<compile_context>
chip_gen: v7x
topology: tpu7x:2x2x1
jax: 0.10.0
libtpu: 0.0.40
codegen_flags: <defaults>
</compile_context>

<pallas_src>
import functools

import numpy as np

import jax
import jax.numpy as jnp
from jax.experimental import pallas as pl
from jax.experimental.pallas import tpu as pltpu

EDGES_NUM = 2
NODE_NUM = 4


# --------------------------------------------------------------------------
# Host-side constant matrices (exact 0/1): upsample + zero-padded 3x3 taps.
# --------------------------------------------------------------------------
def _nearest_up2_matrix(H, W):
    """U (H*W, 4*H*W): (x @ U)[c, q] = x[c, (qy//2)*W + qx//2]  (nearest x2)."""
    H2, W2 = 2 * H, 2 * W
    U = np.zeros((H * W, H2 * W2), np.float32)
    for q in range(H2 * W2):
        qy, qx = divmod(q, W2)
        U[(qy // 2) * W + (qx // 2), q] = 1.0
    return U


def _conv3x3_tap_matrices(H2, W2):
    """S (H2*W2, 9*H2*W2): column block k=(dy*3+dx) shifts by (dy-1, dx-1) with
    zero padding folded in:  (x @ S)[c, k*HW2 + q] = x[c, (qy+dy-1, qx+dx-1)] or 0."""
    HW2 = H2 * W2
    blocks = []
    for dy in range(3):
        for dx in range(3):
            S = np.zeros((HW2, HW2), np.float32)
            for q in range(HW2):
                qy, qx = divmod(q, W2)
                py, px = qy + dy - 1, qx + dx - 1
                if 0 <= py < H2 and 0 <= px < W2:
                    S[py * W2 + px, q] = 1.0
            blocks.append(S)
    return np.concatenate(blocks, axis=1)


# --------------------------------------------------------------------------
# Fused Pallas kernel: the whole UCell forward for one batch element.
# --------------------------------------------------------------------------
def _ucell_fused_kernel(x0_ref, x1_ref, prp_ref, w0_ref, w1_ref, ew_ref,
                        up_ref, sh_ref, cat_ref):
    """All states, upsamples, convs and the EvalCat stay in VMEM/registers.

    x0_ref : (Cpp, H*W)        input0 (one batch element, channels-major)
    x1_ref : (Cp,  H*W)        input1
    prp_ref: (Cs,  H2*W2)      exact upsampled skip (computed in the wrapper)
    w0_ref : (C, Cpp)   bf16   preprocess0 1x1 conv weight (transposed)
    w1_ref : (C, Cp)    bf16   preprocess1 1x1 conv weight (transposed)
    ew_ref : (4, C, 18C) bf16  per-node packed edge-pair 3x3 conv weights
    up_ref : (H*W, H2*W2) bf16 nearest x2 upsample matrix (0/1)
    sh_ref : (H2*W2, 9*H2*W2) bf16  zero-padded 3x3 tap-shift matrices (0/1)
    cat_ref: (Ccat, H2*W2)     EvalCat output (lane-dense store)
    """
    C = w0_ref.shape[0]
    HW2 = sh_ref.shape[0]
    f32, bf16 = jnp.float32, jnp.bfloat16

    def htanh_b(x):
        # hardtanh in f32, then bf16 for native-rate MXU inputs (f32 accumulate).
        return jnp.clip(x.astype(f32), -1.0, 1.0).astype(bf16)

    def pre1x1(x_ref, w_ref):
        # Preprocess: hardtanh + 1x1 conv == (C, Cin) @ (Cin, H*W) on the MXU.
        return jnp.dot(w_ref[...], htanh_b(x_ref[...]),
                       preferred_element_type=f32)

    def up2(a):
        # Nearest x2 upsample as a 0/1 matmul (exact copy of the bf16 values).
        return jnp.dot(a, up_ref[...], preferred_element_type=f32).astype(bf16)

    def conv_pair(h0, h1, n):
        # EvalSum(conv3x3(h0), conv3x3(h1)):
        #   1) ONE 0/1 matmul builds all 9 zero-padded shifted taps (exact),
        #   2) lane-tile-aligned slices + sublane concat restack them to (18C, HW2),
        #   3) ONE (C, 18C) @ (18C, HW2) bf16 contraction, f32 accumulate.
        h01 = jnp.concatenate([h0, h1], axis=0)                      # (2C, HW2)
        wide = jnp.dot(h01, sh_ref[...],
                       preferred_element_type=f32).astype(bf16)      # (2C, 9*HW2)
        patch = jnp.concatenate(
            [wide[:, k * HW2:(k + 1) * HW2] for k in range(9)], axis=0)  # (18C, HW2)
        return jnp.dot(ew_ref[n], patch, preferred_element_type=f32)     # (C, HW2) f32

    # ---- preprocess0 / preprocess1 ----
    s0 = pre1x1(x0_ref, w0_ref)                                      # (C, H*W) f32
    s1 = pre1x1(x1_ref, w1_ref)

    # ---- node 0: both edges stride 2 (nearest x2, then 3x3 conv) ----
    u0 = up2(htanh_b(s0))
    u1 = up2(htanh_b(s1))
    s2 = conv_pair(u0, u1, 0)
    # ---- node 1: edge(s1) stride 2, edge(s2) stride 1 ----
    s3 = conv_pair(u1, htanh_b(s2), 1)
    # ---- node 2 / node 3: both edges stride 1 ----
    s4 = conv_pair(htanh_b(s2), htanh_b(s3), 2)
    s5 = conv_pair(htanh_b(s3), htanh_b(s4), 3)

    # ---- EvalCat: one lane-dense (Ccat, H2*W2) store; skip path stays exact f32 ----
    prp = prp_ref[...].astype(f32)
    cat = jnp.concatenate([s2, s3, s4, s5, prp], axis=0)
    cat_ref[...] = cat.astype(cat_ref.dtype)


# --------------------------------------------------------------------------
# Wrapper (single pallas_call); inputs / outputs in PyTorch NCHW layout.
# --------------------------------------------------------------------------
def ucell_forward(params, input0, input1, skip_input):
    B, Cpp, H, W = input0.shape
    Cp = input1.shape[1]
    Cs = skip_input.shape[1]
    C = params["pre0_w"].shape[1]
    H2, W2 = 2 * H, 2 * W
    HW, HW2 = H * W, H2 * W2
    Ccat = NODE_NUM * C + Cs

    # Host-side packing (once): transposed 1x1 weights, per-node (C, 18C) im2col
    # weights with column order (dy, dx, edge, cin), and the 0/1 constant matrices.
    w0t = params["pre0_w"].T.astype(jnp.bfloat16)                      # (C, Cpp)
    w1t = params["pre1_w"].T.astype(jnp.bfloat16)                      # (C, Cp)
    ew = jnp.stack([
        jnp.stack([params["edge_w"][2 * n], params["edge_w"][2 * n + 1]], axis=2)
           .reshape(18 * C, C).T
        for n in range(NODE_NUM)
    ]).astype(jnp.bfloat16)                                            # (4, C, 18C)
    U = jnp.asarray(_nearest_up2_matrix(H, W), jnp.bfloat16)           # (HW, HW2)
    S = jnp.asarray(_conv3x3_tap_matrices(H2, W2), jnp.bfloat16)       # (HW2, 9*HW2)

    # Channels-major, spatial flattened onto lanes (free contiguous reshapes).
    x0 = input0.reshape(B, Cpp, HW)
    x1 = input1.reshape(B, Cp, HW)
    # Preprocess.skip('u', (2,)): exact nearest x2 upsample, computed once here and
    # fed to the kernel for the in-kernel EvalCat (no in-kernel readback, stays exact).
    prp = jnp.repeat(jnp.repeat(skip_input, 2, axis=2), 2, axis=3)     # (B, Cs, H2, W2)
    prp_flat = prp.reshape(B, Cs, HW2)

    cat = pl.pallas_call(
        _ucell_fused_kernel,
        out_shape=jax.ShapeDtypeStruct((B, Ccat, HW2), input0.dtype),
        grid=(B,),
        in_specs=[
            pl.BlockSpec((None, Cpp, HW), lambda b: (b, 0, 0)),
            pl.BlockSpec((None, Cp, HW), lambda b: (b, 0, 0)),
            pl.BlockSpec((None, Cs, HW2), lambda b: (b, 0, 0)),
            pl.BlockSpec((C, Cpp), lambda b: (0, 0)),
            pl.BlockSpec((C, Cp), lambda b: (0, 0)),
            pl.BlockSpec((NODE_NUM, C, 18 * C), lambda b: (0, 0, 0)),
            pl.BlockSpec((HW, HW2), lambda b: (0, 0)),
            pl.BlockSpec((HW2, 9 * HW2), lambda b: (0, 0)),
        ],
        out_specs=pl.BlockSpec((None, Ccat, HW2), lambda b: (b, 0, 0)),
        compiler_params=pltpu.CompilerParams(
            dimension_semantics=("parallel",)),   # v7x: the 2 TCs split the batch
    )(x0, x1, prp_flat, w0t, w1t, ew, U, S)

    # Undo the lane-dense flattening (contiguous reshape - free).
    return cat.reshape(B, Ccat, H2, W2), prp


# --------------------------------------------------------------------------
# Pure-JAX reference (unfused, f32, NCHW) for a structural correctness check.
# --------------------------------------------------------------------------
def ucell_reference(params, input0, input1, skip_input):
    def htanh(x):
        return jnp.clip(x, -1.0, 1.0)

    def pre(x, w):                               # x: (B,Cin,H,W), w: (Cin,C)
        return jnp.einsum('bchw,cd->bdhw', htanh(x), w)

    def up2(x):
        return jnp.repeat(jnp.repeat(x, 2, axis=2), 2, axis=3)

    def conv3x3(x, w):                           # w: (3,3,Cin,Cout)
        B, Ci, H, W = x.shape
        xp = jnp.pad(x, ((0, 0), (0, 0), (1, 1), (1, 1)))
        acc = jnp.zeros((B, w.shape[-1], H, W), jnp.float32)
        for dy in range(3):
            for dx in range(3):
                acc = acc + jnp.einsum('bchw,cd->bdhw',
                                       xp[:, :, dy:dy + H, dx:dx + W], w[dy, dx])
        return acc

    s0 = pre(input0, params["pre0_w"])
    s1 = pre(input1, params["pre1_w"])
    states = [s0, s1]
    off = 0
    for n in range(NODE_NUM):
        h = list(states[-2:])
        for e in range(EDGES_NUM):
            if n + e <= 1:
                h[e] = up2(h[e])
        s = (conv3x3(htanh(h[0]), params["edge_w"][off]) +
             conv3x3(htanh(h[1]), params["edge_w"][off + 1]))
        off += EDGES_NUM
        states.append(s)
    prp = up2(skip_input)
    states.append(prp)
    return jnp.concatenate(states[-(NODE_NUM + 1):], axis=1), prp


# --------------------------------------------------------------------------
# Deterministic parameter construction + smoke test
# --------------------------------------------------------------------------
def make_params(key, C, C_prev_prev, C_prev):
    n_edges = NODE_NUM * EDGES_NUM
    keys = jax.random.split(key, 2 + n_edges)
    return {
        "pre0_w": jax.random.normal(keys[0], (C_prev_prev, C), jnp.float32)
                  * (1.0 / jnp.sqrt(C_prev_prev)),
        "pre1_w": jax.random.normal(keys[1], (C_prev, C), jnp.float32)
                  * (1.0 / jnp.sqrt(C_prev)),
        "edge_w": [
            jax.random.normal(keys[2 + i], (3, 3, C, C), jnp.float32)
            * (1.0 / jnp.sqrt(9.0 * C))
            for i in range(n_edges)
        ],
    }


if __name__ == "__main__":
    B = 2
    C = 8
    C_prev_prev = 8
    C_prev = 8
    C_skip = 8
    H = W = 8

    key = jax.random.PRNGKey(0)
    kp, k0, k1, ks = jax.random.split(key, 4)
    params = make_params(kp, C, C_prev_prev, C_prev)

    # PyTorch NCHW layout.
    input0 = jax.random.normal(k0, (B, C_prev_prev, H, W), jnp.float32)
    input1 = jax.random.normal(k1, (B, C_prev, H, W), jnp.float32)
    skip_input = jax.random.normal(ks, (B, C_skip, H, W), jnp.float32)

    fwd = jax.jit(functools.partial(ucell_forward, params))
    out_cat, prp = fwd(input0, input1, skip_input)
    jax.block_until_ready((out_cat, prp))

    assert out_cat.shape == (B, NODE_NUM * C + C_skip, 2 * H, 2 * W), out_cat.shape
    assert prp.shape == (B, C_skip, 2 * H, 2 * W), prp.shape
    assert jnp.isfinite(out_cat).all() and jnp.isfinite(prp).all()

    # Structural correctness check vs. an unfused pure-JAX f32 reference.
    ref_cat, ref_prp = jax.jit(functools.partial(ucell_reference, params))(
        input0, input1, skip_input)

    # Skip path is exact (nearest-neighbor copy, no matmul, f32 throughout).
    np.testing.assert_allclose(np.asarray(prp), np.asarray(ref_prp),
                               rtol=0.0, atol=0.0)
    # The prp channels of the in-kernel EvalCat are a pure f32 pass-through copy.
    np.testing.assert_allclose(np.asarray(out_cat[:, NODE_NUM * C:]),
                               np.asarray(prp), rtol=0.0, atol=0.0)
    # Conv states: bf16 MXU inputs (f32 accumulate) -> ~1e-3 level deviation from
    # the f32 reference; 5e-2 still catches any indexing / tap-packing bug (O(1)).
    np.testing.assert_allclose(np.asarray(out_cat), np.asarray(ref_cat),
                               rtol=5e-2, atol=5e-2)

    print("KERNEL_OK")
</pallas_src>

<mosaic_0001>
module attributes {stable_mosaic.version = 11 : i64} {
  func.func @_ucell_fused_kernel(%arg0: i32, %arg1: memref<1x8x64xf32, #tpu.memory_space<vmem>>, %arg2: memref<1x8x64xf32, #tpu.memory_space<vmem>>, %arg3: memref<1x8x256xf32, #tpu.memory_space<vmem>>, %arg4: memref<8x8xbf16, #tpu.memory_space<vmem>>, %arg5: memref<8x8xbf16, #tpu.memory_space<vmem>>, %arg6: memref<4x8x144xbf16, #tpu.memory_space<vmem>>, %arg7: memref<64x256xbf16, #tpu.memory_space<vmem>>, %arg8: memref<256x2304xbf16, #tpu.memory_space<vmem>>, %arg9: memref<1x40x256xf32, #tpu.memory_space<vmem>>) attributes {dimension_semantics = [#tpu.dimension_semantics<parallel>], iteration_bounds = array<i64: 2>, scalar_prefetch = 0 : i64, scratch_operands = 0 : i64, tpu.core_type = #tpu.core_type<tc>, window_params = [{transform_indices = @transform_0, window_bounds = array<i64: 1, 8, 64>}, {transform_indices = @transform_1, window_bounds = array<i64: 1, 8, 64>}, {transform_indices = @transform_2, window_bounds = array<i64: 1, 8, 256>}, {pipeline_mode = #tpu.pipeline_mode<synchronous>, transform_indices = @transform_3, window_bounds = array<i64: 8, 8>}, {pipeline_mode = #tpu.pipeline_mode<synchronous>, transform_indices = @transform_4, window_bounds = array<i64: 8, 8>}, {pipeline_mode = #tpu.pipeline_mode<synchronous>, transform_indices = @transform_5, window_bounds = array<i64: 4, 8, 144>}, {pipeline_mode = #tpu.pipeline_mode<synchronous>, transform_indices = @transform_6, window_bounds = array<i64: 64, 256>}, {pipeline_mode = #tpu.pipeline_mode<synchronous>, transform_indices = @transform_7, window_bounds = array<i64: 256, 2304>}, {transform_indices = @transform_8, window_bounds = array<i64: 1, 40, 256>}]} {
    %c0 = arith.constant 0 : index
    %c0_0 = arith.constant 0 : index
    %0 = vector.load %arg4[%c0, %c0_0] : memref<8x8xbf16, #tpu.memory_space<vmem>>, vector<8x8xbf16>
    %c0_1 = arith.constant 0 : index
    %c0_2 = arith.constant 0 : index
    %c0_3 = arith.constant 0 : index
    %1 = vector.load %arg1[%c0_1, %c0_2, %c0_3] : memref<1x8x64xf32, #tpu.memory_space<vmem>>, vector<1x8x64xf32>
    %2 = vector.shape_cast %1 : vector<1x8x64xf32> to vector<8x64xf32>
    %cst = arith.constant -1.000000e+00 : f32
    %cst_4 = arith.constant 1.000000e+00 : f32
    %3 = vector.broadcast %cst : f32 to vector<8x64xf32>
    %4 = arith.maximumf %3, %2 : vector<8x64xf32>
    %5 = vector.broadcast %cst_4 : f32 to vector<8x64xf32>
    %6 = arith.minimumf %5, %4 : vector<8x64xf32>
    %7 = arith.truncf %6 : vector<8x64xf32> to vector<8x64xbf16>
    %cst_5 = arith.constant dense<0.000000e+00> : vector<8x64xf32>
    %8 = tpu.matmul %0, %7, %cst_5 {dimension_numbers = #tpu.dot_dimension_numbers<[1], [0], [0], [1], [0, 0, 1, 1], [], []>} : vector<8x8xbf16>, vector<8x64xbf16>, vector<8x64xf32> -> vector<8x64xf32>
    %c0_6 = arith.constant 0 : index
    %c0_7 = arith.constant 0 : index
    %9 = vector.load %arg5[%c0_6, %c0_7] : memref<8x8xbf16, #tpu.memory_space<vmem>>, vector<8x8xbf16>
    %c0_8 = arith.constant 0 : index
    %c0_9 = arith.constant 0 : index
    %c0_10 = arith.constant 0 : index
    %10 = vector.load %arg2[%c0_8, %c0_9, %c0_10] : memref<1x8x64xf32, #tpu.memory_space<vmem>>, vector<1x8x64xf32>
    %11 = vector.shape_cast %10 : vector<1x8x64xf32> to vector<8x64xf32>
    %cst_11 = arith.constant -1.000000e+00 : f32
    %cst_12 = arith.constant 1.000000e+00 : f32
    %12 = vector.broadcast %cst_11 : f32 to vector<8x64xf32>
    %13 = arith.maximumf %12, %11 : vector<8x64xf32>
    %14 = vector.broadcast %cst_12 : f32 to vector<8x64xf32>
    %15 = arith.minimumf %14, %13 : vector<8x64xf32>
    %16 = arith.truncf %15 : vector<8x64xf32> to vector<8x64xbf16>
    %cst_13 = arith.constant dense<0.000000e+00> : vector<8x64xf32>
    %17 = tpu.matmul %9, %16, %cst_13 {dimension_numbers = #tpu.dot_dimension_numbers<[1], [0], [0], [1], [0, 0, 1, 1], [], []>} : vector<8x8xbf16>, vector<8x64xbf16>, vector<8x64xf32> -> vector<8x64xf32>
    %cst_14 = arith.constant -1.000000e+00 : f32
    %cst_15 = arith.constant 1.000000e+00 : f32
    %18 = vector.broadcast %cst_14 : f32 to vector<8x64xf32>
    %19 = arith.maximumf %18, %8 : vector<8x64xf32>
    %20 = vector.broadcast %cst_15 : f32 to vector<8x64xf32>
    %21 = arith.minimumf %20, %19 : vector<8x64xf32>
    %22 = arith.truncf %21 : vector<8x64xf32> to vector<8x64xbf16>
    %c0_16 = arith.constant 0 : index
    %c0_17 = arith.constant 0 : index
    %23 = vector.load %arg7[%c0_16, %c0_17] : memref<64x256xbf16, #tpu.memory_space<vmem>>, vector<64x256xbf16>
    %cst_18 = arith.constant dense<0.000000e+00> : vector<8x256xf32>
    %24 = tpu.matmul %22, %23, %cst_18 {dimension_numbers = #tpu.dot_dimension_numbers<[1], [0], [0], [1], [0, 0, 1, 1], [], []>} : vector<8x64xbf16>, vector<64x256xbf16>, vector<8x256xf32> -> vector<8x256xf32>
    %25 = arith.truncf %24 : vector<8x256xf32> to vector<8x256xbf16>
    %cst_19 = arith.constant -1.000000e+00 : f32
    %cst_20 = arith.constant 1.000000e+00 : f32
    %26 = vector.broadcast %cst_19 : f32 to vector<8x64xf32>
    %27 = arith.maximumf %26, %17 : vector<8x64xf32>
    %28 = vector.broadcast %cst_20 : f32 to vector<8x64xf32>
    %29 = arith.minimumf %28, %27 : vector<8x64xf32>
    %30 = arith.truncf %29 : vector<8x64xf32> to vector<8x64xbf16>
    %c0_21 = arith.constant 0 : index
    %c0_22 = arith.constant 0 : index
    %31 = vector.load %arg7[%c0_21, %c0_22] : memref<64x256xbf16, #tpu.memory_space<vmem>>, vector<64x256xbf16>
    %cst_23 = arith.constant dense<0.000000e+00> : vector<8x256xf32>
    %32 = tpu.matmul %30, %31, %cst_23 {dimension_numbers = #tpu.dot_dimension_numbers<[1], [0], [0], [1], [0, 0, 1, 1], [], []>} : vector<8x64xbf16>, vector<64x256xbf16>, vector<8x256xf32> -> vector<8x256xf32>
    %33 = arith.truncf %32 : vector<8x256xf32> to vector<8x256xbf16>
    %34 = tpu.concatenate %25, %33 in 0 : vector<8x256xbf16>, vector<8x256xbf16> -> vector<16x256xbf16>
    %c0_24 = arith.constant 0 : index
    %c0_25 = arith.constant 0 : index
    %35 = vector.load %arg8[%c0_24, %c0_25] : memref<256x2304xbf16, #tpu.memory_space<vmem>>, vector<256x2304xbf16>
    %cst_26 = arith.constant dense<0.000000e+00> : vector<16x2304xf32>
    %36 = tpu.matmul %34, %35, %cst_26 {dimension_numbers = #tpu.dot_dimension_numbers<[1], [0], [0], [1], [0, 0, 1, 1], [], []>} : vector<16x256xbf16>, vector<256x2304xbf16>, vector<16x2304xf32> -> vector<16x2304xf32>
    %37 = arith.truncf %36 : vector<16x2304xf32> to vector<16x2304xbf16>
    %38 = vector.extract_strided_slice %37 {offsets = [0, 0], sizes = [16, 256], strides = [1, 1]} : vector<16x2304xbf16> to vector<16x256xbf16>
    %39 = vector.extract_strided_slice %37 {offsets = [0, 256], sizes = [16, 256], strides = [1, 1]} : vector<16x2304xbf16> to vector<16x256xbf16>
    %40 = vector.extract_strided_slice %37 {offsets = [0, 512], sizes = [16, 256], strides = [1, 1]} : vector<16x2304xbf16> to vector<16x256xbf16>
    %41 = vector.extract_strided_slice %37 {offsets = [0, 768], sizes = [16, 256], strides = [1, 1]} : vector<16x2304xbf16> to vector<16x256xbf16>
    %42 = vector.extract_strided_slice %37 {offsets = [0, 1024], sizes = [16, 256], strides = [1, 1]} : vector<16x2304xbf16> to vector<16x256xbf16>
    %43 = vector.extract_strided_slice %37 {offsets = [0, 1280], sizes = [16, 256], strides = [1, 1]} : vector<16x2304xbf16> to vector<16x256xbf16>
    %44 = vector.extract_strided_slice %37 {offsets = [0, 1536], sizes = [16, 256], strides = [1, 1]} : vector<16x2304xbf16> to vector<16x256xbf16>
    %45 = vector.extract_strided_slice %37 {offsets = [0, 1792], sizes = [16, 256], strides = [1, 1]} : vector<16x2304xbf16> to vector<16x256xbf16>
    %46 = vector.extract_strided_slice %37 {offsets = [0, 2048], sizes = [16, 256], strides = [1, 1]} : vector<16x2304xbf16> to vector<16x256xbf16>
    %47 = tpu.concatenate %38, %39, %40, %41, %42, %43, %44, %45, %46 in 0 : vector<16x256xbf16>, vector<16x256xbf16>, vector<16x256xbf16>, vector<16x256xbf16>, vector<16x256xbf16>, vector<16x256xbf16>, vector<16x256xbf16>, vector<16x256xbf16>, vector<16x256xbf16> -> vector<144x256xbf16>
    %c0_27 = arith.constant 0 : index
    %c0_28 = arith.constant 0 : index
    %c0_29 = arith.constant 0 : index
    %48 = vector.load %arg6[%c0_27, %c0_28, %c0_29] : memref<4x8x144xbf16, #tpu.memory_space<vmem>>, vector<1x8x144xbf16>
    %49 = vector.shape_cast %48 : vector<1x8x144xbf16> to vector<8x144xbf16>
    %cst_30 = arith.constant dense<0.000000e+00> : vector<8x256xf32>
    %50 = tpu.matmul %49, %47, %cst_30 {dimension_numbers = #tpu.dot_dimension_numbers<[1], [0], [0], [1], [0, 0, 1, 1], [], []>} : vector<8x144xbf16>, vector<144x256xbf16>, vector<8x256xf32> -> vector<8x256xf32>
    %cst_31 = arith.constant -1.000000e+00 : f32
    %cst_32 = arith.constant 1.000000e+00 : f32
    %51 = vector.broadcast %cst_31 : f32 to vector<8x256xf32>
    %52 = arith.maximumf %51, %50 : vector<8x256xf32>
    %53 = vector.broadcast %cst_32 : f32 to vector<8x256xf32>
    %54 = arith.minimumf %53, %52 : vector<8x256xf32>
    %55 = arith.truncf %54 : vector<8x256xf32> to vector<8x256xbf16>
    %56 = tpu.concatenate %33, %55 in 0 : vector<8x256xbf16>, vector<8x256xbf16> -> vector<16x256xbf16>
    %c0_33 = arith.constant 0 : index
    %c0_34 = arith.constant 0 : index
    %57 = vector.load %arg8[%c0_33, %c0_34] : memref<256x2304xbf16, #tpu.memory_space<vmem>>, vector<256x2304xbf16>
    %cst_35 = arith.constant dense<0.000000e+00> : vector<16x2304xf32>
    %58 = tpu.matmul %56, %57, %cst_35 {dimension_numbers = #tpu.dot_dimension_numbers<[1], [0], [0], [1], [0, 0, 1, 1], [], []>} : vector<16x256xbf16>, vector<256x2304xbf16>, vector<16x2304xf32> -> vector<16x2304xf32>
    %59 = arith.truncf %58 : vector<16x2304xf32> to vector<16x2304xbf16>
    %60 = vector.extract_strided_slice %59 {offsets = [0, 0], sizes = [16, 256], strides = [1, 1]} : vector<16x2304xbf16> to vector<16x256xbf16>
    %61 = vector.extract_strided_slice %59 {offsets = [0, 256], sizes = [16, 256], strides = [1, 1]} : vector<16x2304xbf16> to vector<16x256xbf16>
    %62 = vector.extract_strided_slice %59 {offsets = [0, 512], sizes = [16, 256], strides = [1, 1]} : vector<16x2304xbf16> to vector<16x256xbf16>
    %63 = vector.extract_strided_slice %59 {offsets = [0, 768], sizes = [16, 256], strides = [1, 1]} : vector<16x2304xbf16> to vector<16x256xbf16>
    %64 = vector.extract_strided_slice %59 {offsets = [0, 1024], sizes = [16, 256], strides = [1, 1]} : vector<16x2304xbf16> to vector<16x256xbf16>
    %65 = vector.extract_strided_slice %59 {offsets = [0, 1280], sizes = [16, 256], strides = [1, 1]} : vector<16x2304xbf16> to vector<16x256xbf16>
    %66 = vector.extract_strided_slice %59 {offsets = [0, 1536], sizes = [16, 256], strides = [1, 1]} : vector<16x2304xbf16> to vector<16x256xbf16>
    %67 = vector.extract_strided_slice %59 {offsets = [0, 1792], sizes = [16, 256], strides = [1, 1]} : vector<16x2304xbf16> to vector<16x256xbf16>
    %68 = vector.extract_strided_slice %59 {offsets = [0, 2048], sizes = [16, 256], strides = [1, 1]} : vector<16x2304xbf16> to vector<16x256xbf16>
    %69 = tpu.concatenate %60, %61, %62, %63, %64, %65, %66, %67, %68 in 0 : vector<16x256xbf16>, vector<16x256xbf16>, vector<16x256xbf16>, vector<16x256xbf16>, vector<16x256xbf16>, vector<16x256xbf16>, vector<16x256xbf16>, vector<16x256xbf16>, vector<16x256xbf16> -> vector<144x256xbf16>
    %c1 = arith.constant 1 : index
    %c0_36 = arith.constant 0 : index
    %c0_37 = arith.constant 0 : index
    %70 = vector.load %arg6[%c1, %c0_36, %c0_37] : memref<4x8x144xbf16, #tpu.memory_space<vmem>>, vector<1x8x144xbf16>
    %71 = vector.shape_cast %70 : vector<1x8x144xbf16> to vector<8x144xbf16>
    %cst_38 = arith.constant dense<0.000000e+00> : vector<8x256xf32>
    %72 = tpu.matmul %71, %69, %cst_38 {dimension_numbers = #tpu.dot_dimension_numbers<[1], [0], [0], [1], [0, 0, 1, 1], [], []>} : vector<8x144xbf16>, vector<144x256xbf16>, vector<8x256xf32> -> vector<8x256xf32>
    %cst_39 = arith.constant -1.000000e+00 : f32
    %cst_40 = arith.constant 1.000000e+00 : f32
    %73 = vector.broadcast %cst_39 : f32 to vector<8x256xf32>
    %74 = arith.maximumf %73, %50 : vector<8x256xf32>
    %75 = vector.broadcast %cst_40 : f32 to vector<8x256xf32>
    %76 = arith.minimumf %75, %74 : vector<8x256xf32>
    %77 = arith.truncf %76 : vector<8x256xf32> to vector<8x256xbf16>
    %cst_41 = arith.constant -1.000000e+00 : f32
    %cst_42 = arith.constant 1.000000e+00 : f32
    %78 = vector.broadcast %cst_41 : f32 to vector<8x256xf32>
    %79 = arith.maximumf %78, %72 : vector<8x256xf32>
    %80 = vector.broadcast %cst_42 : f32 to vector<8x256xf32>
    %81 = arith.minimumf %80, %79 : vector<8x256xf32>
    %82 = arith.truncf %81 : vector<8x256xf32> to vector<8x256xbf16>
    %83 = tpu.concatenate %77, %82 in 0 : vector<8x256xbf16>, vector<8x256xbf16> -> vector<16x256xbf16>
    %c0_43 = arith.constant 0 : index
    %c0_44 = arith.constant 0 : index
    %84 = vector.load %arg8[%c0_43, %c0_44] : memref<256x2304xbf16, #tpu.memory_space<vmem>>, vector<256x2304xbf16>
    %cst_45 = arith.constant dense<0.000000e+00> : vector<16x2304xf32>
    %85 = tpu.matmul %83, %84, %cst_45 {dimension_numbers = #tpu.dot_dimension_numbers<[1], [0], [0], [1], [0, 0, 1, 1], [], []>} : vector<16x256xbf16>, vector<256x2304xbf16>, vector<16x2304xf32> -> vector<16x2304xf32>
    %86 = arith.truncf %85 : vector<16x2304xf32> to vector<16x2304xbf16>
    %87 = vector.extract_strided_slice %86 {offsets = [0, 0], sizes = [16, 256], strides = [1, 1]} : vector<16x2304xbf16> to vector<16x256xbf16>
    %88 = vector.extract_strided_slice %86 {offsets = [0, 256], sizes = [16, 256], strides = [1, 1]} : vector<16x2304xbf16> to vector<16x256xbf16>
    %89 = vector.extract_strided_slice %86 {offsets = [0, 512], sizes = [16, 256], strides = [1, 1]} : vector<16x2304xbf16> to vector<16x256xbf16>
    %90 = vector.extract_strided_slice %86 {offsets = [0, 768], sizes = [16, 256], strides = [1, 1]} : vector<16x2304xbf16> to vector<16x256xbf16>
    %91 = vector.extract_strided_slice %86 {offsets = [0, 1024], sizes = [16, 256], strides = [1, 1]} : vector<16x2304xbf16> to vector<16x256xbf16>
    %92 = vector.extract_strided_slice %86 {offsets = [0, 1280], sizes = [16, 256], strides = [1, 1]} : vector<16x2304xbf16> to vector<16x256xbf16>
    %93 = vector.extract_strided_slice %86 {offsets = [0, 1536], sizes = [16, 256], strides = [1, 1]} : vector<16x2304xbf16> to vector<16x256xbf16>
    %94 = vector.extract_strided_slice %86 {offsets = [0, 1792], sizes = [16, 256], strides = [1, 1]} : vector<16x2304xbf16> to vector<16x256xbf16>
    %95 = vector.extract_strided_slice %86 {offsets = [0, 2048], sizes = [16, 256], strides = [1, 1]} : vector<16x2304xbf16> to vector<16x256xbf16>
    %96 = tpu.concatenate %87, %88, %89, %90, %91, %92, %93, %94, %95 in 0 : vector<16x256xbf16>, vector<16x256xbf16>, vector<16x256xbf16>, vector<16x256xbf16>, vector<16x256xbf16>, vector<16x256xbf16>, vector<16x256xbf16>, vector<16x256xbf16>, vector<16x256xbf16> -> vector<144x256xbf16>
    %c2 = arith.constant 2 : index
    %c0_46 = arith.constant 0 : index
    %c0_47 = arith.constant 0 : index
    %97 = vector.load %arg6[%c2, %c0_46, %c0_47] : memref<4x8x144xbf16, #tpu.memory_space<vmem>>, vector<1x8x144xbf16>
    %98 = vector.shape_cast %97 : vector<1x8x144xbf16> to vector<8x144xbf16>
    %cst_48 = arith.constant dense<0.000000e+00> : vector<8x256xf32>
    %99 = tpu.matmul %98, %96, %cst_48 {dimension_numbers = #tpu.dot_dimension_numbers<[1], [0], [0], [1], [0, 0, 1, 1], [], []>} : vector<8x144xbf16>, vector<144x256xbf16>, vector<8x256xf32> -> vector<8x256xf32>
    %cst_49 = arith.constant -1.000000e+00 : f32
    %cst_50 = arith.constant 1.000000e+00 : f32
    %100 = vector.broadcast %cst_49 : f32 to vector<8x256xf32>
    %101 = arith.maximumf %100, %72 : vector<8x256xf32>
    %102 = vector.broadcast %cst_50 : f32 to vector<8x256xf32>
    %103 = arith.minimumf %102, %101 : vector<8x256xf32>
    %104 = arith.truncf %103 : vector<8x256xf32> to vector<8x256xbf16>
    %cst_51 = arith.constant -1.000000e+00 : f32
    %cst_52 = arith.constant 1.000000e+00 : f32
    %105 = vector.broadcast %cst_51 : f32 to vector<8x256xf32>
    %106 = arith.maximumf %105, %99 : vector<8x256xf32>
    %107 = vector.broadcast %cst_52 : f32 to vector<8x256xf32>
    %108 = arith.minimumf %107, %106 : vector<8x256xf32>
    %109 = arith.truncf %108 : vector<8x256xf32> to vector<8x256xbf16>
    %110 = tpu.concatenate %104, %109 in 0 : vector<8x256xbf16>, vector<8x256xbf16> -> vector<16x256xbf16>
    %c0_53 = arith.constant 0 : index
    %c0_54 = arith.constant 0 : index
    %111 = vector.load %arg8[%c0_53, %c0_54] : memref<256x2304xbf16, #tpu.memory_space<vmem>>, vector<256x2304xbf16>
    %cst_55 = arith.constant dense<0.000000e+00> : vector<16x2304xf32>
    %112 = tpu.matmul %110, %111, %cst_55 {dimension_numbers = #tpu.dot_dimension_numbers<[1], [0], [0], [1], [0, 0, 1, 1], [], []>} : vector<16x256xbf16>, vector<256x2304xbf16>, vector<16x2304xf32> -> vector<16x2304xf32>
    %113 = arith.truncf %112 : vector<16x2304xf32> to vector<16x2304xbf16>
    %114 = vector.extract_strided_slice %113 {offsets = [0, 0], sizes = [16, 256], strides = [1, 1]} : vector<16x2304xbf16> to vector<16x256xbf16>
    %115 = vector.extract_strided_slice %113 {offsets = [0, 256], sizes = [16, 256], strides = [1, 1]} : vector<16x2304xbf16> to vector<16x256xbf16>
    %116 = vector.extract_strided_slice %113 {offsets = [0, 512], sizes = [16, 256], strides = [1, 1]} : vector<16x2304xbf16> to vector<16x256xbf16>
    %117 = vector.extract_strided_slice %113 {offsets = [0, 768], sizes = [16, 256], strides = [1, 1]} : vector<16x2304xbf16> to vector<16x256xbf16>
    %118 = vector.extract_strided_slice %113 {offsets = [0, 1024], sizes = [16, 256], strides = [1, 1]} : vector<16x2304xbf16> to vector<16x256xbf16>
    %119 = vector.extract_strided_slice %113 {offsets = [0, 1280], sizes = [16, 256], strides = [1, 1]} : vector<16x2304xbf16> to vector<16x256xbf16>
    %120 = vector.extract_strided_slice %113 {offsets = [0, 1536], sizes = [16, 256], strides = [1, 1]} : vector<16x2304xbf16> to vector<16x256xbf16>
    %121 = vector.extract_strided_slice %113 {offsets = [0, 1792], sizes = [16, 256], strides = [1, 1]} : vector<16x2304xbf16> to vector<16x256xbf16>
    %122 = vector.extract_strided_slice %113 {offsets = [0, 2048], sizes = [16, 256], strides = [1, 1]} : vector<16x2304xbf16> to vector<16x256xbf16>
    %123 = tpu.concatenate %114, %115, %116, %117, %118, %119, %120, %121, %122 in 0 : vector<16x256xbf16>, vector<16x256xbf16>, vector<16x256xbf16>, vector<16x256xbf16>, vector<16x256xbf16>, vector<16x256xbf16>, vector<16x256xbf16>, vector<16x256xbf16>, vector<16x256xbf16> -> vector<144x256xbf16>
    %c3 = arith.constant 3 : index
    %c0_56 = arith.constant 0 : index
    %c0_57 = arith.constant 0 : index
    %124 = vector.load %arg6[%c3, %c0_56, %c0_57] : memref<4x8x144xbf16, #tpu.memory_space<vmem>>, vector<1x8x144xbf16>
    %125 = vector.shape_cast %124 : vector<1x8x144xbf16> to vector<8x144xbf16>
    %cst_58 = arith.constant dense<0.000000e+00> : vector<8x256xf32>
    %126 = tpu.matmul %125, %123, %cst_58 {dimension_numbers = #tpu.dot_dimension_numbers<[1], [0], [0], [1], [0, 0, 1, 1], [], []>} : vector<8x144xbf16>, vector<144x256xbf16>, vector<8x256xf32> -> vector<8x256xf32>
    %c0_59 = arith.constant 0 : index
    %c0_60 = arith.constant 0 : index
    %c0_61 = arith.constant 0 : index
    %127 = vector.load %arg3[%c0_59, %c0_60, %c0_61] : memref<1x8x256xf32, #tpu.memory_space<vmem>>, vector<1x8x256xf32>
    %128 = vector.shape_cast %127 : vector<1x8x256xf32> to vector<8x256xf32>
    %129 = tpu.concatenate %50, %72, %99, %126, %128 in 0 : vector<8x256xf32>, vector<8x256xf32>, vector<8x256xf32>, vector<8x256xf32>, vector<8x256xf32> -> vector<40x256xf32>
    %c0_62 = arith.constant 0 : index
    %c0_63 = arith.constant 0 : index
    %c0_64 = arith.constant 0 : index
    %130 = vector.load %arg9[%c0_62, %c0_63, %c0_64] : memref<1x40x256xf32, #tpu.memory_space<vmem>>, vector<1x40x256xf32>
    %131 = vector.shape_cast %130 : vector<1x40x256xf32> to vector<40x256xf32>
    %132 = vector.shape_cast %129 : vector<40x256xf32> to vector<1x40x256xf32>
    tpu.vector_store %arg9[%c0_62, %c0_63, %c0_64], %132 {strides = array<i32>} : memref<1x40x256xf32, #tpu.memory_space<vmem>>, vector<1x40x256xf32>,
    return
  }
  func.func @transform_0(%arg0: i32) -> (i32, i32, i32) {
    %c0_i32 = arith.constant 0 : i32
    %c0_i32_0 = arith.constant 0 : i32
    %c0_i32_1 = arith.constant 0 : i32
    return %arg0, %c0_i32, %c0_i32_0 : i32, i32, i32
  }
  func.func @transform_1(%arg0: i32) -> (i32, i32, i32) {
    %c0_i32 = arith.constant 0 : i32
    %c0_i32_0 = arith.constant 0 : i32
    %c0_i32_1 = arith.constant 0 : i32
    return %arg0, %c0_i32, %c0_i32_0 : i32, i32, i32
  }
  func.func @transform_2(%arg0: i32) -> (i32, i32, i32) {
    %c0_i32 = arith.constant 0 : i32
    %c0_i32_0 = arith.constant 0 : i32
    %c0_i32_1 = arith.constant 0 : i32
    return %arg0, %c0_i32, %c0_i32_0 : i32, i32, i32
  }
  func.func @transform_3(%arg0: i32) -> (i32, i32) {
    %c0_i32 = arith.constant 0 : i32
    %c0_i32_0 = arith.constant 0 : i32
    %c0_i32_1 = arith.constant 0 : i32
    return %c0_i32, %c0_i32_0 : i32, i32
  }
  func.func @transform_4(%arg0: i32) -> (i32, i32) {
    %c0_i32 = arith.constant 0 : i32
    %c0_i32_0 = arith.constant 0 : i32
    %c0_i32_1 = arith.constant 0 : i32
    return %c0_i32, %c0_i32_0 : i32, i32
  }
  func.func @transform_5(%arg0: i32) -> (i32, i32, i32) {
    %c0_i32 = arith.constant 0 : i32
    %c0_i32_0 = arith.constant 0 : i32
    %c0_i32_1 = arith.constant 0 : i32
    %c0_i32_2 = arith.constant 0 : i32
    return %c0_i32, %c0_i32_0, %c0_i32_1 : i32, i32, i32
  }
  func.func @transform_6(%arg0: i32) -> (i32, i32) {
    %c0_i32 = arith.constant 0 : i32
    %c0_i32_0 = arith.constant 0 : i32
    %c0_i32_1 = arith.constant 0 : i32
    return %c0_i32, %c0_i32_0 : i32, i32
  }
  func.func @transform_7(%arg0: i32) -> (i32, i32) {
    %c0_i32 = arith.constant 0 : i32
    %c0_i32_0 = arith.constant 0 : i32
    %c0_i32_1 = arith.constant 0 : i32
    return %c0_i32, %c0_i32_0 : i32, i32
  }
  func.func @transform_8(%arg0: i32) -> (i32, i32, i32) {
    %c0_i32 = arith.constant 0 : i32
    %c0_i32_0 = arith.constant 0 : i32
    %c0_i32_1 = arith.constant 0 : i32
    return %arg0, %c0_i32, %c0_i32_0 : i32, i32, i32
  }
}

</mosaic_0001>

<bundles_post_ra>
// kernel: ucell_forward.1
= control target key start
LH: loop header
LB: loop body
LE: loop exit
PB: predicated region body
PF: predicated region fallthrough
CT: control target
= control target key end

     0   :  { %s5645_s27 = smov 0   ;;  %s9702_s0 = inlined_call_operand.vmem [shape: f32[2,8,64], index: 0, kind: input, shape index: {}]   ;;  %s9703_s1 = inlined_call_operand.vmem [shape: f32[2,8,64], index: 1, kind: input, shape index: {}]   ;;  %s9704_s2 = inlined_call_operand.vmem [shape: f32[2,8,256], index: 2, kind: input, shape index: {}]   ;;  %s9705_s3 = inlined_call_operand.vmem [shape: bf16[8,8], index: 3, kind: input, shape index: {}]   ;;  %s9706_s4 = inlined_call_operand.vmem [shape: bf16[8,8], index: 4, kind: input, shape index: {}]   ;;  %s9707_s5 = inlined_call_operand.vmem [shape: bf16[4,8,144], index: 5, kind: input, shape index: {}]   ;;  %s9708_s6 = inlined_call_operand.vmem [shape: bf16[64,256], index: 6, kind: input, shape index: {}]   ;;  %s9709_s7 = inlined_call_operand.vmem [shape: bf16[256,2304], index: 7, kind: input, shape index: {}]   ;;  %s9710_s8 = inlined_call_operand.vmem [shape: f32[2,40,256], index: 8, kind: output, shape index: {}]  }
   0x1 LB: > { %s4305_s28 = sadd.s32 4294967295, %s5595_s27   ;;  %p4309_p0 = scmp.ge.s32.totalorder %s5595_s27, 1  ;;  %s5595_s27 = sphi %s5645_s27, %s18_s27  }
   0x2   : > { %p280_p1 = scmp.lt.s32.totalorder %s5595_s27, 3 }
   0x4   : > { %p281_p2 = pnand %p4309_p0, %p280_p1 }
   0x6   : > { %284 = sbr.rel (%p281_p2) target bundleno = 3250 (0xcb2), region = 52 }
   0xd   : > { %p322_p3 = scmp.lt.s32.totalorder %s4305_s28, 1  ;;  %v5597_v0 = vmov 0.0   ;;  %vm5598_vm0 = vmmov 0   ;;  %v4673_v6 = vld [vmem:[%s9708_s6 + $0x4] ss:$8 sps:$4 sm:$0xff]   ;;  %vm350_vm1 = vcmask 1043456  }
   0xe   : > { %4647 = vmatprep.subr.bf16.mxu0 %v5597_v0  ;;  %4653 = vmatprep.subr.bf16.mxu1 %v5597_v0  ;;  %v341_v10 = vld [vmem:[%s9705_s3] sm:$0xf]  ;;  %v4676_v14 = vld [vmem:[%s9708_s6 + $0x14] ss:$8 sps:$4 sm:$0xff]   ;;  %vm346_vm2 = vcmask 64512   ;;  %v5599_v21 = vmov 0  }
   0xf   : > { %s10600_s28 = smov (!%p322_p3, %s4305_s28), 1  ;;  %4649 = vmatprep.mubr.msk.bf16.mxu0 %vm5598_vm0, %v5597_v0  ;;  %4655 = vmatprep.mubr.msk.bf16.mxu1 %vm5598_vm0, %v5597_v0  ;;  %v4671_v11 = vld [vmem:[%s9708_s6] ss:$8 sps:$4 sm:$0xff]   ;;  %v4674_v16 = vld [vmem:[%s9708_s6 + $0x10] ss:$8 sps:$4 sm:$0xff]   ;;  %vm496_vm3 = vcmask 523264  }
  0x10   : > { %s4310_s29 = sshll.u32 %s10600_s28, 3  ;;  %s4642_s30 = sshll.u32 %s10600_s28, 4  ;;  %v394_v13 = vld [vmem:[%s9706_s4] sm:$0xf]  ;;  %v4679_v17 = vld [vmem:[%s9708_s6 + $0x24] ss:$8 sps:$4 sm:$0xff]  }
  0x11   : > { %s325_s11 = scalar_lea.vmem %s9702_s0, %s4310_s29  ;;  %s334_s14 = scalar_lea.vmem %s9704_s2, %s4642_s30  ;;  %v4677_v18 = vld [vmem:[%s9708_s6 + $0x20] ss:$8 sps:$4 sm:$0xff]   ;;  %v4682_v19 = vld [vmem:[%s9708_s6 + $0x34] ss:$8 sps:$4 sm:$0xff]   ;;  %v4680_v20 = vld [vmem:[%s9708_s6 + $0x30] ss:$8 sps:$4 sm:$0xff]  }
  0x12   : > { %s4659_s15 = smul.u32 80, %s10600_s28  ;;  %v342_v1 = vld [vmem:[%s325_s11] sm:$0xff]  ;;  %v4215_v3 = vld [vmem:[%s334_s14 + $0x8] sm:$0xff]  ;;  %s329_s18 = scalar_lea.vmem %s9703_s1, %s4310_s29  ;;  %v4689_v36 = vld [vmem:[%s9709_s7 + $0x94] ss:$72 sps:$4 sm:$0xff]   ;;  %vm2744_vm4 = vcmask 130048  }
  0x13   : > { %v4214_v2 = vld [vmem:[%s334_s14] sm:$0xff]  ;;  %v4315_v4 = vclamps-f32 %v342_v1, 1.0  ;;  %v4685_v23 = vld [vmem:[%s9709_s7 + $0xc] ss:$72 sps:$4 sm:$0xff]   ;;  %v4688_v35 = vld [vmem:[%s9709_s7 + $0x8] ss:$72 sps:$4 sm:$0xff]  }
  0x14   : > { %v395_v5 = vld [vmem:[%s329_s18] sm:$0xff]  ;;  %s5668_s23 = scalar_lea.vmem %s9710_s8, %s4659_s15  ;;  %v4693_v40 = vld [vmem:[%s9709_s7 + $0x90] ss:$72 sps:$4 sm:$0xff]   ;;  %v4697_v43 = vld [vmem:[%s9709_s7 + $0x12c] ss:$72 sps:$4 sm:$0xff]  }
  0x15   : > { %v4317_v7 = vclamps-f32 %v395_v5, 1.0  ;;  %v345_v8 = vpack.c.bf16 %v4315_v4, %v4315_v4  ;;  %4224 = vst [vmem:[%s5668_s23 + $0x40] sm:$0xff] %v4214_v2  ;;  %4225 = vst [vmem:[%s5668_s23 + $0x48] sm:$0xff] %v4215_v3  ;;  %v4683_v22 = vld [vmem:[%s9709_s7 + $0x4] ss:$72 sps:$4 sm:$0xff]  }
  0x16   : > { %v4687_v31 = vld [vmem:[%s9709_s7] ss:$72 sps:$4 sm:$0xff]   ;;  %v4691_v39 = vld [vmem:[%s9709_s7 + $0x9c] ss:$72 sps:$4 sm:$0xff]   ;;  %v4705_v48 = vld [vmem:[%s9709_s7 + $0x1b0] ss:$72 sps:$4 sm:$0xff]  }
  0x17   : > { %v398_v9 = vpack.c.bf16 %v4317_v7, %v4317_v7  ;;  %v352_v12 = vsel %vm350_vm1, %v345_v8, 0  ;;  %v4694_v41 = vld [vmem:[%s9709_s7 + $0x98] ss:$72 sps:$4 sm:$0xff]   ;;  %v4695_v42 = vld [vmem:[%s9709_s7 + $0x124] ss:$72 sps:$4 sm:$0xff]  }
  0x18   : > { %4648 = vmatpush3.bf16.msra.mxu0 %v352_v12  ;;  %v4699_v44 = vld [vmem:[%s9709_s7 + $0x120] ss:$72 sps:$4 sm:$0xff]   ;;  %v4701_v46 = vld [vmem:[%s9709_s7 + $0x1b4] ss:$72 sps:$4 sm:$0xff]   ;;  %v4707_v50 = vld [vmem:[%s9709_s7 + $0x244] ss:$72 sps:$4 sm:$0xff]  }
  0x19   : > { %v403_v15 = vsel %vm350_vm1, %v398_v9, 0  ;;  %500 = vmatprep.subr.bf16.mxu0 %v4673_v6  ;;  %v4700_v45 = vld [vmem:[%s9709_s7 + $0x128] ss:$72 sps:$4 sm:$0xff]   ;;  %v4703_v47 = vld [vmem:[%s9709_s7 + $0x1bc] ss:$72 sps:$4 sm:$0xff]  }
  0x1a   : > { %4654 = vmatpush3.bf16.msra.mxu1 %v403_v15  ;;  %v4706_v49 = vld [vmem:[%s9709_s7 + $0x1b8] ss:$72 sps:$4 sm:$0xff]   ;;  %v4709_v51 = vld [vmem:[%s9709_s7 + $0x24c] ss:$72 sps:$4 sm:$0xff]   ;;  %v4712_v53 = vld [vmem:[%s9709_s7 + $0x248] ss:$72 sps:$4 sm:$0xff]  }
  0x1b   : > { %549 = vmatprep.subr.bf16.mxu1 %v4673_v6  ;;  %4650 = vmatmul.mubr.msk.bf16.vlgmr.msra.gmra.mrb[0].mxu0 %vm346_vm2, %v341_v10  ;;  %v4711_v52 = vld [vmem:[%s9709_s7 + $0x240] ss:$72 sps:$4 sm:$0xff]   ;;  %v4713_v54 = vld [vmem:[%s9709_s7 + $0x2d4] ss:$72 sps:$4 sm:$0xff]   ;;  %v4717_v56 = vld [vmem:[%s9709_s7 + $0x2d0] ss:$72 sps:$4 sm:$0xff]  }
  0x1c   : > { %501 = vmatpush1.bf16.msra.mxu0 %v4671_v11  ;;  %532 = vmatprep.mubr.bf16.mxu0 %v5599_v21  ;;  %v4715_v55 = vld [vmem:[%s9709_s7 + $0x2dc] ss:$72 sps:$4 sm:$0xff]   ;;  %v4718_v57 = vld [vmem:[%s9709_s7 + $0x2d8] ss:$72 sps:$4 sm:$0xff]   ;;  %v4721_v59 = vld [vmem:[%s9709_s7 + $0x36c] ss:$72 sps:$4 sm:$0xff]  }
  0x1d   : > { %4656 = vmatmul.mubr.msk.bf16.vlgmr.msra.gmra.mrb[0].mxu1 %vm346_vm2, %v394_v13  ;;  %502 = vmatprep.subr.bf16.mxu0 %v4676_v14  ;;  %v4719_v58 = vld [vmem:[%s9709_s7 + $0x364] ss:$72 sps:$4 sm:$0xff]   ;;  %v4723_v60 = vld [vmem:[%s9709_s7 + $0x360] ss:$72 sps:$4 sm:$0xff]   ;;  %v4725_v62 = vld [vmem:[%s9709_s7 + $0x3f4] ss:$72 sps:$4 sm:$0xff]  }
  0x1e   : > { %550 = vmatpush1.bf16.msra.mxu1 %v4671_v11  ;;  %581 = vmatprep.mubr.bf16.mxu1 %v5599_v21  ;;  %v4724_v61 = vld [vmem:[%s9709_s7 + $0x368] ss:$72 sps:$4 sm:$0xff]   ;;  %v4727_v63 = vld [vmem:[%s9709_s7 + $0x3fc] ss:$72 sps:$4 sm:$0xff]   ;;  %v4730_v1 = vld [vmem:[%s9709_s7 + $0x3f8] ss:$72 sps:$4 sm:$0xff]  }
  0x1f   : > { %551 = vmatprep.subr.bf16.mxu1 %v4676_v14  ;;  %v4729_v0 = vld [vmem:[%s9709_s7 + $0x3f0] ss:$72 sps:$4 sm:$0xff]   ;;  %v4731_v2 = vld [vmem:[%s9709_s7 + $0x484] ss:$72 sps:$4 sm:$0xff]   ;;  %v4735_v4 = vld [vmem:[%s9709_s7 + $0x480] ss:$72 sps:$4 sm:$0xff]  }
  0x20   : > { %503 = vmatpush1.bf16.msra.mxu0 %v4674_v16  ;;  %v4733_v3 = vld [vmem:[%s9709_s7 + $0x48c] ss:$72 sps:$4 sm:$0xff]   ;;  %v4736_v5 = vld [vmem:[%s9709_s7 + $0x488] ss:$72 sps:$4 sm:$0xff]   ;;  %v4739_v7 = vld [vmem:[%s9709_s7 + $0x51c] ss:$72 sps:$4 sm:$0xff]  }
  0x21   : > { %504 = vmatprep.subr.bf16.mxu0 %v4679_v17  ;;  %v4737_v6 = vld [vmem:[%s9709_s7 + $0x514] ss:$72 sps:$4 sm:$0xff]   ;;  %v4741_v8 = vld [vmem:[%s9709_s7 + $0x510] ss:$72 sps:$4 sm:$0xff]   ;;  %v4743_v10 = vld [vmem:[%s9709_s7 + $0x5a4] ss:$72 sps:$4 sm:$0xff]  }
  0x22   : > { %552 = vmatpush1.bf16.msra.mxu1 %v4674_v16  ;;  %v4742_v9 = vld [vmem:[%s9709_s7 + $0x518] ss:$72 sps:$4 sm:$0xff]   ;;  %v4745_v11 = vld [vmem:[%s9709_s7 + $0x5ac] ss:$72 sps:$4 sm:$0xff]   ;;  %v4748_v13 = vld [vmem:[%s9709_s7 + $0x5a8] ss:$72 sps:$4 sm:$0xff]  }
  0x23   : > { %553 = vmatprep.subr.bf16.mxu1 %v4679_v17  ;;  %v4747_v12 = vld [vmem:[%s9709_s7 + $0x5a0] ss:$72 sps:$4 sm:$0xff]   ;;  %v4749_v14 = vld [vmem:[%s9709_s7 + $0x634] ss:$72 sps:$4 sm:$0xff]   ;;  %v4753_v16 = vld [vmem:[%s9709_s7 + $0x630] ss:$72 sps:$4 sm:$0xff]  }
  0x24   : > { %505 = vmatpush1.bf16.msra.mxu0 %v4677_v18  ;;  %v4751_v15 = vld [vmem:[%s9709_s7 + $0x63c] ss:$72 sps:$4 sm:$0xff]   ;;  %v4754_v17 = vld [vmem:[%s9709_s7 + $0x638] ss:$72 sps:$4 sm:$0xff]   ;;  %v4760_v21 = vld [vmem:[%s9709_s7 + $0x6c8] ss:$72 sps:$4 sm:$0xff]  }
  0x25   : > { %506 = vmatprep.subr.bf16.mxu0 %v4682_v19 }
  0x26   : > { %554 = vmatpush1.bf16.msra.mxu1 %v4677_v18  ;;  %v4755_v18 = vld [vmem:[%s9709_s7 + $0x6c4] ss:$72 sps:$4 sm:$0xff]  }
  0x27   : > { %555 = vmatprep.subr.bf16.mxu1 %v4682_v19  ;;  %v4757_v19 = vld [vmem:[%s9709_s7 + $0x6cc] ss:$72 sps:$4 sm:$0xff]  }
  0x28   : > { %507 = vmatpush1.bf16.msra.mxu0 %v4680_v20 }
  0x29   : > { %2332 = vmatprep.subr.bf16.mxu0 %v4683_v22  ;;  %v4761_v22 = vld [vmem:[%s9709_s7 + $0x754] ss:$72 sps:$4 sm:$0xff]  }
  0x2a   : > { %556 = vmatpush1.bf16.msra.mxu1 %v4680_v20  ;;  %v4759_v20 = vld [vmem:[%s9709_s7 + $0x6c0] ss:$72 sps:$4 sm:$0xff]  }
  0x2b   : > { %2375 = vmatprep.subr.bf16.mxu1 %v4685_v23  ;;  %v4763_v23 = vld [vmem:[%s9709_s7 + $0x75c] ss:$72 sps:$4 sm:$0xff]  }
  0xee   : > { %v388_v24 = vpop.f32.mrb[0].mxu0 }
  0xef   : > { %v4319_v25 = vclamps-f32 %v388_v24, 1.0  ;;  %v4651_v27 = vpop.f32.mrb[1].mxu0  ;;  %v4765_v24 = vld [vmem:[%s9709_s7 + $0x750] ss:$72 sps:$4 sm:$0xff]  }
  0xf0   : > { %v439_v26 = vpop.f32.mrb[0].mxu1  ;;  %v391_v30 = vpop.f32.mrb[2].mxu0  ;;  %v4769_v27 = vld [vmem:[%s9709_s7 + $0x7ec] ss:$72 sps:$4 sm:$0xff]  }
  0xf1   : > { %v4329_v28 = vclamps-f32 %v439_v26, 1.0  ;;  %v4657_v29 = vpop.f32.mrb[1].mxu1  ;;  %v447_v32 = vpack.c.bf16 %v4319_v25, %v4319_v25  ;;  %v4652_v34 = vpop.f32.mrb[3].mxu0  ;;  %v4766_v25 = vld [vmem:[%s9709_s7 + $0x758] ss:$72 sps:$4 sm:$0xff]  }
  0xf2   : > { %v442_v33 = vpop.f32.mrb[2].mxu1  ;;  %v4767_v26 = vld [vmem:[%s9709_s7 + $0x7e4] ss:$72 sps:$4 sm:$0xff]   ;;  %v4772_v29 = vld [vmem:[%s9709_s7 + $0x7e8] ss:$72 sps:$4 sm:$0xff]  }
  0xf3   : > { %v545_v37 = vpack.c.bf16 %v4329_v28, %v4329_v28  ;;  %v4658_v38 = vpop.f32.mrb[3].mxu1  ;;  %4328 = vmatmul.mubr.msk.bf16.vlgmr.msra.gmra.mrb[4].mxu0 %vm496_vm3, %v447_v32  ;;  %v4771_v28 = vld [vmem:[%s9709_s7 + $0x7e0] ss:$72 sps:$4 sm:$0xff]   ;;  %v4773_v30 = vld [vmem:[%s9709_s7 + $0x874] ss:$72 sps:$4 sm:$0xff]  }
  0xf4   : > { %2333 = vmatpush1.bf16.msra.mxu0 %v4687_v31  ;;  %v4775_v31 = vld [vmem:[%s9709_s7 + $0x87c] ss:$72 sps:$4 sm:$0xff]   ;;  %v4777_v32 = vld [vmem:[%s9709_s7 + $0x870] ss:$72 sps:$4 sm:$0xff]  }
  0xf5   : > { %4330 = vmatmul.mubr.msk.bf16.vlgmr.msra.gmra.mrb[4].mxu1 %vm496_vm3, %v545_v37  ;;  %2334 = vmatprep.subr.bf16.mxu0 %v4689_v36  ;;  %v4778_v33 = vld [vmem:[%s9709_s7 + $0x878] ss:$72 sps:$4 sm:$0xff]   ;;  %v4779_v34 = vld [vmem:[%s9709_s7 + $0x14] ss:$72 sps:$4 sm:$0xff]  }
  0xf6   : > { %2376 = vmatpush1.bf16.msra.mxu1 %v4688_v35  ;;  %v4781_v35 = vld [vmem:[%s9709_s7 + $0x1c] ss:$72 sps:$4 sm:$0xff]  }
  0xf7   : > { %2377 = vmatprep.subr.bf16.mxu1 %v4691_v39 }
  0xf8   : > { %2335 = vmatpush1.bf16.msra.mxu0 %v4693_v40 }
  0xf9   : > { %2336 = vmatprep.subr.bf16.mxu0 %v4695_v42 }
  0xfa   : > { %2378 = vmatpush1.bf16.msra.mxu1 %v4694_v41 }
  0xfb   : > { %2379 = vmatprep.subr.bf16.mxu1 %v4697_v43 }
  0xfc   : > { %2337 = vmatpush1.bf16.msra.mxu0 %v4699_v44 }
  0xfd   : > { %2338 = vmatprep.subr.bf16.mxu0 %v4701_v46 }
  0xfe   : > { %2380 = vmatpush1.bf16.msra.mxu1 %v4700_v45 }
  0xff   : > { %2381 = vmatprep.subr.bf16.mxu1 %v4703_v47 }
 0x100   : > { %2339 = vmatpush1.bf16.msra.mxu0 %v4705_v48 }
 0x101   : > { %2340 = vmatprep.subr.bf16.mxu0 %v4707_v50  ;;  %v4783_v50 = vld [vmem:[%s9709_s7 + $0x10] ss:$72 sps:$4 sm:$0xff]  }
 0x102   : > { %2382 = vmatpush1.bf16.msra.mxu1 %v4706_v49 }
 0x103   : > { %2383 = vmatprep.subr.bf16.mxu1 %v4709_v51  ;;  %v4784_v51 = vld [vmem:[%s9709_s7 + $0x18] ss:$72 sps:$4 sm:$0xff]  }
 0x104   : > { %2341 = vmatpush1.bf16.msra.mxu0 %v4711_v52 }
 0x105   : > { %2342 = vmatprep.subr.bf16.mxu0 %v4713_v54  ;;  %v4785_v54 = vld [vmem:[%s9709_s7 + $0xa4] ss:$72 sps:$4 sm:$0xff]  }
 0x106   : > { %2384 = vmatpush1.bf16.msra.mxu1 %v4712_v53 }
 0x107   : > { %2385 = vmatprep.subr.bf16.mxu1 %v4715_v55  ;;  %v4787_v55 = vld [vmem:[%s9709_s7 + $0xac] ss:$72 sps:$4 sm:$0xff]  }
 0x108   : > { %2343 = vmatpush1.bf16.msra.mxu0 %v4717_v56  ;;  %v4789_v56 = vld [vmem:[%s9709_s7 + $0xa0] ss:$72 sps:$4 sm:$0xff]  }
 0x109   : > { %2344 = vmatprep.subr.bf16.mxu0 %v4719_v58  ;;  %v4791_v58 = vld [vmem:[%s9709_s7 + $0x134] ss:$72 sps:$4 sm:$0xff]  }
 0x10a   : > { %2386 = vmatpush1.bf16.msra.mxu1 %v4718_v57  ;;  %v4790_v57 = vld [vmem:[%s9709_s7 + $0xa8] ss:$72 sps:$4 sm:$0xff]  }
 0x10b   : > { %2387 = vmatprep.subr.bf16.mxu1 %v4721_v59  ;;  %v4793_v59 = vld [vmem:[%s9709_s7 + $0x13c] ss:$72 sps:$4 sm:$0xff]  }
 0x10c   : > { %2345 = vmatpush1.bf16.msra.mxu0 %v4723_v60  ;;  %v4795_v60 = vld [vmem:[%s9709_s7 + $0x130] ss:$72 sps:$4 sm:$0xff]  }
 0x10d   : > { %2346 = vmatprep.subr.bf16.mxu0 %v4725_v62  ;;  %v4797_v62 = vld [vmem:[%s9709_s7 + $0x1c4] ss:$72 sps:$4 sm:$0xff]  }
 0x10e   : > { %2388 = vmatpush1.bf16.msra.mxu1 %v4724_v61  ;;  %v4796_v61 = vld [vmem:[%s9709_s7 + $0x138] ss:$72 sps:$4 sm:$0xff]  }
 0x10f   : > { %2389 = vmatprep.subr.bf16.mxu1 %v4727_v63  ;;  %v4799_v63 = vld [vmem:[%s9709_s7 + $0x1cc] ss:$72 sps:$4 sm:$0xff]  }
 0x110   : > { %2347 = vmatpush1.bf16.msra.mxu0 %v4729_v0  ;;  %v4801_v0 = vld [vmem:[%s9709_s7 + $0x1c0] ss:$72 sps:$4 sm:$0xff]  }
 0x111   : > { %2348 = vmatprep.subr.bf16.mxu0 %v4731_v2  ;;  %v4803_v2 = vld [vmem:[%s9709_s7 + $0x254] ss:$72 sps:$4 sm:$0xff]  }
 0x112   : > { %2390 = vmatpush1.bf16.msra.mxu1 %v4730_v1  ;;  %v4802_v1 = vld [vmem:[%s9709_s7 + $0x1c8] ss:$72 sps:$4 sm:$0xff]  }
 0x113   : > { %2391 = vmatprep.subr.bf16.mxu1 %v4733_v3  ;;  %v4805_v3 = vld [vmem:[%s9709_s7 + $0x25c] ss:$72 sps:$4 sm:$0xff]  }
 0x114   : > { %2349 = vmatpush1.bf16.msra.mxu0 %v4735_v4  ;;  %v4807_v4 = vld [vmem:[%s9709_s7 + $0x250] ss:$72 sps:$4 sm:$0xff]  }
 0x115   : > { %2350 = vmatprep.subr.bf16.mxu0 %v4737_v6  ;;  %v4809_v6 = vld [vmem:[%s9709_s7 + $0x2e4] ss:$72 sps:$4 sm:$0xff]  }
 0x116   : > { %2392 = vmatpush1.bf16.msra.mxu1 %v4736_v5  ;;  %v4808_v5 = vld [vmem:[%s9709_s7 + $0x258] ss:$72 sps:$4 sm:$0xff]  }
 0x117   : > { %2393 = vmatprep.subr.bf16.mxu1 %v4739_v7  ;;  %v4811_v7 = vld [vmem:[%s9709_s7 + $0x2ec] ss:$72 sps:$4 sm:$0xff]  }
 0x118   : > { %2351 = vmatpush1.bf16.msra.mxu0 %v4741_v8  ;;  %v4813_v8 = vld [vmem:[%s9709_s7 + $0x2e0] ss:$72 sps:$4 sm:$0xff]  }
 0x119   : > { %2352 = vmatprep.subr.bf16.mxu0 %v4743_v10  ;;  %v4815_v10 = vld [vmem:[%s9709_s7 + $0x374] ss:$72 sps:$4 sm:$0xff]  }
 0x11a   : > { %2394 = vmatpush1.bf16.msra.mxu1 %v4742_v9  ;;  %v4814_v9 = vld [vmem:[%s9709_s7 + $0x2e8] ss:$72 sps:$4 sm:$0xff]  }
 0x11b   : > { %2395 = vmatprep.subr.bf16.mxu1 %v4745_v11  ;;  %v4817_v11 = vld [vmem:[%s9709_s7 + $0x37c] ss:$72 sps:$4 sm:$0xff]  }
 0x11c   : > { %2353 = vmatpush1.bf16.msra.mxu0 %v4747_v12  ;;  %v4819_v12 = vld [vmem:[%s9709_s7 + $0x370] ss:$72 sps:$4 sm:$0xff]  }
 0x11d   : > { %2354 = vmatprep.subr.bf16.mxu0 %v4749_v14  ;;  %v4821_v14 = vld [vmem:[%s9709_s7 + $0x404] ss:$72 sps:$4 sm:$0xff]  }
 0x11e   : > { %2396 = vmatpush1.bf16.msra.mxu1 %v4748_v13  ;;  %v4820_v13 = vld [vmem:[%s9709_s7 + $0x378] ss:$72 sps:$4 sm:$0xff]  }
 0x11f   : > { %2397 = vmatprep.subr.bf16.mxu1 %v4751_v15  ;;  %v4823_v15 = vld [vmem:[%s9709_s7 + $0x40c] ss:$72 sps:$4 sm:$0xff]  }
 0x120   : > { %2355 = vmatpush1.bf16.msra.mxu0 %v4753_v16  ;;  %v4825_v16 = vld [vmem:[%s9709_s7 + $0x400] ss:$72 sps:$4 sm:$0xff]  }
 0x121   : > { %2356 = vmatprep.subr.bf16.mxu0 %v4755_v18  ;;  %v4827_v18 = vld [vmem:[%s9709_s7 + $0x494] ss:$72 sps:$4 sm:$0xff]  }
 0x122   : > { %2398 = vmatpush1.bf16.msra.mxu1 %v4754_v17  ;;  %v4826_v17 = vld [vmem:[%s9709_s7 + $0x408] ss:$72 sps:$4 sm:$0xff]  }
 0x123   : > { %2399 = vmatprep.subr.bf16.mxu1 %v4757_v19  ;;  %v4829_v19 = vld [vmem:[%s9709_s7 + $0x49c] ss:$72 sps:$4 sm:$0xff]  }
 0x124   : > { %2357 = vmatpush1.bf16.msra.mxu0 %v4759_v20  ;;  %v4831_v20 = vld [vmem:[%s9709_s7 + $0x490] ss:$72 sps:$4 sm:$0xff]  }
 0x125   : > { %2358 = vmatprep.subr.bf16.mxu0 %v4761_v22  ;;  %v4833_v22 = vld [vmem:[%s9709_s7 + $0x524] ss:$72 sps:$4 sm:$0xff]  }
 0x126   : > { %2400 = vmatpush1.bf16.msra.mxu1 %v4760_v21  ;;  %v4832_v21 = vld [vmem:[%s9709_s7 + $0x498] ss:$72 sps:$4 sm:$0xff]  }
 0x127   : > { %2401 = vmatprep.subr.bf16.mxu1 %v4763_v23  ;;  %v4835_v23 = vld [vmem:[%s9709_s7 + $0x52c] ss:$72 sps:$4 sm:$0xff]  }
 0x128   : > { %2359 = vmatpush1.bf16.msra.mxu0 %v4765_v24  ;;  %v4837_v24 = vld [vmem:[%s9709_s7 + $0x520] ss:$72 sps:$4 sm:$0xff]  }
 0x129   : > { %2360 = vmatprep.subr.bf16.mxu0 %v4767_v26  ;;  %v4839_v26 = vld [vmem:[%s9709_s7 + $0x5b4] ss:$72 sps:$4 sm:$0xff]  }
 0x12a   : > { %2402 = vmatpush1.bf16.msra.mxu1 %v4766_v25  ;;  %v4838_v25 = vld [vmem:[%s9709_s7 + $0x528] ss:$72 sps:$4 sm:$0xff]  }
 0x12b   : > { %2403 = vmatprep.subr.bf16.mxu1 %v4769_v27  ;;  %v4841_v27 = vld [vmem:[%s9709_s7 + $0x5bc] ss:$72 sps:$4 sm:$0xff]  }
 0x12c   : > { %2361 = vmatpush1.bf16.msra.mxu0 %v4771_v28  ;;  %v4843_v28 = vld [vmem:[%s9709_s7 + $0x5b0] ss:$72 sps:$4 sm:$0xff]  }
 0x12d   : > { %2362 = vmatprep.subr.bf16.mxu0 %v4773_v30  ;;  %v4845_v30 = vld [vmem:[%s9709_s7 + $0x644] ss:$72 sps:$4 sm:$0xff]  }
 0x12e   : > { %2404 = vmatpush1.bf16.msra.mxu1 %v4772_v29  ;;  %v4844_v29 = vld [vmem:[%s9709_s7 + $0x5b8] ss:$72 sps:$4 sm:$0xff]  }
 0x12f   : > { %2405 = vmatprep.subr.bf16.mxu1 %v4775_v31  ;;  %v4847_v31 = vld [vmem:[%s9709_s7 + $0x64c] ss:$72 sps:$4 sm:$0xff]  }
 0x130   : > { %2363 = vmatpush1.bf16.msra.mxu0 %v4777_v32  ;;  %v4849_v32 = vld [vmem:[%s9709_s7 + $0x640] ss:$72 sps:$4 sm:$0xff]  }
 0x131   : > { %2418 = vmatprep.subr.bf16.mxu0 %v4779_v34  ;;  %v4851_v34 = vld [vmem:[%s9709_s7 + $0x6d4] ss:$72 sps:$4 sm:$0xff]  }
 0x132   : > { %2406 = vmatpush1.bf16.msra.mxu1 %v4778_v33  ;;  %v4850_v33 = vld [vmem:[%s9709_s7 + $0x648] ss:$72 sps:$4 sm:$0xff]  }
 0x133   : > { %2461 = vmatprep.subr.bf16.mxu1 %v4781_v35  ;;  %v4853_v35 = vld [vmem:[%s9709_s7 + $0x6dc] ss:$72 sps:$4 sm:$0xff]  }
 0x1c6   : > { %v534_v36 = vpop.f32.mrb[4].mxu0 }
 0x1c7   : > { %v536_v38 = vpop.f32.mrb[5].mxu0  ;;  %v541_v46 = vpack.c.bf16 %v534_v36, %v534_v36  ;;  %v4855_v36 = vld [vmem:[%s9709_s7 + $0x6d0] ss:$72 sps:$4 sm:$0xff]  }
 0x1c8   : > { %v583_v37 = vpop.f32.mrb[4].mxu1  ;;  %v538_v41 = vpop.f32.mrb[6].mxu0  ;;  %v542_v42 = vpack.c.bf16 %v536_v38, %v536_v38  ;;  %v4857_v38 = vld [vmem:[%s9709_s7 + $0x764] ss:$72 sps:$4 sm:$0xff]  }
 0x1c9   : > { %v5899_v39 = vpack.c.bf16 %v583_v37, %v583_v37  ;;  %v585_v40 = vpop.f32.mrb[5].mxu1  ;;  %v539_v45 = vpop.f32.mrb[7].mxu0  ;;  %v4856_v37 = vld [vmem:[%s9709_s7 + $0x6d8] ss:$72 sps:$4 sm:$0xff]  }
 0x1ca   : > { %v5901_v43 = vpack.c.bf16 %v585_v40, %v585_v40  ;;  %v587_v44 = vpop.f32.mrb[6].mxu1  ;;  %v4859_v40 = vld [vmem:[%s9709_s7 + $0x76c] ss:$72 sps:$4 sm:$0xff]   ;;  %v4861_v41 = vld [vmem:[%s9709_s7 + $0x760] ss:$72 sps:$4 sm:$0xff]  }
 0x1cb   : > { %v594_v47 = vrot.slane %v5899_v39, 4  ;;  %v588_v48 = vpop.f32.mrb[7].mxu1  ;;  %v4863_v44 = vld [vmem:[%s9709_s7 + $0x7f4] ss:$72 sps:$4 sm:$0xff]  }
 0x1cc   : > { %v595_v49 = vrot.slane %v5901_v43, 4  ;;  %v4865_v45 = vld [vmem:[%s9709_s7 + $0x7fc] ss:$72 sps:$4 sm:$0xff]  }
 0x1cd   : > { %v5915_v53 = vsel %vm350_vm1, %v541_v46, %v594_v47  ;;  %v4867_v46 = vld [vmem:[%s9709_s7 + $0x7f0] ss:$72 sps:$4 sm:$0xff]   ;;  %v4869_v48 = vld [vmem:[%s9709_s7 + $0x884] ss:$72 sps:$4 sm:$0xff]  }
 0x1ce   : > { %v5912_v52 = vsel %vm350_vm1, %v542_v42, %v595_v49  ;;  %v4862_v42 = vld [vmem:[%s9709_s7 + $0x768] ss:$72 sps:$4 sm:$0xff]   ;;  %v4868_v47 = vld [vmem:[%s9709_s7 + $0x7f8] ss:$72 sps:$4 sm:$0xff]   ;;  %v4871_v49 = vld [vmem:[%s9709_s7 + $0x88c] ss:$72 sps:$4 sm:$0xff]  }
 0x1cf   : > { %2364 = vmatprep.mubr.bf16.mxu0 %v5912_v52  ;;  %2407 = vmatprep.mubr.bf16.mxu1 %v5912_v52 }
 0x1d0   : > { %2365 = vmatmul.mubr.bf16.vlgmr.msra.gmra.mrb[8].mxu0 %v5915_v53  ;;  %2408 = vmatmul.mubr.bf16.vlgmr.msra.gmra.mrb[8].mxu1 %v5915_v53 }
 0x1d1   : > { %2419 = vmatpush1.bf16.msra.mxu0 %v4783_v50  ;;  %2462 = vmatpush1.bf16.msra.mxu1 %v4784_v51  ;;  %v4873_v50 = vld [vmem:[%s9709_s7 + $0x880] ss:$72 sps:$4 sm:$0xff]  }
 0x1d2   : > { %2450 = vmatprep.mubr.bf16.mxu0 %v5912_v52  ;;  %2493 = vmatprep.mubr.bf16.mxu1 %v5912_v52  ;;  %v4874_v51 = vld [vmem:[%s9709_s7 + $0x888] ss:$72 sps:$4 sm:$0xff]  }
 0x1d3   : > { %2420 = vmatprep.subr.bf16.mxu0 %v4785_v54  ;;  %2463 = vmatprep.subr.bf16.mxu1 %v4787_v55  ;;  %v4875_v54 = vld [vmem:[%s9709_s7 + $0x24] ss:$72 sps:$4 sm:$0xff]  }
 0x1d4   : > { %v4877_v55 = vld [vmem:[%s9709_s7 + $0x2c] ss:$72 sps:$4 sm:$0xff]  }
 0x1d5   : > { %2421 = vmatpush1.bf16.msra.mxu0 %v4789_v56  ;;  %2464 = vmatpush1.bf16.msra.mxu1 %v4790_v57  ;;  %v4879_v56 = vld [vmem:[%s9709_s7 + $0x20] ss:$72 sps:$4 sm:$0xff]  }
 0x1d6   : > { %2422 = vmatprep.subr.bf16.mxu0 %v4791_v58  ;;  %2465 = vmatprep.subr.bf16.mxu1 %v4793_v59  ;;  %v4880_v57 = vld [vmem:[%s9709_s7 + $0x28] ss:$72 sps:$4 sm:$0xff]   ;;  %v4881_v58 = vld [vmem:[%s9709_s7 + $0xb4] ss:$72 sps:$4 sm:$0xff]  }
 0x1d7   : > { %v4883_v59 = vld [vmem:[%s9709_s7 + $0xbc] ss:$72 sps:$4 sm:$0xff]  }
 0x1d9   : > { %2423 = vmatpush1.bf16.msra.mxu0 %v4795_v60  ;;  %2466 = vmatpush1.bf16.msra.mxu1 %v4796_v61  ;;  %v4885_v60 = vld [vmem:[%s9709_s7 + $0xb0] ss:$72 sps:$4 sm:$0xff]  }
 0x1da   : > { %2424 = vmatprep.subr.bf16.mxu0 %v4797_v62  ;;  %2467 = vmatprep.subr.bf16.mxu1 %v4799_v63  ;;  %v4886_v61 = vld [vmem:[%s9709_s7 + $0xb8] ss:$72 sps:$4 sm:$0xff]   ;;  %v4887_v62 = vld [vmem:[%s9709_s7 + $0x144] ss:$72 sps:$4 sm:$0xff]  }
 0x1db   : > { %v4889_v63 = vld [vmem:[%s9709_s7 + $0x14c] ss:$72 sps:$4 sm:$0xff]  }
 0x1dd   : > { %2425 = vmatpush1.bf16.msra.mxu0 %v4801_v0  ;;  %2468 = vmatpush1.bf16.msra.mxu1 %v4802_v1  ;;  %v4891_v0 = vld [vmem:[%s9709_s7 + $0x140] ss:$72 sps:$4 sm:$0xff]  }
 0x1de   : > { %2426 = vmatprep.subr.bf16.mxu0 %v4803_v2  ;;  %2469 = vmatprep.subr.bf16.mxu1 %v4805_v3  ;;  %v4892_v1 = vld [vmem:[%s9709_s7 + $0x148] ss:$72 sps:$4 sm:$0xff]   ;;  %v4893_v2 = vld [vmem:[%s9709_s7 + $0x1d4] ss:$72 sps:$4 sm:$0xff]  }
 0x1df   : > { %v4895_v3 = vld [vmem:[%s9709_s7 + $0x1dc] ss:$72 sps:$4 sm:$0xff]  }
 0x1e1   : > { %2427 = vmatpush1.bf16.msra.mxu0 %v4807_v4  ;;  %2470 = vmatpush1.bf16.msra.mxu1 %v4808_v5  ;;  %v4897_v4 = vld [vmem:[%s9709_s7 + $0x1d0] ss:$72 sps:$4 sm:$0xff]  }
 0x1e2   : > { %2428 = vmatprep.subr.bf16.mxu0 %v4809_v6  ;;  %2471 = vmatprep.subr.bf16.mxu1 %v4811_v7  ;;  %v4898_v5 = vld [vmem:[%s9709_s7 + $0x1d8] ss:$72 sps:$4 sm:$0xff]   ;;  %v4899_v6 = vld [vmem:[%s9709_s7 + $0x264] ss:$72 sps:$4 sm:$0xff]  }
 0x1e3   : > { %v4901_v7 = vld [vmem:[%s9709_s7 + $0x26c] ss:$72 sps:$4 sm:$0xff]  }
 0x1e5   : > { %2429 = vmatpush1.bf16.msra.mxu0 %v4813_v8  ;;  %2472 = vmatpush1.bf16.msra.mxu1 %v4814_v9  ;;  %v4903_v8 = vld [vmem:[%s9709_s7 + $0x260] ss:$72 sps:$4 sm:$0xff]  }
 0x1e6   : > { %2430 = vmatprep.subr.bf16.mxu0 %v4815_v10  ;;  %2473 = vmatprep.subr.bf16.mxu1 %v4817_v11  ;;  %v4904_v9 = vld [vmem:[%s9709_s7 + $0x268] ss:$72 sps:$4 sm:$0xff]   ;;  %v4905_v10 = vld [vmem:[%s9709_s7 + $0x2f4] ss:$72 sps:$4 sm:$0xff]  }
 0x1e7   : > { %v4907_v11 = vld [vmem:[%s9709_s7 + $0x2fc] ss:$72 sps:$4 sm:$0xff]  }
 0x1e9   : > { %2431 = vmatpush1.bf16.msra.mxu0 %v4819_v12  ;;  %2474 = vmatpush1.bf16.msra.mxu1 %v4820_v13  ;;  %v4909_v12 = vld [vmem:[%s9709_s7 + $0x2f0] ss:$72 sps:$4 sm:$0xff]  }
 0x1ea   : > { %2432 = vmatprep.subr.bf16.mxu0 %v4821_v14  ;;  %2475 = vmatprep.subr.bf16.mxu1 %v4823_v15  ;;  %v4910_v13 = vld [vmem:[%s9709_s7 + $0x2f8] ss:$72 sps:$4 sm:$0xff]   ;;  %v4911_v14 = vld [vmem:[%s9709_s7 + $0x384] ss:$72 sps:$4 sm:$0xff]  }
 0x1eb   : > { %v4913_v15 = vld [vmem:[%s9709_s7 + $0x38c] ss:$72 sps:$4 sm:$0xff]  }
 0x1ed   : > { %2433 = vmatpush1.bf16.msra.mxu0 %v4825_v16  ;;  %2476 = vmatpush1.bf16.msra.mxu1 %v4826_v17  ;;  %v4915_v16 = vld [vmem:[%s9709_s7 + $0x380] ss:$72 sps:$4 sm:$0xff]  }
 0x1ee   : > { %2434 = vmatprep.subr.bf16.mxu0 %v4827_v18  ;;  %2477 = vmatprep.subr.bf16.mxu1 %v4829_v19  ;;  %v4916_v17 = vld [vmem:[%s9709_s7 + $0x388] ss:$72 sps:$4 sm:$0xff]   ;;  %v4917_v18 = vld [vmem:[%s9709_s7 + $0x414] ss:$72 sps:$4 sm:$0xff]  }
 0x1ef   : > { %v4919_v19 = vld [vmem:[%s9709_s7 + $0x41c] ss:$72 sps:$4 sm:$0xff]  }
 0x1f1   : > { %2435 = vmatpush1.bf16.msra.mxu0 %v4831_v20  ;;  %2478 = vmatpush1.bf16.msra.mxu1 %v4832_v21  ;;  %v4921_v20 = vld [vmem:[%s9709_s7 + $0x410] ss:$72 sps:$4 sm:$0xff]  }
 0x1f2   : > { %2436 = vmatprep.subr.bf16.mxu0 %v4833_v22  ;;  %2479 = vmatprep.subr.bf16.mxu1 %v4835_v23  ;;  %v4922_v21 = vld [vmem:[%s9709_s7 + $0x418] ss:$72 sps:$4 sm:$0xff]   ;;  %v4923_v22 = vld [vmem:[%s9709_s7 + $0x4a4] ss:$72 sps:$4 sm:$0xff]  }
 0x1f3   : > { %v4925_v23 = vld [vmem:[%s9709_s7 + $0x4ac] ss:$72 sps:$4 sm:$0xff]  }
 0x1f5   : > { %2437 = vmatpush1.bf16.msra.mxu0 %v4837_v24  ;;  %2480 = vmatpush1.bf16.msra.mxu1 %v4838_v25  ;;  %v4927_v24 = vld [vmem:[%s9709_s7 + $0x4a0] ss:$72 sps:$4 sm:$0xff]  }
 0x1f6   : > { %2438 = vmatprep.subr.bf16.mxu0 %v4839_v26  ;;  %2481 = vmatprep.subr.bf16.mxu1 %v4841_v27  ;;  %v4928_v25 = vld [vmem:[%s9709_s7 + $0x4a8] ss:$72 sps:$4 sm:$0xff]   ;;  %v4929_v26 = vld [vmem:[%s9709_s7 + $0x534] ss:$72 sps:$4 sm:$0xff]  }
 0x1f7   : > { %v4931_v27 = vld [vmem:[%s9709_s7 + $0x53c] ss:$72 sps:$4 sm:$0xff]  }
 0x1f9   : > { %2439 = vmatpush1.bf16.msra.mxu0 %v4843_v28  ;;  %2482 = vmatpush1.bf16.msra.mxu1 %v4844_v29  ;;  %v4933_v28 = vld [vmem:[%s9709_s7 + $0x530] ss:$72 sps:$4 sm:$0xff]  }
 0x1fa   : > { %2440 = vmatprep.subr.bf16.mxu0 %v4845_v30  ;;  %2483 = vmatprep.subr.bf16.mxu1 %v4847_v31  ;;  %v4934_v29 = vld [vmem:[%s9709_s7 + $0x538] ss:$72 sps:$4 sm:$0xff]   ;;  %v4935_v30 = vld [vmem:[%s9709_s7 + $0x5c4] ss:$72 sps:$4 sm:$0xff]  }
 0x1fb   : > { %v4937_v31 = vld [vmem:[%s9709_s7 + $0x5cc] ss:$72 sps:$4 sm:$0xff]  }
 0x1fd   : > { %2441 = vmatpush1.bf16.msra.mxu0 %v4849_v32  ;;  %2484 = vmatpush1.bf16.msra.mxu1 %v4850_v33  ;;  %v4939_v32 = vld [vmem:[%s9709_s7 + $0x5c0] ss:$72 sps:$4 sm:$0xff]  }
 0x1fe   : > { %2442 = vmatprep.subr.bf16.mxu0 %v4851_v34  ;;  %2485 = vmatprep.subr.bf16.mxu1 %v4853_v35  ;;  %v4940_v33 = vld [vmem:[%s9709_s7 + $0x5c8] ss:$72 sps:$4 sm:$0xff]   ;;  %v4941_v34 = vld [vmem:[%s9709_s7 + $0x654] ss:$72 sps:$4 sm:$0xff]  }
 0x1ff   : > { %v4943_v35 = vld [vmem:[%s9709_s7 + $0x65c] ss:$72 sps:$4 sm:$0xff]  }
 0x201   : > { %2443 = vmatpush1.bf16.msra.mxu0 %v4855_v36  ;;  %2486 = vmatpush1.bf16.msra.mxu1 %v4856_v37  ;;  %v4945_v36 = vld [vmem:[%s9709_s7 + $0x650] ss:$72 sps:$4 sm:$0xff]  }
 0x202   : > { %2444 = vmatprep.subr.bf16.mxu0 %v4857_v38  ;;  %2487 = vmatprep.subr.bf16.mxu1 %v4859_v40  ;;  %v4946_v37 = vld [vmem:[%s9709_s7 + $0x658] ss:$72 sps:$4 sm:$0xff]   ;;  %v4947_v38 = vld [vmem:[%s9709_s7 + $0x6e4] ss:$72 sps:$4 sm:$0xff]  }
 0x203   : > { %v4949_v40 = vld [vmem:[%s9709_s7 + $0x6ec] ss:$72 sps:$4 sm:$0xff]  }
 0x205   : > { %2445 = vmatpush1.bf16.msra.mxu0 %v4861_v41  ;;  %2488 = vmatpush1.bf16.msra.mxu1 %v4862_v42  ;;  %v6260_v41 = vld [vmem:[%s9709_s7 + $0x6e0] ss:$72 sps:$4 sm:$0xff]  }
 0x206   : > { %2446 = vmatprep.subr.bf16.mxu0 %v4863_v44  ;;  %2489 = vmatprep.subr.bf16.mxu1 %v4865_v45  ;;  %v6265_v42 = vld [vmem:[%s9709_s7 + $0x6e8] ss:$72 sps:$4 sm:$0xff]   ;;  %v6270_v44 = vld [vmem:[%s9709_s7 + $0x774] ss:$72 sps:$4 sm:$0xff]  }
 0x207   : > { %v6275_v45 = vld [vmem:[%s9709_s7 + $0x77c] ss:$72 sps:$4 sm:$0xff]  }
 0x209   : > { %2447 = vmatpush1.bf16.msra.mxu0 %v4867_v46  ;;  %2490 = vmatpush1.bf16.msra.mxu1 %v4868_v47  ;;  %v6281_v46 = vld [vmem:[%s9709_s7 + $0x770] ss:$72 sps:$4 sm:$0xff]  }
 0x20a   : > { %2448 = vmatprep.subr.bf16.mxu0 %v4869_v48  ;;  %2491 = vmatprep.subr.bf16.mxu1 %v4871_v49  ;;  %v6288_v47 = vld [vmem:[%s9709_s7 + $0x778] ss:$72 sps:$4 sm:$0xff]   ;;  %v6293_v48 = vld [vmem:[%s9709_s7 + $0x804] ss:$72 sps:$4 sm:$0xff]  }
 0x20b   : > { %v6299_v49 = vld [vmem:[%s9709_s7 + $0x80c] ss:$72 sps:$4 sm:$0xff]  }
 0x20d   : > { %2449 = vmatpush1.bf16.msra.mxu0 %v4873_v50  ;;  %2492 = vmatpush1.bf16.msra.mxu1 %v4874_v51  ;;  %v6305_v50 = vld [vmem:[%s9709_s7 + $0x800] ss:$72 sps:$4 sm:$0xff]  }
 0x20e   : > { %2504 = vmatprep.subr.bf16.mxu0 %v4875_v54  ;;  %2547 = vmatprep.subr.bf16.mxu1 %v4877_v55  ;;  %v6312_v51 = vld [vmem:[%s9709_s7 + $0x808] ss:$72 sps:$4 sm:$0xff]   ;;  %v6317_v54 = vld [vmem:[%s9709_s7 + $0x894] ss:$72 sps:$4 sm:$0xff]  }
 0x20f   : > { %v6323_v55 = vld [vmem:[%s9709_s7 + $0x89c] ss:$72 sps:$4 sm:$0xff]  }
 0x210   : > { %2451 = vmatmul.mubr.bf16.vlgmr.msra.gmra.mrb[12].mxu0 %v5915_v53  ;;  %2494 = vmatmul.mubr.bf16.vlgmr.msra.gmra.mrb[12].mxu1 %v5915_v53 }
 0x211   : > { %2505 = vmatpush1.bf16.msra.mxu0 %v4879_v56  ;;  %2536 = vmatprep.mubr.bf16.mxu0 %v5912_v52  ;;  %v6329_v56 = vld [vmem:[%s9709_s7 + $0x890] ss:$72 sps:$4 sm:$0xff]  }
 0x212   : > { %2548 = vmatpush1.bf16.msra.mxu1 %v4880_v57  ;;  %2579 = vmatprep.mubr.bf16.mxu1 %v5912_v52  ;;  %v6336_v57 = vld [vmem:[%s9709_s7 + $0x898] ss:$72 sps:$4 sm:$0xff]  }
 0x213   : > { %2506 = vmatprep.subr.bf16.mxu0 %v4881_v58  ;;  %2549 = vmatprep.subr.bf16.mxu1 %v4883_v59  ;;  %v6341_v58 = vld [vmem:[%s9709_s7 + $0x34] ss:$72 sps:$4 sm:$0xff]  }
 0x214   : > { %v6347_v59 = vld [vmem:[%s9709_s7 + $0x3c] ss:$72 sps:$4 sm:$0xff]  }
 0x215   : > { %2507 = vmatpush1.bf16.msra.mxu0 %v4885_v60  ;;  %v6353_v60 = vld [vmem:[%s9709_s7 + $0x30] ss:$72 sps:$4 sm:$0xff]  }
 0x216   : > { %2550 = vmatpush1.bf16.msra.mxu1 %v4886_v61  ;;  %2508 = vmatprep.subr.bf16.mxu0 %v4887_v62  ;;  %v6360_v61 = vld [vmem:[%s9709_s7 + $0x38] ss:$72 sps:$4 sm:$0xff]   ;;  %v6366_v62 = vld [vmem:[%s9709_s7 + $0xc4] ss:$72 sps:$4 sm:$0xff]  }
 0x217   : > { %2551 = vmatprep.subr.bf16.mxu1 %v4889_v63  ;;  %v6372_v63 = vld [vmem:[%s9709_s7 + $0xcc] ss:$72 sps:$4 sm:$0xff]  }
 0x219   : > { %2509 = vmatpush1.bf16.msra.mxu0 %v4891_v0  ;;  %v6379_v0 = vld [vmem:[%s9709_s7 + $0xc0] ss:$72 sps:$4 sm:$0xff]  }
 0x21a   : > { %2552 = vmatpush1.bf16.msra.mxu1 %v4892_v1  ;;  %2510 = vmatprep.subr.bf16.mxu0 %v4893_v2  ;;  %v6386_v1 = vld [vmem:[%s9709_s7 + $0xc8] ss:$72 sps:$4 sm:$0xff]   ;;  %v6391_v2 = vld [vmem:[%s9709_s7 + $0x154] ss:$72 sps:$4 sm:$0xff]  }
 0x21b   : > { %2553 = vmatprep.subr.bf16.mxu1 %v4895_v3  ;;  %v6398_v3 = vld [vmem:[%s9709_s7 + $0x15c] ss:$72 sps:$4 sm:$0xff]  }
 0x21d   : > { %2511 = vmatpush1.bf16.msra.mxu0 %v4897_v4  ;;  %v6405_v4 = vld [vmem:[%s9709_s7 + $0x150] ss:$72 sps:$4 sm:$0xff]  }
 0x21e   : > { %2554 = vmatpush1.bf16.msra.mxu1 %v4898_v5  ;;  %2512 = vmatprep.subr.bf16.mxu0 %v4899_v6  ;;  %v6412_v5 = vld [vmem:[%s9709_s7 + $0x158] ss:$72 sps:$4 sm:$0xff]   ;;  %v6417_v6 = vld [vmem:[%s9709_s7 + $0x1e4] ss:$72 sps:$4 sm:$0xff]  }
 0x21f   : > { %2555 = vmatprep.subr.bf16.mxu1 %v4901_v7  ;;  %v6423_v7 = vld [vmem:[%s9709_s7 + $0x1ec] ss:$72 sps:$4 sm:$0xff]  }
 0x221   : > { %2513 = vmatpush1.bf16.msra.mxu0 %v4903_v8  ;;  %v6429_v8 = vld [vmem:[%s9709_s7 + $0x1e0] ss:$72 sps:$4 sm:$0xff]  }
 0x222   : > { %2556 = vmatpush1.bf16.msra.mxu1 %v4904_v9  ;;  %2514 = vmatprep.subr.bf16.mxu0 %v4905_v10  ;;  %v6436_v9 = vld [vmem:[%s9709_s7 + $0x1e8] ss:$72 sps:$4 sm:$0xff]   ;;  %v6441_v10 = vld [vmem:[%s9709_s7 + $0x274] ss:$72 sps:$4 sm:$0xff]  }
 0x223   : > { %2557 = vmatprep.subr.bf16.mxu1 %v4907_v11  ;;  %v6447_v11 = vld [vmem:[%s9709_s7 + $0x27c] ss:$72 sps:$4 sm:$0xff]  }
 0x225   : > { %2515 = vmatpush1.bf16.msra.mxu0 %v4909_v12  ;;  %v6453_v12 = vld [vmem:[%s9709_s7 + $0x270] ss:$72 sps:$4 sm:$0xff]  }
 0x226   : > { %2558 = vmatpush1.bf16.msra.mxu1 %v4910_v13  ;;  %2516 = vmatprep.subr.bf16.mxu0 %v4911_v14  ;;  %v6460_v13 = vld [vmem:[%s9709_s7 + $0x278] ss:$72 sps:$4 sm:$0xff]   ;;  %v6465_v14 = vld [vmem:[%s9709_s7 + $0x304] ss:$72 sps:$4 sm:$0xff]  }
 0x227   : > { %2559 = vmatprep.subr.bf16.mxu1 %v4913_v15  ;;  %v6471_v15 = vld [vmem:[%s9709_s7 + $0x30c] ss:$72 sps:$4 sm:$0xff]  }
 0x229   : > { %2517 = vmatpush1.bf16.msra.mxu0 %v4915_v16  ;;  %v6477_v16 = vld [vmem:[%s9709_s7 + $0x300] ss:$72 sps:$4 sm:$0xff]  }
 0x22a   : > { %2560 = vmatpush1.bf16.msra.mxu1 %v4916_v17  ;;  %2518 = vmatprep.subr.bf16.mxu0 %v4917_v18  ;;  %v6484_v17 = vld [vmem:[%s9709_s7 + $0x308] ss:$72 sps:$4 sm:$0xff]   ;;  %v6489_v18 = vld [vmem:[%s9709_s7 + $0x394] ss:$72 sps:$4 sm:$0xff]  }
 0x22b   : > { %2561 = vmatprep.subr.bf16.mxu1 %v4919_v19  ;;  %v6495_v19 = vld [vmem:[%s9709_s7 + $0x39c] ss:$72 sps:$4 sm:$0xff]  }
 0x22d   : > { %2519 = vmatpush1.bf16.msra.mxu0 %v4921_v20  ;;  %v6501_v20 = vld [vmem:[%s9709_s7 + $0x390] ss:$72 sps:$4 sm:$0xff]  }
 0x22e   : > { %2562 = vmatpush1.bf16.msra.mxu1 %v4922_v21  ;;  %2520 = vmatprep.subr.bf16.mxu0 %v4923_v22  ;;  %v6508_v21 = vld [vmem:[%s9709_s7 + $0x398] ss:$72 sps:$4 sm:$0xff]   ;;  %v6513_v22 = vld [vmem:[%s9709_s7 + $0x424] ss:$72 sps:$4 sm:$0xff]  }
 0x22f   : > { %2563 = vmatprep.subr.bf16.mxu1 %v4925_v23  ;;  %10007 = vst [vmem:[#allocation2_spill] sm:$0xff] %v6513_v22  ;;  %v6519_v23 = vld [vmem:[%s9709_s7 + $0x42c] ss:$72 sps:$4 sm:$0xff]  }
 0x230   : > { %10008 = vst [vmem:[#allocation3_spill] sm:$0xff] %v6519_v23 }
 0x231   : > { %2521 = vmatpush1.bf16.msra.mxu0 %v4927_v24  ;;  %v6525_v24 = vld [vmem:[%s9709_s7 + $0x420] ss:$72 sps:$4 sm:$0xff]  }
 0x232   : > { %2564 = vmatpush1.bf16.msra.mxu1 %v4928_v25  ;;  %2522 = vmatprep.subr.bf16.mxu0 %v4929_v26  ;;  %10009 = vst [vmem:[#allocation4_spill] sm:$0xff] %v6525_v24  ;;  %v6532_v25 = vld [vmem:[%s9709_s7 + $0x428] ss:$72 sps:$4 sm:$0xff]   ;;  %v6537_v26 = vld [vmem:[%s9709_s7 + $0x4b4] ss:$72 sps:$4 sm:$0xff]  }
 0x233   : > { %2565 = vmatprep.subr.bf16.mxu1 %v4931_v27  ;;  %10010 = vst [vmem:[#allocation5_spill] sm:$0xff] %v6532_v25  ;;  %10011 = vst [vmem:[#allocation6_spill] sm:$0xff] %v6537_v26  ;;  %v6543_v27 = vld [vmem:[%s9709_s7 + $0x4bc] ss:$72 sps:$4 sm:$0xff]  }
 0x234   : > { %10012 = vst [vmem:[#allocation7_spill] sm:$0xff] %v6543_v27 }
 0x235   : > { %2523 = vmatpush1.bf16.msra.mxu0 %v4933_v28  ;;  %v6549_v28 = vld [vmem:[%s9709_s7 + $0x4b0] ss:$72 sps:$4 sm:$0xff]  }
 0x236   : > { %2566 = vmatpush1.bf16.msra.mxu1 %v4934_v29  ;;  %2524 = vmatprep.subr.bf16.mxu0 %v4935_v30  ;;  %10013 = vst [vmem:[#allocation8_spill] sm:$0xff] %v6549_v28  ;;  %v6556_v29 = vld [vmem:[%s9709_s7 + $0x4b8] ss:$72 sps:$4 sm:$0xff]   ;;  %v6561_v30 = vld [vmem:[%s9709_s7 + $0x544] ss:$72 sps:$4 sm:$0xff]  }
 0x237   : > { %2567 = vmatprep.subr.bf16.mxu1 %v4937_v31  ;;  %10014 = vst [vmem:[#allocation9_spill] sm:$0xff] %v6556_v29  ;;  %10015 = vst [vmem:[#allocation10_spill] sm:$0xff] %v6561_v30  ;;  %v6567_v31 = vld [vmem:[%s9709_s7 + $0x54c] ss:$72 sps:$4 sm:$0xff]  }
 0x238   : > { %10016 = vst [vmem:[#allocation11_spill] sm:$0xff] %v6567_v31 }
 0x239   : > { %2525 = vmatpush1.bf16.msra.mxu0 %v4939_v32  ;;  %v6573_v32 = vld [vmem:[%s9709_s7 + $0x540] ss:$72 sps:$4 sm:$0xff]  }
 0x23a   : > { %2568 = vmatpush1.bf16.msra.mxu1 %v4940_v33  ;;  %2526 = vmatprep.subr.bf16.mxu0 %v4941_v34  ;;  %10017 = vst [vmem:[#allocation12_spill] sm:$0xff] %v6573_v32  ;;  %v6580_v33 = vld [vmem:[%s9709_s7 + $0x548] ss:$72 sps:$4 sm:$0xff]   ;;  %v6585_v34 = vld [vmem:[%s9709_s7 + $0x5d4] ss:$72 sps:$4 sm:$0xff]  }
 0x23b   : > { %2569 = vmatprep.subr.bf16.mxu1 %v4943_v35  ;;  %10018 = vst [vmem:[#allocation13_spill] sm:$0xff] %v6580_v33  ;;  %10019 = vst [vmem:[#allocation14_spill] sm:$0xff] %v6585_v34  ;;  %v6591_v35 = vld [vmem:[%s9709_s7 + $0x5dc] ss:$72 sps:$4 sm:$0xff]  }
 0x23c   : > { %10020 = vst [vmem:[#allocation15_spill] sm:$0xff] %v6591_v35 }
 0x23d   : > { %2527 = vmatpush1.bf16.msra.mxu0 %v4945_v36  ;;  %v6597_v36 = vld [vmem:[%s9709_s7 + $0x5d0] ss:$72 sps:$4 sm:$0xff]  }
 0x23e   : > { %2570 = vmatpush1.bf16.msra.mxu1 %v4946_v37  ;;  %2528 = vmatprep.subr.bf16.mxu0 %v4947_v38  ;;  %10021 = vst [vmem:[#allocation16_spill] sm:$0xff] %v6597_v36  ;;  %v6604_v37 = vld [vmem:[%s9709_s7 + $0x5d8] ss:$72 sps:$4 sm:$0xff]   ;;  %v6609_v38 = vld [vmem:[%s9709_s7 + $0x664] ss:$72 sps:$4 sm:$0xff]  }
 0x23f   : > { %2571 = vmatprep.subr.bf16.mxu1 %v4949_v40  ;;  %10022 = vst [vmem:[#allocation17_spill] sm:$0xff] %v6604_v37  ;;  %10023 = vst [vmem:[#allocation18_spill] sm:$0xff] %v6609_v38  ;;  %v6615_v40 = vld [vmem:[%s9709_s7 + $0x66c] ss:$72 sps:$4 sm:$0xff]  }
 0x240   : > { %10024 = vst [vmem:[#allocation19_spill] sm:$0xff] %v6615_v40 }
 0x241   : > { %2529 = vmatpush1.bf16.msra.mxu0 %v6260_v41 }
 0x242   : > { %2572 = vmatpush1.bf16.msra.mxu1 %v6265_v42  ;;  %2530 = vmatprep.subr.bf16.mxu0 %v6270_v44 }
 0x243   : > { %2573 = vmatprep.subr.bf16.mxu1 %v6275_v45 }
 0x245   : > { %2531 = vmatpush1.bf16.msra.mxu0 %v6281_v46 }
 0x246   : > { %2574 = vmatpush1.bf16.msra.mxu1 %v6288_v47  ;;  %2532 = vmatprep.subr.bf16.mxu0 %v6293_v48 }
 0x247   : > { %2575 = vmatprep.subr.bf16.mxu1 %v6299_v49 }
 0x249   : > { %2533 = vmatpush1.bf16.msra.mxu0 %v6305_v50 }
 0x24a   : > { %2576 = vmatpush1.bf16.msra.mxu1 %v6312_v51  ;;  %2534 = vmatprep.subr.bf16.mxu0 %v6317_v54 }
 0x24b   : > { %2577 = vmatprep.subr.bf16.mxu1 %v6323_v55 }
 0x24d   : > { %2535 = vmatpush1.bf16.msra.mxu0 %v6329_v56 }
 0x24e   : > { %2578 = vmatpush1.bf16.msra.mxu1 %v6336_v57  ;;  %2590 = vmatprep.subr.bf16.mxu0 %v6341_v58 }
 0x24f   : > { %2633 = vmatprep.subr.bf16.mxu1 %v6347_v59 }
 0x250   : > { %2537 = vmatmul.mubr.bf16.vlgmr.msra.gmra.mrb[16].mxu0 %v5915_v53 }
 0x251   : > { %2580 = vmatmul.mubr.bf16.vlgmr.msra.gmra.mrb[16].mxu1 %v5915_v53  ;;  %2591 = vmatpush1.bf16.msra.mxu0 %v6353_v60 }
 0x252   : > { %2622 = vmatprep.mubr.bf16.mxu0 %v5912_v52  ;;  %2634 = vmatpush1.bf16.msra.mxu1 %v6360_v61 }
 0x253   : > { %2665 = vmatprep.mubr.bf16.mxu1 %v5912_v52  ;;  %2592 = vmatprep.subr.bf16.mxu0 %v6366_v62 }
 0x254   : > { %2635 = vmatprep.subr.bf16.mxu1 %v6372_v63 }
 0x255   : > { %2593 = vmatpush1.bf16.msra.mxu0 %v6379_v0 }
 0x256   : > { %2636 = vmatpush1.bf16.msra.mxu1 %v6386_v1  ;;  %2594 = vmatprep.subr.bf16.mxu0 %v6391_v2 }
 0x257   : > { %2637 = vmatprep.subr.bf16.mxu1 %v6398_v3 }
 0x259   : > { %2595 = vmatpush1.bf16.msra.mxu0 %v6405_v4 }
 0x25a   : > { %2638 = vmatpush1.bf16.msra.mxu1 %v6412_v5  ;;  %2596 = vmatprep.subr.bf16.mxu0 %v6417_v6 }
 0x25b   : > { %2639 = vmatprep.subr.bf16.mxu1 %v6423_v7 }
 0x25d   : > { %2597 = vmatpush1.bf16.msra.mxu0 %v6429_v8 }
 0x25e   : > { %2640 = vmatpush1.bf16.msra.mxu1 %v6436_v9  ;;  %2598 = vmatprep.subr.bf16.mxu0 %v6441_v10 }
 0x25f   : > { %2641 = vmatprep.subr.bf16.mxu1 %v6447_v11 }
 0x261   : > { %2599 = vmatpush1.bf16.msra.mxu0 %v6453_v12 }
 0x262   : > { %2642 = vmatpush1.bf16.msra.mxu1 %v6460_v13  ;;  %2600 = vmatprep.subr.bf16.mxu0 %v6465_v14 }
 0x263   : > { %2643 = vmatprep.subr.bf16.mxu1 %v6471_v15 }
 0x265   : > { %2601 = vmatpush1.bf16.msra.mxu0 %v6477_v16 }
 0x266   : > { %2644 = vmatpush1.bf16.msra.mxu1 %v6484_v17  ;;  %2602 = vmatprep.subr.bf16.mxu0 %v6489_v18 }
 0x267   : > { %2645 = vmatprep.subr.bf16.mxu1 %v6495_v19 }
 0x269   : > { %2603 = vmatpush1.bf16.msra.mxu0 %v6501_v20 }
 0x26a   : > { %2646 = vmatpush1.bf16.msra.mxu1 %v6508_v21  ;;  %2604 = vmatprep.subr.bf16.mxu0 %v6513_v22 }
 0x26b   : > { %2647 = vmatprep.subr.bf16.mxu1 %v6519_v23 }
 0x26d   : > { %2605 = vmatpush1.bf16.msra.mxu0 %v6525_v24 }
 0x26e   : > { %2648 = vmatpush1.bf16.msra.mxu1 %v6532_v25  ;;  %2606 = vmatprep.subr.bf16.mxu0 %v6537_v26  ;;  %v6824_v25 = vld [vmem:[%s9709_s7 + $0x430] ss:$72 sps:$4 sm:$0xff]  }
 0x26f   : > { %2649 = vmatprep.subr.bf16.mxu1 %v6543_v27  ;;  %v6818_v27 = vld [vmem:[%s9709_s7 + $0x434] ss:$72 sps:$4 sm:$0xff]   ;;  %10058 = vst [vmem:[#allocation53_spill] sm:$0xff] %v6824_v25 }
 0x270   : > { %10057 = vst [vmem:[#allocation52_spill] sm:$0xff] %v6818_v27 }
 0x271   : > { %2607 = vmatpush1.bf16.msra.mxu0 %v6549_v28 }
 0x272   : > { %2650 = vmatpush1.bf16.msra.mxu1 %v6556_v29  ;;  %2608 = vmatprep.subr.bf16.mxu0 %v6561_v30 }
 0x273   : > { %2651 = vmatprep.subr.bf16.mxu1 %v6567_v31  ;;  %v6812_v31 = vld [vmem:[%s9709_s7 + $0x3a0] ss:$72 sps:$4 sm:$0xff]  }
 0x274   : > { %10056 = vst [vmem:[#allocation51_spill] sm:$0xff] %v6812_v31 }
 0x275   : > { %2609 = vmatpush1.bf16.msra.mxu0 %v6573_v32 }
 0x276   : > { %2652 = vmatpush1.bf16.msra.mxu1 %v6580_v33  ;;  %2610 = vmatprep.subr.bf16.mxu0 %v6585_v34  ;;  %v6621_v34 = vld [vmem:[%s9709_s7 + $0x660] ss:$72 sps:$4 sm:$0xff]   ;;  %v6633_v33 = vld [vmem:[%s9709_s7 + $0x6f4] ss:$72 sps:$4 sm:$0xff]  }
 0x277   : > { %2653 = vmatprep.subr.bf16.mxu1 %v6591_v35  ;;  %10025 = vst [vmem:[#allocation20_spill] sm:$0xff] %v6621_v34  ;;  %v6628_v35 = vld [vmem:[%s9709_s7 + $0x668] ss:$72 sps:$4 sm:$0xff]   ;;  %10027 = vst [vmem:[#allocation22_spill] sm:$0xff] %v6633_v33 }
 0x278   : > { %10026 = vst [vmem:[#allocation21_spill] sm:$0xff] %v6628_v35 }
 0x279   : > { %2611 = vmatpush1.bf16.msra.mxu0 %v6597_v36  ;;  %v6639_v36 = vld [vmem:[%s9709_s7 + $0x6fc] ss:$72 sps:$4 sm:$0xff]  }
 0x27a   : > { %2654 = vmatpush1.bf16.msra.mxu1 %v6604_v37  ;;  %2612 = vmatprep.subr.bf16.mxu0 %v6609_v38  ;;  %10028 = vst [vmem:[#allocation23_spill] sm:$0xff] %v6639_v36  ;;  %v6645_v38 = vld [vmem:[%s9709_s7 + $0x6f0] ss:$72 sps:$4 sm:$0xff]   ;;  %v6657_v37 = vld [vmem:[%s9709_s7 + $0x784] ss:$72 sps:$4 sm:$0xff]  }
 0x27b   : > { %2655 = vmatprep.subr.bf16.mxu1 %v6615_v40  ;;  %10029 = vst [vmem:[#allocation24_spill] sm:$0xff] %v6645_v38  ;;  %v6652_v40 = vld [vmem:[%s9709_s7 + $0x6f8] ss:$72 sps:$4 sm:$0xff]   ;;  %10031 = vst [vmem:[#allocation26_spill] sm:$0xff] %v6657_v37 }
 0x27c   : > { %10030 = vst [vmem:[#allocation25_spill] sm:$0xff] %v6652_v40 }
 0x27d   : > { %2613 = vmatpush1.bf16.msra.mxu0 %v6621_v34  ;;  %v6663_v34 = vld [vmem:[%s9709_s7 + $0x78c] ss:$72 sps:$4 sm:$0xff]  }
 0x27e   : > { %2656 = vmatpush1.bf16.msra.mxu1 %v6628_v35  ;;  %2614 = vmatprep.subr.bf16.mxu0 %v6633_v33  ;;  %10032 = vst [vmem:[#allocation27_spill] sm:$0xff] %v6663_v34  ;;  %v6669_v33 = vld [vmem:[%s9709_s7 + $0x780] ss:$72 sps:$4 sm:$0xff]   ;;  %v6681_v35 = vld [vmem:[%s9709_s7 + $0x814] ss:$72 sps:$4 sm:$0xff]  }
 0x27f   : > { %2657 = vmatprep.subr.bf16.mxu1 %v6639_v36  ;;  %10033 = vst [vmem:[#allocation28_spill] sm:$0xff] %v6669_v33  ;;  %v6676_v36 = vld [vmem:[%s9709_s7 + $0x788] ss:$72 sps:$4 sm:$0xff]   ;;  %10035 = vst [vmem:[#allocation30_spill] sm:$0xff] %v6681_v35 }
 0x280   : > { %10034 = vst [vmem:[#allocation29_spill] sm:$0xff] %v6676_v36 }
 0x281   : > { %2615 = vmatpush1.bf16.msra.mxu0 %v6645_v38  ;;  %v6687_v38 = vld [vmem:[%s9709_s7 + $0x81c] ss:$72 sps:$4 sm:$0xff]  }
 0x282   : > { %2658 = vmatpush1.bf16.msra.mxu1 %v6652_v40  ;;  %2616 = vmatprep.subr.bf16.mxu0 %v6657_v37  ;;  %10036 = vst [vmem:[#allocation31_spill] sm:$0xff] %v6687_v38  ;;  %v6693_v37 = vld [vmem:[%s9709_s7 + $0x810] ss:$72 sps:$4 sm:$0xff]   ;;  %v6705_v40 = vld [vmem:[%s9709_s7 + $0x8a4] ss:$72 sps:$4 sm:$0xff]  }
 0x283   : > { %2659 = vmatprep.subr.bf16.mxu1 %v6663_v34  ;;  %10037 = vst [vmem:[#allocation32_spill] sm:$0xff] %v6693_v37  ;;  %v6700_v34 = vld [vmem:[%s9709_s7 + $0x818] ss:$72 sps:$4 sm:$0xff]   ;;  %10039 = vst [vmem:[#allocation34_spill] sm:$0xff] %v6705_v40 }
 0x284   : > { %10038 = vst [vmem:[#allocation33_spill] sm:$0xff] %v6700_v34 }
 0x285   : > { %2617 = vmatpush1.bf16.msra.mxu0 %v6669_v33  ;;  %v6711_v33 = vld [vmem:[%s9709_s7 + $0x8ac] ss:$72 sps:$4 sm:$0xff]  }
 0x286   : > { %2660 = vmatpush1.bf16.msra.mxu1 %v6676_v36  ;;  %2618 = vmatprep.subr.bf16.mxu0 %v6681_v35  ;;  %10040 = vst [vmem:[#allocation35_spill] sm:$0xff] %v6711_v33  ;;  %v6717_v35 = vld [vmem:[%s9709_s7 + $0x8a0] ss:$72 sps:$4 sm:$0xff]   ;;  %v6729_v36 = vld [vmem:[%s9709_s7 + $0x44] ss:$72 sps:$4 sm:$0xff]  }
 0x287   : > { %2661 = vmatprep.subr.bf16.mxu1 %v6687_v38  ;;  %10041 = vst [vmem:[#allocation36_spill] sm:$0xff] %v6717_v35  ;;  %v6724_v38 = vld [vmem:[%s9709_s7 + $0x8a8] ss:$72 sps:$4 sm:$0xff]   ;;  %10043 = vst [vmem:[#allocation38_spill] sm:$0xff] %v6729_v36 }
 0x288   : > { %10042 = vst [vmem:[#allocation37_spill] sm:$0xff] %v6724_v38 }
 0x289   : > { %2619 = vmatpush1.bf16.msra.mxu0 %v6693_v37 }
 0x28a   : > { %2662 = vmatpush1.bf16.msra.mxu1 %v6700_v34  ;;  %2620 = vmatprep.subr.bf16.mxu0 %v6705_v40  ;;  %v6736_v34 = vld [vmem:[%s9709_s7 + $0x40] ss:$72 sps:$4 sm:$0xff]   ;;  %v6743_v40 = vld [vmem:[%s9709_s7 + $0xd4] ss:$72 sps:$4 sm:$0xff]  }
 0x28b   : > { %2663 = vmatprep.subr.bf16.mxu1 %v6711_v33  ;;  %10044 = vst [vmem:[#allocation39_spill] sm:$0xff] %v6736_v34  ;;  %10045 = vst [vmem:[#allocation40_spill] sm:$0xff] %v6743_v40 }
 0x28d   : > { %2621 = vmatpush1.bf16.msra.mxu0 %v6717_v35  ;;  %v6751_v35 = vld [vmem:[%s9709_s7 + $0xd0] ss:$72 sps:$4 sm:$0xff]  }
 0x28e   : > { %2664 = vmatpush1.bf16.msra.mxu1 %v6724_v38  ;;  %2676 = vmatprep.subr.bf16.mxu0 %v6729_v36  ;;  %10046 = vst [vmem:[#allocation41_spill] sm:$0xff] %v6751_v35  ;;  %v6758_v36 = vld [vmem:[%s9709_s7 + $0x164] ss:$72 sps:$4 sm:$0xff]  }
 0x28f   : > { %10047 = vst [vmem:[#allocation42_spill] sm:$0xff] %v6758_v36 }
 0x290   : > { %2623 = vmatmul.mubr.bf16.vlgmr.msra.gmra.mrb[20].mxu0 %v5915_v53 }
 0x291   : > { %2666 = vmatmul.mubr.bf16.vlgmr.msra.gmra.mrb[20].mxu1 %v5915_v53  ;;  %2677 = vmatpush1.bf16.msra.mxu0 %v6736_v34  ;;  %v6764_v34 = vld [vmem:[%s9709_s7 + $0x160] ss:$72 sps:$4 sm:$0xff]  }
 0x292   : > { %2708 = vmatprep.mubr.bf16.mxu0 %v5912_v52  ;;  %2678 = vmatprep.subr.bf16.mxu0 %v6743_v40  ;;  %10048 = vst [vmem:[#allocation43_spill] sm:$0xff] %v6764_v34  ;;  %v6770_v52 = vld [vmem:[%s9709_s7 + $0x1f4] ss:$72 sps:$4 sm:$0xff]   ;;  %v6776_v40 = vld [vmem:[%s9709_s7 + $0x1f0] ss:$72 sps:$4 sm:$0xff]  }
 0x293   : > { %10049 = vst [vmem:[#allocation44_spill] sm:$0xff] %v6770_v52  ;;  %10050 = vst [vmem:[#allocation45_spill] sm:$0xff] %v6776_v40 }
 0x295   : > { %2679 = vmatpush1.bf16.msra.mxu0 %v6751_v35  ;;  %v6782_v35 = vld [vmem:[%s9709_s7 + $0x284] ss:$72 sps:$4 sm:$0xff]  }
 0x296   : > { %2680 = vmatprep.subr.bf16.mxu0 %v6758_v36  ;;  %10051 = vst [vmem:[#allocation46_spill] sm:$0xff] %v6782_v35  ;;  %v6788_v36 = vld [vmem:[%s9709_s7 + $0x280] ss:$72 sps:$4 sm:$0xff]  }
 0x297   : > { %10052 = vst [vmem:[#allocation47_spill] sm:$0xff] %v6788_v36 }
 0x299   : > { %2681 = vmatpush1.bf16.msra.mxu0 %v6764_v34  ;;  %v6794_v34 = vld [vmem:[%s9709_s7 + $0x314] ss:$72 sps:$4 sm:$0xff]  }
 0x29a   : > { %2682 = vmatprep.subr.bf16.mxu0 %v6770_v52  ;;  %10053 = vst [vmem:[#allocation48_spill] sm:$0xff] %v6794_v34  ;;  %v6800_v52 = vld [vmem:[%s9709_s7 + $0x310] ss:$72 sps:$4 sm:$0xff]  }
 0x29b   : > { %10054 = vst [vmem:[#allocation49_spill] sm:$0xff] %v6800_v52 }
 0x29d   : > { %2683 = vmatpush1.bf16.msra.mxu0 %v6776_v40  ;;  %v6806_v40 = vld [vmem:[%s9709_s7 + $0x3a4] ss:$72 sps:$4 sm:$0xff]  }
 0x29e   : > { %2684 = vmatprep.subr.bf16.mxu0 %v6782_v35  ;;  %10055 = vst [vmem:[#allocation50_spill] sm:$0xff] %v6806_v40 }
 0x2a1   : > { %2685 = vmatpush1.bf16.msra.mxu0 %v6788_v36 }
 0x2a2   : > { %2686 = vmatprep.subr.bf16.mxu0 %v6794_v34 }
 0x2a3   : > { %v2366_v35 = vpop.f32.mrb[8].mxu0  ;;  %v2409_v38 = vpop.f32.mrb[8].mxu1 }
 0x2a4   : > { %v2368_v33 = vpop.f32.mrb[9].mxu0  ;;  %v2411_v37 = vpop.f32.mrb[9].mxu1 }
 0x2a5   : > { %2687 = vmatpush1.bf16.msra.mxu0 %v6800_v52  ;;  %v2370_v32 = vpop.f32.mrb[10].mxu0  ;;  %v2413_v36 = vpop.f32.mrb[10].mxu1 }
 0x2a6   : > { %v2719_v30 = vpack.c.bf16 %v2370_v32, %v2366_v35  ;;  %v2721_v34 = vpack.c.bf16 %v2413_v36, %v2409_v38  ;;  %v2372_v29 = vpop.f32.mrb[11].mxu0  ;;  %v2415_v28 = vpop.f32.mrb[11].mxu1  ;;  %2688 = vmatprep.subr.bf16.mxu0 %v6806_v40  ;;  %v6830_v32 = vld [vmem:[%s9709_s7 + $0x4c4] ss:$72 sps:$4 sm:$0xff]   ;;  %v6872_v35 = vld [vmem:[%s9709_s7 + $0x670] ss:$72 sps:$4 sm:$0xff]  }
 0x2a7   : > { %v2720_v26 = vpack.c.bf16 %v2372_v29, %v2368_v33  ;;  %v2722_v52 = vpack.c.bf16 %v2415_v28, %v2411_v37  ;;  %10059 = vst [vmem:[#allocation54_spill] sm:$0xff] %v6830_v32  ;;  %v6842_v28 = vld [vmem:[%s9709_s7 + $0x554] ss:$72 sps:$4 sm:$0xff]   ;;  %v6848_v29 = vld [vmem:[%s9709_s7 + $0x550] ss:$72 sps:$4 sm:$0xff]   ;;  %10066 = vst [vmem:[#allocation61_spill] sm:$0xff] %v6872_v35 }
 0x2a8   : > { %10061 = vst [vmem:[#allocation56_spill] sm:$0xff] %v6842_v28  ;;  %10062 = vst [vmem:[#allocation57_spill] sm:$0xff] %v6848_v29  ;;  %v6860_v33 = vld [vmem:[%s9709_s7 + $0x5e0] ss:$72 sps:$4 sm:$0xff]   ;;  %v6878_v36 = vld [vmem:[%s9709_s7 + $0x704] ss:$72 sps:$4 sm:$0xff]  }
 0x2a9   : > { %2689 = vmatpush1.bf16.msra.mxu0 %v6812_v31  ;;  %2748 = vmatprep.subr.bf16.mxu1 %v2720_v26  ;;  %v6836_v26 = vld [vmem:[%s9709_s7 + $0x4c0] ss:$72 sps:$4 sm:$0xff]   ;;  %10064 = vst [vmem:[#allocation59_spill] sm:$0xff] %v6860_v33  ;;  %10067 = vst [vmem:[#allocation62_spill] sm:$0xff] %v6878_v36  ;;  %v6890_v38 = vld [vmem:[%s9709_s7 + $0x794] ss:$72 sps:$4 sm:$0xff]  }
 0x2aa   : > { %2749 = vmatpush1.bf16.msra.mxu1 %v2719_v30  ;;  %2690 = vmatprep.subr.bf16.mxu0 %v6818_v27  ;;  %10060 = vst [vmem:[#allocation55_spill] sm:$0xff] %v6836_v26  ;;  %v6854_v30 = vld [vmem:[%s9709_s7 + $0x5e4] ss:$72 sps:$4 sm:$0xff]   ;;  %v6884_v37 = vld [vmem:[%s9709_s7 + $0x700] ss:$72 sps:$4 sm:$0xff]   ;;  %10069 = vst [vmem:[#allocation64_spill] sm:$0xff] %v6890_v38 }
 0x2ab   : > { %2750 = vmatprep.subr.bf16.mxu1 %v2722_v52  ;;  %10063 = vst [vmem:[#allocation58_spill] sm:$0xff] %v6854_v30  ;;  %10068 = vst [vmem:[#allocation63_spill] sm:$0xff] %v6884_v37  ;;  %v6896_v52 = vld [vmem:[%s9709_s7 + $0x790] ss:$72 sps:$4 sm:$0xff]  }
 0x2ac   : > { %10070 = vst [vmem:[#allocation65_spill] sm:$0xff] %v6896_v52  ;;  %v7006_v27 = vld [vmem:[%s9709_s7 + $0x368] ss:$72 sps:$4 sm:$0xff]  }
 0x2ad   : > { %2691 = vmatpush1.bf16.msra.mxu0 %v6824_v25  ;;  %10088 = vst [vmem:[#allocation83_spill] sm:$0xff] %v7006_v27 }
 0x2ae   : > { %2751 = vmatpush1.bf16.msra.mxu1 %v2721_v34  ;;  %2692 = vmatprep.subr.bf16.mxu0 %v6830_v32  ;;  %v6866_v34 = vld [vmem:[%s9709_s7 + $0x674] ss:$72 sps:$4 sm:$0xff]  }
 0x2af   : > { %10065 = vst [vmem:[#allocation60_spill] sm:$0xff] %v6866_v34 }
 0x2b1   : > { %2693 = vmatpush1.bf16.msra.mxu0 %v6836_v26 }
 0x2b2   : > { %2694 = vmatprep.subr.bf16.mxu0 %v6842_v28 }
 0x2b5   : > { %2695 = vmatpush1.bf16.msra.mxu0 %v6848_v29 }
 0x2b6   : > { %2696 = vmatprep.subr.bf16.mxu0 %v6854_v30  ;;  %v6994_v30 = vld [vmem:[%s9709_s7 + $0x2d8] ss:$72 sps:$4 sm:$0xff]  }
 0x2b7   : > { %10086 = vst [vmem:[#allocation81_spill] sm:$0xff] %v6994_v30 }
 0x2b9   : > { %2697 = vmatpush1.bf16.msra.mxu0 %v6860_v33 }
 0x2ba   : > { %2698 = vmatprep.subr.bf16.mxu0 %v6866_v34 }
 0x2bd   : > { %2699 = vmatpush1.bf16.msra.mxu0 %v6872_v35  ;;  %v6902_v35 = vld [vmem:[%s9709_s7 + $0x824] ss:$72 sps:$4 sm:$0xff]  }
 0x2be   : > { %2700 = vmatprep.subr.bf16.mxu0 %v6878_v36  ;;  %10071 = vst [vmem:[#allocation66_spill] sm:$0xff] %v6902_v35  ;;  %v6908_v36 = vld [vmem:[%s9709_s7 + $0x820] ss:$72 sps:$4 sm:$0xff]  }
 0x2bf   : > { %10072 = vst [vmem:[#allocation67_spill] sm:$0xff] %v6908_v36 }
 0x2c1   : > { %2701 = vmatpush1.bf16.msra.mxu0 %v6884_v37  ;;  %v6914_v37 = vld [vmem:[%s9709_s7 + $0x8b4] ss:$72 sps:$4 sm:$0xff]  }
 0x2c2   : > { %2702 = vmatprep.subr.bf16.mxu0 %v6890_v38  ;;  %10073 = vst [vmem:[#allocation68_spill] sm:$0xff] %v6914_v37  ;;  %v6920_v38 = vld [vmem:[%s9709_s7 + $0x8b0] ss:$72 sps:$4 sm:$0xff]  }
 0x2c3   : > { %10074 = vst [vmem:[#allocation69_spill] sm:$0xff] %v6920_v38 }
 0x2c5   : > { %2703 = vmatpush1.bf16.msra.mxu0 %v6896_v52 }
 0x2c6   : > { %2704 = vmatprep.subr.bf16.mxu0 %v6902_v35  ;;  %v6927_v35 = vld [vmem:[%s9709_s7 + $0xc] ss:$72 sps:$4 sm:$0xff]  }
 0x2c7   : > { %10075 = vst [vmem:[#allocation70_spill] sm:$0xff] %v6927_v35 }
 0x2c9   : > { %2705 = vmatpush1.bf16.msra.mxu0 %v6908_v36  ;;  %v6934_v36 = vld [vmem:[%s9709_s7 + $0x8] ss:$72 sps:$4 sm:$0xff]  }
 0x2ca   : > { %2706 = vmatprep.subr.bf16.mxu0 %v6914_v37  ;;  %10076 = vst [vmem:[#allocation71_spill] sm:$0xff] %v6934_v36 }
 0x2cd   : > { %2707 = vmatpush1.bf16.msra.mxu0 %v6920_v38  ;;  %v6940_v38 = vld [vmem:[%s9709_s7 + $0x9c] ss:$72 sps:$4 sm:$0xff]  }
 0x2ce   : > { %2850 = vmatprep.subr.bf16.mxu0 %v6927_v35  ;;  %10077 = vst [vmem:[#allocation72_spill] sm:$0xff] %v6940_v38  ;;  %v6946_v35 = vld [vmem:[%s9709_s7 + $0x98] ss:$72 sps:$4 sm:$0xff]  }
 0x2cf   : > { %10078 = vst [vmem:[#allocation73_spill] sm:$0xff] %v6946_v35 }
 0x2d0   : > { %2709 = vmatmul.mubr.bf16.vlgmr.msra.gmra.mrb[24].mxu0 %v5915_v53  ;;  %v6952_v53 = vld [vmem:[%s9709_s7 + $0x12c] ss:$72 sps:$4 sm:$0xff]  }
 0x2d1   : > { %2851 = vmatpush1.bf16.msra.mxu0 %v6934_v36  ;;  %10079 = vst [vmem:[#allocation74_spill] sm:$0xff] %v6952_v53  ;;  %v6958_v36 = vld [vmem:[%s9709_s7 + $0x128] ss:$72 sps:$4 sm:$0xff]  }
 0x2d2   : > { %2852 = vmatprep.subr.bf16.mxu0 %v6940_v38  ;;  %10080 = vst [vmem:[#allocation75_spill] sm:$0xff] %v6958_v36  ;;  %v6964_v38 = vld [vmem:[%s9709_s7 + $0x1bc] ss:$72 sps:$4 sm:$0xff]  }
 0x2d3   : > { %10081 = vst [vmem:[#allocation76_spill] sm:$0xff] %v6964_v38 }
 0x2d5   : > { %2853 = vmatpush1.bf16.msra.mxu0 %v6946_v35  ;;  %v6970_v35 = vld [vmem:[%s9709_s7 + $0x1b8] ss:$72 sps:$4 sm:$0xff]  }
 0x2d6   : > { %2854 = vmatprep.subr.bf16.mxu0 %v6952_v53  ;;  %10082 = vst [vmem:[#allocation77_spill] sm:$0xff] %v6970_v35  ;;  %v6976_v53 = vld [vmem:[%s9709_s7 + $0x24c] ss:$72 sps:$4 sm:$0xff]  }
 0x2d7   : > { %10083 = vst [vmem:[#allocation78_spill] sm:$0xff] %v6976_v53 }
 0x2d9   : > { %2855 = vmatpush1.bf16.msra.mxu0 %v6958_v36  ;;  %v6982_v36 = vld [vmem:[%s9709_s7 + $0x248] ss:$72 sps:$4 sm:$0xff]  }
 0x2da   : > { %2856 = vmatprep.subr.bf16.mxu0 %v6964_v38  ;;  %10084 = vst [vmem:[#allocation79_spill] sm:$0xff] %v6982_v36  ;;  %v6988_v38 = vld [vmem:[%s9709_s7 + $0x2dc] ss:$72 sps:$4 sm:$0xff]  }
 0x2db   : > { %10085 = vst [vmem:[#allocation80_spill] sm:$0xff] %v6988_v38 }
 0x2dd   : > { %2857 = vmatpush1.bf16.msra.mxu0 %v6970_v35 }
 0x2de   : > { %2858 = vmatprep.subr.bf16.mxu0 %v6976_v53 }
 0x2e1   : > { %2859 = vmatpush1.bf16.msra.mxu0 %v6982_v36 }
 0x2e2   : > { %2860 = vmatprep.subr.bf16.mxu0 %v6988_v38  ;;  %v7000_v38 = vld [vmem:[%s9709_s7 + $0x36c] ss:$72 sps:$4 sm:$0xff]  }
 0x2e3   : > { %v2452_v35 = vpop.f32.mrb[12].mxu0  ;;  %v2495_v37 = vpop.f32.mrb[12].mxu1  ;;  %10087 = vst [vmem:[#allocation82_spill] sm:$0xff] %v7000_v38 }
 0x2e4   : > { %v2454_v52 = vpop.f32.mrb[13].mxu0  ;;  %v2497_v34 = vpop.f32.mrb[13].mxu1 }
 0x2e5   : > { %v2456_v33 = vpop.f32.mrb[14].mxu0  ;;  %v2499_v53 = vpop.f32.mrb[14].mxu1  ;;  %2861 = vmatpush1.bf16.msra.mxu0 %v6994_v30 }
 0x2e6   : > { %v2723_v36 = vpack.c.bf16 %v2456_v33, %v2452_v35  ;;  %v2725_v29 = vpack.c.bf16 %v2499_v53, %v2495_v37  ;;  %v2458_v28 = vpop.f32.mrb[15].mxu0  ;;  %v2501_v26 = vpop.f32.mrb[15].mxu1  ;;  %2862 = vmatprep.subr.bf16.mxu0 %v7000_v38  ;;  %v7012_v33 = vld [vmem:[%s9709_s7 + $0x3fc] ss:$72 sps:$4 sm:$0xff]   ;;  %v7054_v35 = vld [vmem:[%s9709_s7 + $0x5a8] ss:$72 sps:$4 sm:$0xff]  }
 0x2e7   : > { %v2724_v32 = vpack.c.bf16 %v2458_v28, %v2454_v52  ;;  %v2726_v25 = vpack.c.bf16 %v2501_v26, %v2497_v34  ;;  %10089 = vst [vmem:[#allocation84_spill] sm:$0xff] %v7012_v33  ;;  %v7024_v26 = vld [vmem:[%s9709_s7 + $0x48c] ss:$72 sps:$4 sm:$0xff]   ;;  %v7030_v28 = vld [vmem:[%s9709_s7 + $0x488] ss:$72 sps:$4 sm:$0xff]   ;;  %10096 = vst [vmem:[#allocation91_spill] sm:$0xff] %v7054_v35 }
 0x2e8   : > { %10091 = vst [vmem:[#allocation86_spill] sm:$0xff] %v7024_v26  ;;  %10092 = vst [vmem:[#allocation87_spill] sm:$0xff] %v7030_v28  ;;  %v7048_v34 = vld [vmem:[%s9709_s7 + $0x5ac] ss:$72 sps:$4 sm:$0xff]   ;;  %v7066_v37 = vld [vmem:[%s9709_s7 + $0x638] ss:$72 sps:$4 sm:$0xff]  }
 0x2e9   : > { %2752 = vmatprep.subr.bf16.mxu1 %v2724_v32  ;;  %2863 = vmatpush1.bf16.msra.mxu0 %v7006_v27  ;;  %v7018_v32 = vld [vmem:[%s9709_s7 + $0x3f8] ss:$72 sps:$4 sm:$0xff]   ;;  %10095 = vst [vmem:[#allocation90_spill] sm:$0xff] %v7048_v34  ;;  %10098 = vst [vmem:[#allocation93_spill] sm:$0xff] %v7066_v37  ;;  %v7072_v52 = vld [vmem:[%s9709_s7 + $0x6cc] ss:$72 sps:$4 sm:$0xff]  }
 0x2ea   : > { %2753 = vmatpush1.bf16.msra.mxu1 %v2723_v36  ;;  %2864 = vmatprep.subr.bf16.mxu0 %v7012_v33  ;;  %10090 = vst [vmem:[#allocation85_spill] sm:$0xff] %v7018_v32  ;;  %v7060_v36 = vld [vmem:[%s9709_s7 + $0x63c] ss:$72 sps:$4 sm:$0xff]   ;;  %10099 = vst [vmem:[#allocation94_spill] sm:$0xff] %v7072_v52  ;;  %v7078_v53 = vld [vmem:[%s9709_s7 + $0x6c8] ss:$72 sps:$4 sm:$0xff]  }
 0x2eb   : > { %2754 = vmatprep.subr.bf16.mxu1 %v2726_v25  ;;  %v7036_v25 = vld [vmem:[%s9709_s7 + $0x51c] ss:$72 sps:$4 sm:$0xff]   ;;  %10097 = vst [vmem:[#allocation92_spill] sm:$0xff] %v7060_v36  ;;  %10100 = vst [vmem:[#allocation95_spill] sm:$0xff] %v7078_v53 }
 0x2ec   : > { %10093 = vst [vmem:[#allocation88_spill] sm:$0xff] %v7036_v25 }
 0x2ed   : > { %2865 = vmatpush1.bf16.msra.mxu0 %v7018_v32 }
 0x2ee   : > { %2755 = vmatpush1.bf16.msra.mxu1 %v2725_v29  ;;  %2866 = vmatprep.subr.bf16.mxu0 %v7024_v26  ;;  %v7042_v29 = vld [vmem:[%s9709_s7 + $0x518] ss:$72 sps:$4 sm:$0xff]  }
 0x2ef   : > { %10094 = vst [vmem:[#allocation89_spill] sm:$0xff] %v7042_v29 }
 0x2f1   : > { %2867 = vmatpush1.bf16.msra.mxu0 %v7030_v28 }
 0x2f2   : > { %2868 = vmatprep.subr.bf16.mxu0 %v7036_v25 }
 0x2f5   : > { %2869 = vmatpush1.bf16.msra.mxu0 %v7042_v29 }
 0x2f6   : > { %2870 = vmatprep.subr.bf16.mxu0 %v7048_v34 }
 0x2f9   : > { %2871 = vmatpush1.bf16.msra.mxu0 %v7054_v35 }
 0x2fa   : > { %2872 = vmatprep.subr.bf16.mxu0 %v7060_v36  ;;  %v7084_v36 = vld [vmem:[%s9709_s7 + $0x75c] ss:$72 sps:$4 sm:$0xff]  }
 0x2fb   : > { %10101 = vst [vmem:[#allocation96_spill] sm:$0xff] %v7084_v36 }
 0x2fd   : > { %2873 = vmatpush1.bf16.msra.mxu0 %v7066_v37  ;;  %v7090_v37 = vld [vmem:[%s9709_s7 + $0x758] ss:$72 sps:$4 sm:$0xff]  }
 0x2fe   : > { %2874 = vmatprep.subr.bf16.mxu0 %v7072_v52  ;;  %10102 = vst [vmem:[#allocation97_spill] sm:$0xff] %v7090_v37  ;;  %v7096_v52 = vld [vmem:[%s9709_s7 + $0x7ec] ss:$72 sps:$4 sm:$0xff]  }
 0x2ff   : > { %10103 = vst [vmem:[#allocation98_spill] sm:$0xff] %v7096_v52 }
 0x301   : > { %2875 = vmatpush1.bf16.msra.mxu0 %v7078_v53  ;;  %v7102_v53 = vld [vmem:[%s9709_s7 + $0x7e8] ss:$72 sps:$4 sm:$0xff]  }
 0x302   : > { %2876 = vmatprep.subr.bf16.mxu0 %v7084_v36  ;;  %10104 = vst [vmem:[#allocation99_spill] sm:$0xff] %v7102_v53  ;;  %v7108_v36 = vld [vmem:[%s9709_s7 + $0x87c] ss:$72 sps:$4 sm:$0xff]  }
 0x303   : > { %10105 = vst [vmem:[#allocation100_spill] sm:$0xff] %v7108_v36 }
 0x305   : > { %2877 = vmatpush1.bf16.msra.mxu0 %v7090_v37  ;;  %v7114_v37 = vld [vmem:[%s9709_s7 + $0x878] ss:$72 sps:$4 sm:$0xff]  }
 0x306   : > { %2878 = vmatprep.subr.bf16.mxu0 %v7096_v52  ;;  %10106 = vst [vmem:[#allocation101_spill] sm:$0xff] %v7114_v37  ;;  %v7120_v52 = vld [vmem:[%s9709_s7 + $0x1c] ss:$72 sps:$4 sm:$0xff]  }
 0x307   : > { %10107 = vst [vmem:[#allocation102_spill] sm:$0xff] %v7120_v52 }
 0x309   : > { %2879 = vmatpush1.bf16.msra.mxu0 %v7102_v53 }
 0x30a   : > { %2880 = vmatprep.subr.bf16.mxu0 %v7108_v36 }
 0x30d   : > { %2881 = vmatpush1.bf16.msra.mxu0 %v7114_v37  ;;  %v2737_v37 = vld [vmem:[%s9707_s5] sm:$0xff] }
 0x30e   : > { %2936 = vmatprep.subr.bf16.mxu0 %v7120_v52  ;;  %v4620_v52 = vcombine.high %v2737_v37, %v2737_v37  ;;  %v4619_v22 = vcombine.low %v2737_v37, %v2737_v37  ;;  %v7166_v37 = vld [vmem:[%s9709_s7 + $0x1b4] ss:$72 sps:$4 sm:$0xff]  }
 0x310   : > { %4621 = vmatprep.mubr.msk.bf16.mxu1 %vm2744_vm4, %v4620_v52 }
 0x323   : > { %v2538_v53 = vpop.f32.mrb[16].mxu0 }
 0x324   : > { %v2581_v35 = vpop.f32.mrb[16].mxu1  ;;  %v2540_v34 = vpop.f32.mrb[17].mxu0 }
 0x325   : > { %v2583_v29 = vpop.f32.mrb[17].mxu1  ;;  %v2542_v25 = vpop.f32.mrb[18].mxu0 }
 0x326   : > { %v2727_v36 = vpack.c.bf16 %v2542_v25, %v2538_v53  ;;  %v2585_v28 = vpop.f32.mrb[18].mxu1  ;;  %v2544_v26 = vpop.f32.mrb[19].mxu0 }
 0x327   : > { %v2729_v32 = vpack.c.bf16 %v2585_v28, %v2581_v35  ;;  %v2728_v33 = vpack.c.bf16 %v2544_v26, %v2540_v34  ;;  %v2587_v27 = vpop.f32.mrb[19].mxu1 }
 0x328   : > { %v2730_v38 = vpack.c.bf16 %v2587_v27, %v2583_v29 }
 0x329   : > { %2756 = vmatprep.subr.bf16.mxu1 %v2728_v33 }
 0x32a   : > { %2757 = vmatpush1.bf16.msra.mxu1 %v2727_v36 }
 0x32b   : > { %2758 = vmatprep.subr.bf16.mxu1 %v2730_v38 }
 0x32e   : > { %2759 = vmatpush1.bf16.msra.mxu1 %v2729_v32 }
 0x363   : > { %v2624_v30 = vpop.f32.mrb[20].mxu0 }
 0x364   : > { %v2667_v25 = vpop.f32.mrb[20].mxu1  ;;  %v2626_v53 = vpop.f32.mrb[21].mxu0 }
 0x365   : > { %v2669_v31 = vpop.f32.mrb[21].mxu1  ;;  %v2628_v28 = vpop.f32.mrb[22].mxu0 }
 0x366   : > { %v2731_v26 = vpack.c.bf16 %v2628_v28, %v2624_v30  ;;  %v2671_v34 = vpop.f32.mrb[22].mxu1  ;;  %v2630_v27 = vpop.f32.mrb[23].mxu0  ;;  %v7130_v30 = vld [vmem:[%s9709_s7 + $0x4] ss:$72 sps:$4 sm:$0xff]   ;;  %v7184_v28 = vld [vmem:[%s9709_s7 + $0x240] ss:$72 sps:$4 sm:$0xff]  }
 0x367   : > { %v2733_v33 = vpack.c.bf16 %v2671_v34, %v2667_v25  ;;  %v2732_v29 = vpack.c.bf16 %v2630_v27, %v2626_v53  ;;  %v2673_v35 = vpop.f32.mrb[23].mxu1  ;;  %v7172_v25 = vld [vmem:[%s9709_s7 + $0x1b0] ss:$72 sps:$4 sm:$0xff]   ;;  %v7178_v53 = vld [vmem:[%s9709_s7 + $0x244] ss:$72 sps:$4 sm:$0xff]   ;;  %10109 = vst [vmem:[#allocation104_spill] sm:$0xff] %v7184_v28 }
 0x368   : > { %v2734_v36 = vpack.c.bf16 %v2673_v35, %v2669_v31  ;;  %v7136_v31 = vld [vmem:[%s9709_s7] ss:$72 sps:$4 sm:$0xff]   ;;  %10108 = vst [vmem:[#allocation103_spill] sm:$0xff] %v7178_v53  ;;  %v7196_v34 = vld [vmem:[%s9709_s7 + $0x2d0] ss:$72 sps:$4 sm:$0xff]  }
 0x369   : > { %2760 = vmatprep.subr.bf16.mxu1 %v2732_v29  ;;  %10111 = vst [vmem:[#allocation106_spill] sm:$0xff] %v7196_v34  ;;  %v7202_v27 = vld [vmem:[%s9709_s7 + $0x364] ss:$72 sps:$4 sm:$0xff]   ;;  %v7214_v29 = vld [vmem:[%s9709_s7 + $0x3f4] ss:$72 sps:$4 sm:$0xff]  }
 0x36a   : > { %2761 = vmatpush1.bf16.msra.mxu1 %v2731_v26  ;;  %v7190_v26 = vld [vmem:[%s9709_s7 + $0x2d4] ss:$72 sps:$4 sm:$0xff]   ;;  %10112 = vst [vmem:[#allocation107_spill] sm:$0xff] %v7202_v27  ;;  %10114 = vst [vmem:[#allocation109_spill] sm:$0xff] %v7214_v29  ;;  %v7220_v35 = vld [vmem:[%s9709_s7 + $0x3f0] ss:$72 sps:$4 sm:$0xff]  }
 0x36b   : > { %2762 = vmatprep.subr.bf16.mxu1 %v2734_v36  ;;  %10110 = vst [vmem:[#allocation105_spill] sm:$0xff] %v7190_v26  ;;  %10115 = vst [vmem:[#allocation110_spill] sm:$0xff] %v7220_v35  ;;  %v7226_v36 = vld [vmem:[%s9709_s7 + $0x484] ss:$72 sps:$4 sm:$0xff]  }
 0x36c   : > { %10116 = vst [vmem:[#allocation111_spill] sm:$0xff] %v7226_v36 }
 0x36e   : > { %2763 = vmatpush1.bf16.msra.mxu1 %v2733_v33  ;;  %v7208_v33 = vld [vmem:[%s9709_s7 + $0x360] ss:$72 sps:$4 sm:$0xff]  }
 0x36f   : > { %10113 = vst [vmem:[#allocation108_spill] sm:$0xff] %v7208_v33 }
 0x3a3   : > { %v2710_v38 = vpop.f32.mrb[24].mxu0 }
 0x3a4   : > { %v2712_v40 = vpop.f32.mrb[25].mxu0 }
 0x3a5   : > { %v2714_v52 = vpop.f32.mrb[26].mxu0 }
 0x3a6   : > { %v2735_v32 = vpack.c.bf16 %v2714_v52, %v2710_v38  ;;  %v2716_v24 = vpop.f32.mrb[27].mxu0  ;;  %v7232_v38 = vld [vmem:[%s9709_s7 + $0x480] ss:$72 sps:$4 sm:$0xff]   ;;  %v7238_v52 = vld [vmem:[%s9709_s7 + $0x514] ss:$72 sps:$4 sm:$0xff]  }
 0x3a7   : > { %v2736_v23 = vpack.c.bf16 %v2716_v24, %v2712_v40  ;;  %v7148_v24 = vld [vmem:[%s9709_s7 + $0x90] ss:$72 sps:$4 sm:$0xff]   ;;  %v7160_v40 = vld [vmem:[%s9709_s7 + $0x120] ss:$72 sps:$4 sm:$0xff]   ;;  %10117 = vst [vmem:[#allocation112_spill] sm:$0xff] %v7232_v38  ;;  %10118 = vst [vmem:[#allocation113_spill] sm:$0xff] %v7238_v52 }
 0x3a9   : > { %2764 = vmatprep.subr.bf16.mxu1 %v2736_v23  ;;  %v7142_v23 = vld [vmem:[%s9709_s7 + $0x94] ss:$72 sps:$4 sm:$0xff]  }
 0x3aa   : > { %2765 = vmatpush1.bf16.msra.mxu1 %v2735_v32  ;;  %v7244_v32 = vld [vmem:[%s9709_s7 + $0x510] ss:$72 sps:$4 sm:$0xff]  }
 0x3ab   : > { %2807 = vmatprep.subr.bf16.mxu1 %v7130_v30  ;;  %10119 = vst [vmem:[#allocation114_spill] sm:$0xff] %v7244_v32 }
 0x3ad   : > { %2781 = vmatmul.mubr.bf16.vlgmr.msra.gmra.mrb[24].mxu1 %v4619_v22  ;;  %v7154_v22 = vld [vmem:[%s9709_s7 + $0x124] ss:$72 sps:$4 sm:$0xff]  }
 0x3ae   : > { %2808 = vmatpush1.bf16.msra.mxu1 %v7136_v31 }
 0x3af   : > { %2809 = vmatprep.subr.bf16.mxu1 %v7142_v23 }
 0x3b2   : > { %2810 = vmatpush1.bf16.msra.mxu1 %v7148_v24 }
 0x3b3   : > { %2811 = vmatprep.subr.bf16.mxu1 %v7154_v22 }
 0x3b6   : > { %2812 = vmatpush1.bf16.msra.mxu1 %v7160_v40 }
 0x3b7   : > { %2813 = vmatprep.subr.bf16.mxu1 %v7166_v37 }
 0x3ba   : > { %2814 = vmatpush1.bf16.msra.mxu1 %v7172_v25 }
 0x3bb   : > { %2815 = vmatprep.subr.bf16.mxu1 %v7178_v53 }
 0x3be   : > { %2816 = vmatpush1.bf16.msra.mxu1 %v7184_v28 }
 0x3bf   : > { %2817 = vmatprep.subr.bf16.mxu1 %v7190_v26 }
 0x3c2   : > { %2818 = vmatpush1.bf16.msra.mxu1 %v7196_v34 }
 0x3c3   : > { %2819 = vmatprep.subr.bf16.mxu1 %v7202_v27 }
 0x3c6   : > { %2820 = vmatpush1.bf16.msra.mxu1 %v7208_v33 }
 0x3c7   : > { %2821 = vmatprep.subr.bf16.mxu1 %v7214_v29 }
 0x3ca   : > { %2822 = vmatpush1.bf16.msra.mxu1 %v7220_v35 }
 0x3cb   : > { %2823 = vmatprep.subr.bf16.mxu1 %v7226_v36  ;;  %v7250_v36 = vld [vmem:[%s9709_s7 + $0x5a4] ss:$72 sps:$4 sm:$0xff]  }
 0x3cc   : > { %10120 = vst [vmem:[#allocation115_spill] sm:$0xff] %v7250_v36 }
 0x3ce   : > { %2824 = vmatpush1.bf16.msra.mxu1 %v7232_v38  ;;  %v7256_v38 = vld [vmem:[%s9709_s7 + $0x5a0] ss:$72 sps:$4 sm:$0xff]  }
 0x3cf   : > { %2825 = vmatprep.subr.bf16.mxu1 %v7238_v52  ;;  %10121 = vst [vmem:[#allocation116_spill] sm:$0xff] %v7256_v38  ;;  %v7262_v52 = vld [vmem:[%s9709_s7 + $0x634] ss:$72 sps:$4 sm:$0xff]  }
 0x3d0   : > { %10122 = vst [vmem:[#allocation117_spill] sm:$0xff] %v7262_v52 }
 0x3d2   : > { %2826 = vmatpush1.bf16.msra.mxu1 %v7244_v32  ;;  %v7268_v32 = vld [vmem:[%s9709_s7 + $0x630] ss:$72 sps:$4 sm:$0xff]  }
 0x3d3   : > { %2827 = vmatprep.subr.bf16.mxu1 %v7250_v36  ;;  %10123 = vst [vmem:[#allocation118_spill] sm:$0xff] %v7268_v32  ;;  %v7274_v36 = vld [vmem:[%s9709_s7 + $0x6c4] ss:$72 sps:$4 sm:$0xff]  }
 0x3d4   : > { %10124 = vst [vmem:[#allocation119_spill] sm:$0xff] %v7274_v36 }
 0x3d6   : > { %2828 = vmatpush1.bf16.msra.mxu1 %v7256_v38  ;;  %v7280_v38 = vld [vmem:[%s9709_s7 + $0x6c0] ss:$72 sps:$4 sm:$0xff]  }
 0x3d7   : > { %2829 = vmatprep.subr.bf16.mxu1 %v7262_v52  ;;  %10125 = vst [vmem:[#allocation120_spill] sm:$0xff] %v7280_v38  ;;  %v7286_v52 = vld [vmem:[%s9709_s7 + $0x754] ss:$72 sps:$4 sm:$0xff]  }
 0x3d8   : > { %10126 = vst [vmem:[#allocation121_spill] sm:$0xff] %v7286_v52 }
 0x3da   : > { %2830 = vmatpush1.bf16.msra.mxu1 %v7268_v32  ;;  %v7292_v32 = vld [vmem:[%s9709_s7 + $0x750] ss:$72 sps:$4 sm:$0xff]  }
 0x3db   : > { %2831 = vmatprep.subr.bf16.mxu1 %v7274_v36  ;;  %10127 = vst [vmem:[#allocation122_spill] sm:$0xff] %v7292_v32  ;;  %v7304_v36 = vld [vmem:[%s9709_s7 + $0x7e0] ss:$72 sps:$4 sm:$0xff]  }
 0x3dc   : > { %10129 = vst [vmem:[#allocation124_spill] sm:$0xff] %v7304_v36 }
 0x3de   : > { %2832 = vmatpush1.bf16.msra.mxu1 %v7280_v38  ;;  %v7298_v38 = vld [vmem:[%s9709_s7 + $0x7e4] ss:$72 sps:$4 sm:$0xff]  }
 0x3df   : > { %2833 = vmatprep.subr.bf16.mxu1 %v7286_v52  ;;  %10128 = vst [vmem:[#allocation123_spill] sm:$0xff] %v7298_v38  ;;  %v7310_v52 = vld [vmem:[%s9709_s7 + $0x874] ss:$72 sps:$4 sm:$0xff]  }
 0x3e0   : > { %10130 = vst [vmem:[#allocation125_spill] sm:$0xff] %v7310_v52 }
 0x3e2   : > { %2834 = vmatpush1.bf16.msra.mxu1 %v7292_v32  ;;  %v7316_v32 = vld [vmem:[%s9709_s7 + $0x870] ss:$72 sps:$4 sm:$0xff]  }
 0x3e3   : > { %2835 = vmatprep.subr.bf16.mxu1 %v7298_v38  ;;  %10131 = vst [vmem:[#allocation126_spill] sm:$0xff] %v7316_v32  ;;  %v7322_v38 = vld [vmem:[%s9709_s7 + $0x14] ss:$72 sps:$4 sm:$0xff]  }
 0x3e6   : > { %2836 = vmatpush1.bf16.msra.mxu1 %v7304_v36 }
 0x3e7   : > { %2837 = vmatprep.subr.bf16.mxu1 %v7310_v52 }
 0x3ea   : > { %2838 = vmatpush1.bf16.msra.mxu1 %v7316_v32 }
 0x3eb   : > { %2893 = vmatprep.subr.bf16.mxu1 %v7322_v38 }
 0x480   : > { %v2782_v36 = vpop.f32.mrb[24].mxu1 }
 0x481   : > { %v4622_v35 = vclamps-f32 %v2782_v36, 1.0  ;;  %4216 = vst [vmem:[%s5668_s23] sm:$0xff] %v2782_v36  ;;  %v2784_v29 = vpop.f32.mrb[25].mxu1 }
 0x482   : > { %v4623_v33 = vclamps-f32 %v2784_v29, 1.0  ;;  %4217 = vst [vmem:[%s5668_s23 + $0x8] sm:$0xff] %v2784_v29  ;;  %v2786_v52 = vpop.f32.mrb[26].mxu1  ;;  %v7380_v29 = vld [vmem:[%s9709_s7 + $0xa8] ss:$72 sps:$4 sm:$0xff]  }
 0x483   : > { %v7327_v27 = vpack.c.bf16 %v4622_v35, %v4622_v35  ;;  %v2787_v34 = vpop.f32.mrb[27].mxu1  ;;  %10132 = vst [vmem:[#allocation127_spill] sm:$0xff] %v7380_v29  ;;  %v7386_v35 = vld [vmem:[%s9709_s7 + $0x134] ss:$72 sps:$4 sm:$0xff]  }
 0x484   : > { %v7329_v26 = vpack.c.bf16 %v4623_v33, %v4623_v33  ;;  %v7348_v34 = vld [vmem:[%s9709_s7 + $0x10] ss:$72 sps:$4 sm:$0xff]   ;;  %v7374_v33 = vld [vmem:[%s9709_s7 + $0xa0] ss:$72 sps:$4 sm:$0xff]   ;;  %10133 = vst [vmem:[#allocation128_spill] sm:$0xff] %v7386_v35 }
 0x485   : > { %v2797_v32 = vrot.slane %v7327_v27, 4  ;;  %v7392_v52 = vld [vmem:[%s9709_s7 + $0x13c] ss:$72 sps:$4 sm:$0xff]  }
 0x486   : > { %v2798_v28 = vrot.slane %v7329_v26, 4  ;;  %10134 = vst [vmem:[#allocation129_spill] sm:$0xff] %v7392_v52 }
 0x487   : > { %v7339_v36 = vsel %vm350_vm1, %v5899_v39, %v2797_v32  ;;  %v7354_v39 = vld [vmem:[%s9709_s7 + $0x18] ss:$72 sps:$4 sm:$0xff]  }
 0x488   : > { %v7335_v53 = vsel %vm350_vm1, %v5901_v43, %v2798_v28  ;;  %v7362_v43 = vld [vmem:[%s9709_s7 + $0xa4] ss:$72 sps:$4 sm:$0xff]   ;;  %v7398_v32 = vld [vmem:[%s9709_s7 + $0x130] ss:$72 sps:$4 sm:$0xff]  }
 0x489   : > { %2839 = vmatprep.mubr.bf16.mxu1 %v7335_v53  ;;  %2882 = vmatprep.mubr.bf16.mxu0 %v7335_v53  ;;  %v7368_v28 = vld [vmem:[%s9709_s7 + $0xac] ss:$72 sps:$4 sm:$0xff]   ;;  %10135 = vst [vmem:[#allocation130_spill] sm:$0xff] %v7398_v32 }
 0x48a   : > { %2840 = vmatmul.mubr.bf16.vlgmr.msra.gmra.mrb[28].mxu1 %v7339_v36  ;;  %2883 = vmatmul.mubr.bf16.vlgmr.msra.gmra.mrb[28].mxu0 %v7339_v36 }
 0x48b   : > { %2894 = vmatpush1.bf16.msra.mxu1 %v7348_v34  ;;  %2937 = vmatpush1.bf16.msra.mxu0 %v7354_v39 }
 0x48c   : > { %2925 = vmatprep.mubr.bf16.mxu1 %v7335_v53  ;;  %2968 = vmatprep.mubr.bf16.mxu0 %v7335_v53 }
 0x48d   : > { %2895 = vmatprep.subr.bf16.mxu1 %v7362_v43  ;;  %2938 = vmatprep.subr.bf16.mxu0 %v7368_v28 }
 0x48f   : > { %2896 = vmatpush1.bf16.msra.mxu1 %v7374_v33  ;;  %2939 = vmatpush1.bf16.msra.mxu0 %v7380_v29  ;;  %v7404_v29 = vld [vmem:[%s9709_s7 + $0x138] ss:$72 sps:$4 sm:$0xff]  }
 0x490   : > { %2897 = vmatprep.subr.bf16.mxu1 %v7386_v35  ;;  %2940 = vmatprep.subr.bf16.mxu0 %v7392_v52  ;;  %10136 = vst [vmem:[#allocation131_spill] sm:$0xff] %v7404_v29  ;;  %v7410_v35 = vld [vmem:[%s9709_s7 + $0x1c4] ss:$72 sps:$4 sm:$0xff]  }
 0x491   : > { %10137 = vst [vmem:[#allocation132_spill] sm:$0xff] %v7410_v35  ;;  %v7416_v52 = vld [vmem:[%s9709_s7 + $0x1cc] ss:$72 sps:$4 sm:$0xff]  }
 0x492   : > { %10138 = vst [vmem:[#allocation133_spill] sm:$0xff] %v7416_v52 }
 0x493   : > { %2898 = vmatpush1.bf16.msra.mxu1 %v7398_v32  ;;  %2941 = vmatpush1.bf16.msra.mxu0 %v7404_v29  ;;  %v7422_v32 = vld [vmem:[%s9709_s7 + $0x1c0] ss:$72 sps:$4 sm:$0xff]  }
 0x494   : > { %2899 = vmatprep.subr.bf16.mxu1 %v7410_v35  ;;  %2942 = vmatprep.subr.bf16.mxu0 %v7416_v52  ;;  %10139 = vst [vmem:[#allocation134_spill] sm:$0xff] %v7422_v32  ;;  %v7428_v29 = vld [vmem:[%s9709_s7 + $0x1c8] ss:$72 sps:$4 sm:$0xff]   ;;  %v7434_v35 = vld [vmem:[%s9709_s7 + $0x254] ss:$72 sps:$4 sm:$0xff]  }
 0x495   : > { %10140 = vst [vmem:[#allocation135_spill] sm:$0xff] %v7428_v29  ;;  %10141 = vst [vmem:[#allocation136_spill] sm:$0xff] %v7434_v35  ;;  %v7440_v52 = vld [vmem:[%s9709_s7 + $0x25c] ss:$72 sps:$4 sm:$0xff]  }
 0x496   : > { %10142 = vst [vmem:[#allocation137_spill] sm:$0xff] %v7440_v52 }
 0x497   : > { %2900 = vmatpush1.bf16.msra.mxu1 %v7422_v32  ;;  %2943 = vmatpush1.bf16.msra.mxu0 %v7428_v29  ;;  %v7446_v32 = vld [vmem:[%s9709_s7 + $0x250] ss:$72 sps:$4 sm:$0xff]  }
 0x498   : > { %2901 = vmatprep.subr.bf16.mxu1 %v7434_v35  ;;  %2944 = vmatprep.subr.bf16.mxu0 %v7440_v52  ;;  %10143 = vst [vmem:[#allocation138_spill] sm:$0xff] %v7446_v32  ;;  %v7452_v29 = vld [vmem:[%s9709_s7 + $0x258] ss:$72 sps:$4 sm:$0xff]   ;;  %v7458_v35 = vld [vmem:[%s9709_s7 + $0x2e4] ss:$72 sps:$4 sm:$0xff]  }
 0x499   : > { %10144 = vst [vmem:[#allocation139_spill] sm:$0xff] %v7452_v29  ;;  %10145 = vst [vmem:[#allocation140_spill] sm:$0xff] %v7458_v35  ;;  %v7464_v52 = vld [vmem:[%s9709_s7 + $0x2ec] ss:$72 sps:$4 sm:$0xff]  }
 0x49a   : > { %10146 = vst [vmem:[#allocation141_spill] sm:$0xff] %v7464_v52 }
 0x49b   : > { %2902 = vmatpush1.bf16.msra.mxu1 %v7446_v32  ;;  %2945 = vmatpush1.bf16.msra.mxu0 %v7452_v29  ;;  %v7470_v32 = vld [vmem:[%s9709_s7 + $0x2e0] ss:$72 sps:$4 sm:$0xff]  }
 0x49c   : > { %2903 = vmatprep.subr.bf16.mxu1 %v7458_v35  ;;  %2946 = vmatprep.subr.bf16.mxu0 %v7464_v52  ;;  %10147 = vst [vmem:[#allocation142_spill] sm:$0xff] %v7470_v32  ;;  %v7476_v29 = vld [vmem:[%s9709_s7 + $0x2e8] ss:$72 sps:$4 sm:$0xff]   ;;  %v7482_v35 = vld [vmem:[%s9709_s7 + $0x374] ss:$72 sps:$4 sm:$0xff]  }
 0x49d   : > { %10148 = vst [vmem:[#allocation143_spill] sm:$0xff] %v7476_v29  ;;  %10149 = vst [vmem:[#allocation144_spill] sm:$0xff] %v7482_v35  ;;  %v7488_v52 = vld [vmem:[%s9709_s7 + $0x37c] ss:$72 sps:$4 sm:$0xff]  }
 0x49e   : > { %10150 = vst [vmem:[#allocation145_spill] sm:$0xff] %v7488_v52 }
 0x49f   : > { %2904 = vmatpush1.bf16.msra.mxu1 %v7470_v32  ;;  %2947 = vmatpush1.bf16.msra.mxu0 %v7476_v29  ;;  %v7494_v32 = vld [vmem:[%s9709_s7 + $0x370] ss:$72 sps:$4 sm:$0xff]  }
 0x4a0   : > { %2905 = vmatprep.subr.bf16.mxu1 %v7482_v35  ;;  %2948 = vmatprep.subr.bf16.mxu0 %v7488_v52  ;;  %10151 = vst [vmem:[#allocation146_spill] sm:$0xff] %v7494_v32  ;;  %v7500_v29 = vld [vmem:[%s9709_s7 + $0x378] ss:$72 sps:$4 sm:$0xff]   ;;  %v7506_v35 = vld [vmem:[%s9709_s7 + $0x404] ss:$72 sps:$4 sm:$0xff]  }
 0x4a1   : > { %10152 = vst [vmem:[#allocation147_spill] sm:$0xff] %v7500_v29  ;;  %10153 = vst [vmem:[#allocation148_spill] sm:$0xff] %v7506_v35  ;;  %v7512_v52 = vld [vmem:[%s9709_s7 + $0x40c] ss:$72 sps:$4 sm:$0xff]  }
 0x4a2   : > { %10154 = vst [vmem:[#allocation149_spill] sm:$0xff] %v7512_v52 }
 0x4a3   : > { %2906 = vmatpush1.bf16.msra.mxu1 %v7494_v32  ;;  %2949 = vmatpush1.bf16.msra.mxu0 %v7500_v29  ;;  %v7518_v32 = vld [vmem:[%s9709_s7 + $0x400] ss:$72 sps:$4 sm:$0xff]  }
 0x4a4   : > { %2907 = vmatprep.subr.bf16.mxu1 %v7506_v35  ;;  %2950 = vmatprep.subr.bf16.mxu0 %v7512_v52  ;;  %10155 = vst [vmem:[#allocation150_spill] sm:$0xff] %v7518_v32  ;;  %v7524_v29 = vld [vmem:[%s9709_s7 + $0x408] ss:$72 sps:$4 sm:$0xff]   ;;  %v7530_v35 = vld [vmem:[%s9709_s7 + $0x494] ss:$72 sps:$4 sm:$0xff]  }
 0x4a5   : > { %10156 = vst [vmem:[#allocation151_spill] sm:$0xff] %v7524_v29  ;;  %10157 = vst [vmem:[#allocation152_spill] sm:$0xff] %v7530_v35  ;;  %v7536_v52 = vld [vmem:[%s9709_s7 + $0x49c] ss:$72 sps:$4 sm:$0xff]  }
 0x4a6   : > { %10158 = vst [vmem:[#allocation153_spill] sm:$0xff] %v7536_v52 }
 0x4a7   : > { %2908 = vmatpush1.bf16.msra.mxu1 %v7518_v32  ;;  %2951 = vmatpush1.bf16.msra.mxu0 %v7524_v29  ;;  %v7542_v32 = vld [vmem:[%s9709_s7 + $0x490] ss:$72 sps:$4 sm:$0xff]  }
 0x4a8   : > { %2909 = vmatprep.subr.bf16.mxu1 %v7530_v35  ;;  %2952 = vmatprep.subr.bf16.mxu0 %v7536_v52  ;;  %10159 = vst [vmem:[#allocation154_spill] sm:$0xff] %v7542_v32  ;;  %v7548_v29 = vld [vmem:[%s9709_s7 + $0x498] ss:$72 sps:$4 sm:$0xff]   ;;  %v7554_v35 = vld [vmem:[%s9709_s7 + $0x524] ss:$72 sps:$4 sm:$0xff]  }
 0x4a9   : > { %10160 = vst [vmem:[#allocation155_spill] sm:$0xff] %v7548_v29  ;;  %10161 = vst [vmem:[#allocation156_spill] sm:$0xff] %v7554_v35  ;;  %v7560_v52 = vld [vmem:[%s9709_s7 + $0x52c] ss:$72 sps:$4 sm:$0xff]  }
 0x4aa   : > { %10162 = vst [vmem:[#allocation157_spill] sm:$0xff] %v7560_v52 }
 0x4ab   : > { %2910 = vmatpush1.bf16.msra.mxu1 %v7542_v32  ;;  %2953 = vmatpush1.bf16.msra.mxu0 %v7548_v29  ;;  %v7566_v32 = vld [vmem:[%s9709_s7 + $0x520] ss:$72 sps:$4 sm:$0xff]  }
 0x4ac   : > { %2911 = vmatprep.subr.bf16.mxu1 %v7554_v35  ;;  %2954 = vmatprep.subr.bf16.mxu0 %v7560_v52  ;;  %10163 = vst [vmem:[#allocation158_spill] sm:$0xff] %v7566_v32  ;;  %v7572_v29 = vld [vmem:[%s9709_s7 + $0x528] ss:$72 sps:$4 sm:$0xff]   ;;  %v7578_v35 = vld [vmem:[%s9709_s7 + $0x5b4] ss:$72 sps:$4 sm:$0xff]  }
 0x4ad   : > { %10164 = vst [vmem:[#allocation159_spill] sm:$0xff] %v7572_v29  ;;  %10165 = vst [vmem:[#allocation160_spill] sm:$0xff] %v7578_v35  ;;  %v7584_v52 = vld [vmem:[%s9709_s7 + $0x5bc] ss:$72 sps:$4 sm:$0xff]  }
 0x4ae   : > { %10166 = vst [vmem:[#allocation161_spill] sm:$0xff] %v7584_v52 }
 0x4af   : > { %2912 = vmatpush1.bf16.msra.mxu1 %v7566_v32  ;;  %2955 = vmatpush1.bf16.msra.mxu0 %v7572_v29  ;;  %v7590_v32 = vld [vmem:[%s9709_s7 + $0x5b0] ss:$72 sps:$4 sm:$0xff]  }
 0x4b0   : > { %2913 = vmatprep.subr.bf16.mxu1 %v7578_v35  ;;  %2956 = vmatprep.subr.bf16.mxu0 %v7584_v52  ;;  %10167 = vst [vmem:[#allocation162_spill] sm:$0xff] %v7590_v32  ;;  %v7596_v29 = vld [vmem:[%s9709_s7 + $0x5b8] ss:$72 sps:$4 sm:$0xff]   ;;  %v7602_v35 = vld [vmem:[%s9709_s7 + $0x644] ss:$72 sps:$4 sm:$0xff]  }
 0x4b1   : > { %10168 = vst [vmem:[#allocation163_spill] sm:$0xff] %v7596_v29  ;;  %10169 = vst [vmem:[#allocation164_spill] sm:$0xff] %v7602_v35  ;;  %v7608_v52 = vld [vmem:[%s9709_s7 + $0x64c] ss:$72 sps:$4 sm:$0xff]  }
 0x4b2   : > { %10170 = vst [vmem:[#allocation165_spill] sm:$0xff] %v7608_v52 }
 0x4b3   : > { %2914 = vmatpush1.bf16.msra.mxu1 %v7590_v32  ;;  %2957 = vmatpush1.bf16.msra.mxu0 %v7596_v29  ;;  %v7614_v32 = vld [vmem:[%s9709_s7 + $0x640] ss:$72 sps:$4 sm:$0xff]  }
 0x4b4   : > { %2915 = vmatprep.subr.bf16.mxu1 %v7602_v35  ;;  %2958 = vmatprep.subr.bf16.mxu0 %v7608_v52  ;;  %10171 = vst [vmem:[#allocation166_spill] sm:$0xff] %v7614_v32  ;;  %v7620_v29 = vld [vmem:[%s9709_s7 + $0x648] ss:$72 sps:$4 sm:$0xff]   ;;  %v7626_v35 = vld [vmem:[%s9709_s7 + $0x6d4] ss:$72 sps:$4 sm:$0xff]  }
 0x4b5   : > { %10172 = vst [vmem:[#allocation167_spill] sm:$0xff] %v7620_v29  ;;  %10173 = vst [vmem:[#allocation168_spill] sm:$0xff] %v7626_v35  ;;  %v7632_v52 = vld [vmem:[%s9709_s7 + $0x6dc] ss:$72 sps:$4 sm:$0xff]  }
 0x4b6   : > { %10174 = vst [vmem:[#allocation169_spill] sm:$0xff] %v7632_v52 }
 0x4b7   : > { %2916 = vmatpush1.bf16.msra.mxu1 %v7614_v32  ;;  %2959 = vmatpush1.bf16.msra.mxu0 %v7620_v29  ;;  %v7638_v32 = vld [vmem:[%s9709_s7 + $0x6d0] ss:$72 sps:$4 sm:$0xff]  }
 0x4b8   : > { %2917 = vmatprep.subr.bf16.mxu1 %v7626_v35  ;;  %2960 = vmatprep.subr.bf16.mxu0 %v7632_v52  ;;  %10175 = vst [vmem:[#allocation170_spill] sm:$0xff] %v7638_v32  ;;  %v7644_v29 = vld [vmem:[%s9709_s7 + $0x6d8] ss:$72 sps:$4 sm:$0xff]   ;;  %v7650_v35 = vld [vmem:[%s9709_s7 + $0x764] ss:$72 sps:$4 sm:$0xff]  }
 0x4b9   : > { %10176 = vst [vmem:[#allocation171_spill] sm:$0xff] %v7644_v29  ;;  %10177 = vst [vmem:[#allocation172_spill] sm:$0xff] %v7650_v35  ;;  %v7656_v52 = vld [vmem:[%s9709_s7 + $0x76c] ss:$72 sps:$4 sm:$0xff]  }
 0x4ba   : > { %10178 = vst [vmem:[#allocation173_spill] sm:$0xff] %v7656_v52 }
 0x4bb   : > { %2918 = vmatpush1.bf16.msra.mxu1 %v7638_v32  ;;  %2961 = vmatpush1.bf16.msra.mxu0 %v7644_v29  ;;  %v7662_v32 = vld [vmem:[%s9709_s7 + $0x760] ss:$72 sps:$4 sm:$0xff]  }
 0x4bc   : > { %2919 = vmatprep.subr.bf16.mxu1 %v7650_v35  ;;  %2962 = vmatprep.subr.bf16.mxu0 %v7656_v52  ;;  %10179 = vst [vmem:[#allocation174_spill] sm:$0xff] %v7662_v32  ;;  %v7668_v29 = vld [vmem:[%s9709_s7 + $0x768] ss:$72 sps:$4 sm:$0xff]   ;;  %v7674_v35 = vld [vmem:[%s9709_s7 + $0x7f4] ss:$72 sps:$4 sm:$0xff]  }
 0x4bd   : > { %10180 = vst [vmem:[#allocation175_spill] sm:$0xff] %v7668_v29  ;;  %10181 = vst [vmem:[#allocation176_spill] sm:$0xff] %v7674_v35  ;;  %v7680_v52 = vld [vmem:[%s9709_s7 + $0x7fc] ss:$72 sps:$4 sm:$0xff]  }
 0x4be   : > { %10182 = vst [vmem:[#allocation177_spill] sm:$0xff] %v7680_v52 }
 0x4bf   : > { %2920 = vmatpush1.bf16.msra.mxu1 %v7662_v32  ;;  %2963 = vmatpush1.bf16.msra.mxu0 %v7668_v29  ;;  %v7686_v32 = vld [vmem:[%s9709_s7 + $0x7f0] ss:$72 sps:$4 sm:$0xff]  }
 0x4c0   : > { %2921 = vmatprep.subr.bf16.mxu1 %v7674_v35  ;;  %2964 = vmatprep.subr.bf16.mxu0 %v7680_v52  ;;  %10183 = vst [vmem:[#allocation178_spill] sm:$0xff] %v7686_v32  ;;  %v7692_v29 = vld [vmem:[%s9709_s7 + $0x7f8] ss:$72 sps:$4 sm:$0xff]   ;;  %v7698_v35 = vld [vmem:[%s9709_s7 + $0x884] ss:$72 sps:$4 sm:$0xff]  }
 0x4c1   : > { %10184 = vst [vmem:[#allocation179_spill] sm:$0xff] %v7692_v29  ;;  %10185 = vst [vmem:[#allocation180_spill] sm:$0xff] %v7698_v35  ;;  %v7704_v52 = vld [vmem:[%s9709_s7 + $0x88c] ss:$72 sps:$4 sm:$0xff]  }
 0x4c2   : > { %10186 = vst [vmem:[#allocation181_spill] sm:$0xff] %v7704_v52 }
 0x4c3   : > { %2922 = vmatpush1.bf16.msra.mxu1 %v7686_v32  ;;  %2965 = vmatpush1.bf16.msra.mxu0 %v7692_v29  ;;  %v7710_v32 = vld [vmem:[%s9709_s7 + $0x880] ss:$72 sps:$4 sm:$0xff]  }
 0x4c4   : > { %2923 = vmatprep.subr.bf16.mxu1 %v7698_v35  ;;  %2966 = vmatprep.subr.bf16.mxu0 %v7704_v52  ;;  %10187 = vst [vmem:[#allocation182_spill] sm:$0xff] %v7710_v32  ;;  %v7716_v29 = vld [vmem:[%s9709_s7 + $0x888] ss:$72 sps:$4 sm:$0xff]   ;;  %v7722_v35 = vld [vmem:[%s9709_s7 + $0x24] ss:$72 sps:$4 sm:$0xff]  }
 0x4c5   : > { %10188 = vst [vmem:[#allocation183_spill] sm:$0xff] %v7716_v29  ;;  %10189 = vst [vmem:[#allocation184_spill] sm:$0xff] %v7722_v35  ;;  %v7728_v52 = vld [vmem:[%s9709_s7 + $0x2c] ss:$72 sps:$4 sm:$0xff]  }
 0x4c6   : > { %10190 = vst [vmem:[#allocation185_spill] sm:$0xff] %v7728_v52 }
 0x4c7   : > { %2924 = vmatpush1.bf16.msra.mxu1 %v7710_v32  ;;  %2967 = vmatpush1.bf16.msra.mxu0 %v7716_v29  ;;  %v7736_v29 = vld [vmem:[%s9709_s7 + $0x20] ss:$72 sps:$4 sm:$0xff]  }
 0x4c8   : > { %2979 = vmatprep.subr.bf16.mxu1 %v7722_v35  ;;  %3022 = vmatprep.subr.bf16.mxu0 %v7728_v52  ;;  %10191 = vst [vmem:[#allocation186_spill] sm:$0xff] %v7736_v29  ;;  %v7743_v35 = vld [vmem:[%s9709_s7 + $0x28] ss:$72 sps:$4 sm:$0xff]   ;;  %v7750_v52 = vld [vmem:[%s9709_s7 + $0xb4] ss:$72 sps:$4 sm:$0xff]  }
 0x4c9   : > { %10192 = vst [vmem:[#allocation187_spill] sm:$0xff] %v7743_v35  ;;  %10193 = vst [vmem:[#allocation188_spill] sm:$0xff] %v7750_v52  ;;  %v7768_v32 = vld [vmem:[%s9709_s7 + $0xb8] ss:$72 sps:$4 sm:$0xff]  }
 0x4ca   : > { %2926 = vmatmul.mubr.bf16.vlgmr.msra.gmra.mrb[32].mxu1 %v7339_v36  ;;  %2969 = vmatmul.mubr.bf16.vlgmr.msra.gmra.mrb[32].mxu0 %v7339_v36  ;;  %10196 = vst [vmem:[#allocation191_spill] sm:$0xff] %v7768_v32 }
 0x4cb   : > { %2980 = vmatpush1.bf16.msra.mxu1 %v7736_v29  ;;  %3011 = vmatprep.mubr.bf16.mxu1 %v7335_v53  ;;  %v7756_v29 = vld [vmem:[%s9709_s7 + $0xbc] ss:$72 sps:$4 sm:$0xff]  }
 0x4cc   : > { %3023 = vmatpush1.bf16.msra.mxu0 %v7743_v35  ;;  %3054 = vmatprep.mubr.bf16.mxu0 %v7335_v53  ;;  %10194 = vst [vmem:[#allocation189_spill] sm:$0xff] %v7756_v29  ;;  %v7762_v35 = vld [vmem:[%s9709_s7 + $0xb0] ss:$72 sps:$4 sm:$0xff]  }
 0x4cd   : > { %2981 = vmatprep.subr.bf16.mxu1 %v7750_v52  ;;  %3024 = vmatprep.subr.bf16.mxu0 %v7756_v29  ;;  %10195 = vst [vmem:[#allocation190_spill] sm:$0xff] %v7762_v35  ;;  %v7774_v52 = vld [vmem:[%s9709_s7 + $0x144] ss:$72 sps:$4 sm:$0xff]  }
 0x4ce   : > { %10197 = vst [vmem:[#allocation192_spill] sm:$0xff] %v7774_v52  ;;  %v7780_v29 = vld [vmem:[%s9709_s7 + $0x14c] ss:$72 sps:$4 sm:$0xff]  }
 0x4cf   : > { %2982 = vmatpush1.bf16.msra.mxu1 %v7762_v35  ;;  %10198 = vst [vmem:[#allocation193_spill] sm:$0xff] %v7780_v29  ;;  %v7786_v35 = vld [vmem:[%s9709_s7 + $0x140] ss:$72 sps:$4 sm:$0xff]  }
 0x4d0   : > { %3025 = vmatpush1.bf16.msra.mxu0 %v7768_v32  ;;  %2983 = vmatprep.subr.bf16.mxu1 %v7774_v52  ;;  %10199 = vst [vmem:[#allocation194_spill] sm:$0xff] %v7786_v35  ;;  %v7792_v32 = vld [vmem:[%s9709_s7 + $0x148] ss:$72 sps:$4 sm:$0xff]   ;;  %v7798_v52 = vld [vmem:[%s9709_s7 + $0x1d4] ss:$72 sps:$4 sm:$0xff]  }
 0x4d1   : > { %3026 = vmatprep.subr.bf16.mxu0 %v7780_v29  ;;  %10200 = vst [vmem:[#allocation195_spill] sm:$0xff] %v7792_v32  ;;  %10201 = vst [vmem:[#allocation196_spill] sm:$0xff] %v7798_v52  ;;  %v7804_v29 = vld [vmem:[%s9709_s7 + $0x1dc] ss:$72 sps:$4 sm:$0xff]  }
 0x4d2   : > { %10202 = vst [vmem:[#allocation197_spill] sm:$0xff] %v7804_v29 }
 0x4d3   : > { %2984 = vmatpush1.bf16.msra.mxu1 %v7786_v35  ;;  %v7810_v35 = vld [vmem:[%s9709_s7 + $0x1d0] ss:$72 sps:$4 sm:$0xff]  }
 0x4d4   : > { %3027 = vmatpush1.bf16.msra.mxu0 %v7792_v32  ;;  %2985 = vmatprep.subr.bf16.mxu1 %v7798_v52  ;;  %10203 = vst [vmem:[#allocation198_spill] sm:$0xff] %v7810_v35  ;;  %v7816_v32 = vld [vmem:[%s9709_s7 + $0x1d8] ss:$72 sps:$4 sm:$0xff]   ;;  %v7822_v52 = vld [vmem:[%s9709_s7 + $0x264] ss:$72 sps:$4 sm:$0xff]  }
 0x4d5   : > { %3028 = vmatprep.subr.bf16.mxu0 %v7804_v29  ;;  %10204 = vst [vmem:[#allocation199_spill] sm:$0xff] %v7816_v32  ;;  %10205 = vst [vmem:[#allocation200_spill] sm:$0xff] %v7822_v52  ;;  %v7828_v29 = vld [vmem:[%s9709_s7 + $0x26c] ss:$72 sps:$4 sm:$0xff]  }
 0x4d6   : > { %10206 = vst [vmem:[#allocation201_spill] sm:$0xff] %v7828_v29 }
 0x4d7   : > { %2986 = vmatpush1.bf16.msra.mxu1 %v7810_v35  ;;  %v7834_v35 = vld [vmem:[%s9709_s7 + $0x260] ss:$72 sps:$4 sm:$0xff]  }
 0x4d8   : > { %3029 = vmatpush1.bf16.msra.mxu0 %v7816_v32  ;;  %2987 = vmatprep.subr.bf16.mxu1 %v7822_v52  ;;  %10207 = vst [vmem:[#allocation202_spill] sm:$0xff] %v7834_v35  ;;  %v7840_v32 = vld [vmem:[%s9709_s7 + $0x268] ss:$72 sps:$4 sm:$0xff]   ;;  %v7846_v52 = vld [vmem:[%s9709_s7 + $0x2f4] ss:$72 sps:$4 sm:$0xff]  }
 0x4d9   : > { %3030 = vmatprep.subr.bf16.mxu0 %v7828_v29  ;;  %10208 = vst [vmem:[#allocation203_spill] sm:$0xff] %v7840_v32  ;;  %10209 = vst [vmem:[#allocation204_spill] sm:$0xff] %v7846_v52  ;;  %v7852_v29 = vld [vmem:[%s9709_s7 + $0x2fc] ss:$72 sps:$4 sm:$0xff]  }
 0x4da   : > { %10210 = vst [vmem:[#allocation205_spill] sm:$0xff] %v7852_v29 }
 0x4db   : > { %2988 = vmatpush1.bf16.msra.mxu1 %v7834_v35  ;;  %v7858_v35 = vld [vmem:[%s9709_s7 + $0x2f0] ss:$72 sps:$4 sm:$0xff]  }
 0x4dc   : > { %3031 = vmatpush1.bf16.msra.mxu0 %v7840_v32  ;;  %2989 = vmatprep.subr.bf16.mxu1 %v7846_v52  ;;  %10211 = vst [vmem:[#allocation206_spill] sm:$0xff] %v7858_v35  ;;  %v7864_v32 = vld [vmem:[%s9709_s7 + $0x2f8] ss:$72 sps:$4 sm:$0xff]   ;;  %v7870_v52 = vld [vmem:[%s9709_s7 + $0x384] ss:$72 sps:$4 sm:$0xff]  }
 0x4dd   : > { %3032 = vmatprep.subr.bf16.mxu0 %v7852_v29  ;;  %10212 = vst [vmem:[#allocation207_spill] sm:$0xff] %v7864_v32  ;;  %10213 = vst [vmem:[#allocation208_spill] sm:$0xff] %v7870_v52  ;;  %v7876_v29 = vld [vmem:[%s9709_s7 + $0x38c] ss:$72 sps:$4 sm:$0xff]  }
 0x4de   : > { %10214 = vst [vmem:[#allocation209_spill] sm:$0xff] %v7876_v29 }
 0x4df   : > { %2990 = vmatpush1.bf16.msra.mxu1 %v7858_v35  ;;  %v7882_v35 = vld [vmem:[%s9709_s7 + $0x380] ss:$72 sps:$4 sm:$0xff]  }
 0x4e0   : > { %3033 = vmatpush1.bf16.msra.mxu0 %v7864_v32  ;;  %2991 = vmatprep.subr.bf16.mxu1 %v7870_v52  ;;  %10215 = vst [vmem:[#allocation210_spill] sm:$0xff] %v7882_v35  ;;  %v7888_v32 = vld [vmem:[%s9709_s7 + $0x388] ss:$72 sps:$4 sm:$0xff]   ;;  %v7894_v52 = vld [vmem:[%s9709_s7 + $0x414] ss:$72 sps:$4 sm:$0xff]  }
 0x4e1   : > { %3034 = vmatprep.subr.bf16.mxu0 %v7876_v29  ;;  %10216 = vst [vmem:[#allocation211_spill] sm:$0xff] %v7888_v32  ;;  %10217 = vst [vmem:[#allocation212_spill] sm:$0xff] %v7894_v52  ;;  %v7900_v29 = vld [vmem:[%s9709_s7 + $0x41c] ss:$72 sps:$4 sm:$0xff]  }
 0x4e2   : > { %10218 = vst [vmem:[#allocation213_spill] sm:$0xff] %v7900_v29 }
 0x4e3   : > { %2992 = vmatpush1.bf16.msra.mxu1 %v7882_v35  ;;  %v7906_v35 = vld [vmem:[%s9709_s7 + $0x410] ss:$72 sps:$4 sm:$0xff]  }
 0x4e4   : > { %3035 = vmatpush1.bf16.msra.mxu0 %v7888_v32  ;;  %2993 = vmatprep.subr.bf16.mxu1 %v7894_v52  ;;  %10219 = vst [vmem:[#allocation214_spill] sm:$0xff] %v7906_v35  ;;  %v7912_v32 = vld [vmem:[%s9709_s7 + $0x418] ss:$72 sps:$4 sm:$0xff]   ;;  %v7918_v52 = vld [vmem:[%s9709_s7 + $0x4a4] ss:$72 sps:$4 sm:$0xff]  }
 0x4e5   : > { %3036 = vmatprep.subr.bf16.mxu0 %v7900_v29  ;;  %10220 = vst [vmem:[#allocation215_spill] sm:$0xff] %v7912_v32  ;;  %10221 = vst [vmem:[#allocation216_spill] sm:$0xff] %v7918_v52  ;;  %v7924_v29 = vld [vmem:[%s9709_s7 + $0x4ac] ss:$72 sps:$4 sm:$0xff]  }
 0x4e6   : > { %10222 = vst [vmem:[#allocation217_spill] sm:$0xff] %v7924_v29 }
 0x4e7   : > { %2994 = vmatpush1.bf16.msra.mxu1 %v7906_v35  ;;  %v7930_v35 = vld [vmem:[%s9709_s7 + $0x4a0] ss:$72 sps:$4 sm:$0xff]  }
 0x4e8   : > { %3037 = vmatpush1.bf16.msra.mxu0 %v7912_v32  ;;  %2995 = vmatprep.subr.bf16.mxu1 %v7918_v52  ;;  %10223 = vst [vmem:[#allocation218_spill] sm:$0xff] %v7930_v35  ;;  %v7936_v32 = vld [vmem:[%s9709_s7 + $0x4a8] ss:$72 sps:$4 sm:$0xff]   ;;  %v7942_v52 = vld [vmem:[%s9709_s7 + $0x534] ss:$72 sps:$4 sm:$0xff]  }
 0x4e9   : > { %3038 = vmatprep.subr.bf16.mxu0 %v7924_v29  ;;  %10224 = vst [vmem:[#allocation219_spill] sm:$0xff] %v7936_v32  ;;  %10225 = vst [vmem:[#allocation220_spill] sm:$0xff] %v7942_v52  ;;  %v7948_v29 = vld [vmem:[%s9709_s7 + $0x53c] ss:$72 sps:$4 sm:$0xff]  }
 0x4ea   : > { %10226 = vst [vmem:[#allocation221_spill] sm:$0xff] %v7948_v29 }
 0x4eb   : > { %2996 = vmatpush1.bf16.msra.mxu1 %v7930_v35  ;;  %v7954_v35 = vld [vmem:[%s9709_s7 + $0x530] ss:$72 sps:$4 sm:$0xff]  }
 0x4ec   : > { %3039 = vmatpush1.bf16.msra.mxu0 %v7936_v32  ;;  %2997 = vmatprep.subr.bf16.mxu1 %v7942_v52  ;;  %10227 = vst [vmem:[#allocation222_spill] sm:$0xff] %v7954_v35  ;;  %v7960_v32 = vld [vmem:[%s9709_s7 + $0x538] ss:$72 sps:$4 sm:$0xff]   ;;  %v7966_v52 = vld [vmem:[%s9709_s7 + $0x5c4] ss:$72 sps:$4 sm:$0xff]  }
 0x4ed   : > { %3040 = vmatprep.subr.bf16.mxu0 %v7948_v29  ;;  %10228 = vst [vmem:[#allocation223_spill] sm:$0xff] %v7960_v32  ;;  %10229 = vst [vmem:[#allocation224_spill] sm:$0xff] %v7966_v52  ;;  %v7972_v29 = vld [vmem:[%s9709_s7 + $0x5cc] ss:$72 sps:$4 sm:$0xff]  }
 0x4ee   : > { %10230 = vst [vmem:[#allocation225_spill] sm:$0xff] %v7972_v29 }
 0x4ef   : > { %2998 = vmatpush1.bf16.msra.mxu1 %v7954_v35  ;;  %v7978_v35 = vld [vmem:[%s9709_s7 + $0x5c0] ss:$72 sps:$4 sm:$0xff]  }
 0x4f0   : > { %3041 = vmatpush1.bf16.msra.mxu0 %v7960_v32  ;;  %2999 = vmatprep.subr.bf16.mxu1 %v7966_v52  ;;  %10231 = vst [vmem:[#allocation226_spill] sm:$0xff] %v7978_v35  ;;  %v7984_v32 = vld [vmem:[%s9709_s7 + $0x5c8] ss:$72 sps:$4 sm:$0xff]   ;;  %v7990_v52 = vld [vmem:[%s9709_s7 + $0x654] ss:$72 sps:$4 sm:$0xff]  }
 0x4f1   : > { %3042 = vmatprep.subr.bf16.mxu0 %v7972_v29  ;;  %10232 = vst [vmem:[#allocation227_spill] sm:$0xff] %v7984_v32  ;;  %10233 = vst [vmem:[#allocation228_spill] sm:$0xff] %v7990_v52  ;;  %v7996_v29 = vld [vmem:[%s9709_s7 + $0x65c] ss:$72 sps:$4 sm:$0xff]  }
 0x4f2   : > { %10234 = vst [vmem:[#allocation229_spill] sm:$0xff] %v7996_v29 }
 0x4f3   : > { %3000 = vmatpush1.bf16.msra.mxu1 %v7978_v35  ;;  %v8002_v35 = vld [vmem:[%s9709_s7 + $0x650] ss:$72 sps:$4 sm:$0xff]  }
 0x4f4   : > { %3043 = vmatpush1.bf16.msra.mxu0 %v7984_v32  ;;  %3001 = vmatprep.subr.bf16.mxu1 %v7990_v52  ;;  %v8008_v32 = vld [vmem:[%s9709_s7 + $0x658] ss:$72 sps:$4 sm:$0xff]   ;;  %v8014_v52 = vld [vmem:[%s9709_s7 + $0x6e4] ss:$72 sps:$4 sm:$0xff]  }
 0x4f5   : > { %3044 = vmatprep.subr.bf16.mxu0 %v7996_v29  ;;  %v8020_v29 = vld [vmem:[%s9709_s7 + $0x6ec] ss:$72 sps:$4 sm:$0xff]  }
 0x4f7   : > { %3002 = vmatpush1.bf16.msra.mxu1 %v8002_v35 }
 0x4f8   : > { %3045 = vmatpush1.bf16.msra.mxu0 %v8008_v32  ;;  %3003 = vmatprep.subr.bf16.mxu1 %v8014_v52 }
 0x4f9   : > { %3046 = vmatprep.subr.bf16.mxu0 %v8020_v29 }
 0x4fb   : > { %3004 = vmatpush1.bf16.msra.mxu1 %v6260_v41  ;;  %v10235_v41 = vld [vmem:[#allocation2_spill] sm:$0xff] }
 0x4fc   : > { %3047 = vmatpush1.bf16.msra.mxu0 %v6265_v42  ;;  %3005 = vmatprep.subr.bf16.mxu1 %v6270_v44  ;;  %v10236_v42 = vld [vmem:[#allocation3_spill] sm:$0xff]  ;;  %v10237_v44 = vld [vmem:[#allocation4_spill] sm:$0xff] }
 0x4fd   : > { %3048 = vmatprep.subr.bf16.mxu0 %v6275_v45  ;;  %v10238_v45 = vld [vmem:[#allocation5_spill] sm:$0xff] }
 0x4ff   : > { %3006 = vmatpush1.bf16.msra.mxu1 %v6281_v46  ;;  %v10239_v46 = vld [vmem:[#allocation6_spill] sm:$0xff] }
 0x500   : > { %3049 = vmatpush1.bf16.msra.mxu0 %v6288_v47  ;;  %3007 = vmatprep.subr.bf16.mxu1 %v6293_v48  ;;  %v10240_v47 = vld [vmem:[#allocation7_spill] sm:$0xff]  ;;  %v10241_v48 = vld [vmem:[#allocation8_spill] sm:$0xff] }
 0x501   : > { %3050 = vmatprep.subr.bf16.mxu0 %v6299_v49  ;;  %v10242_v49 = vld [vmem:[#allocation9_spill] sm:$0xff] }
 0x503   : > { %3008 = vmatpush1.bf16.msra.mxu1 %v6305_v50  ;;  %v10243_v50 = vld [vmem:[#allocation10_spill] sm:$0xff] }
 0x504   : > { %3051 = vmatpush1.bf16.msra.mxu0 %v6312_v51  ;;  %3009 = vmatprep.subr.bf16.mxu1 %v6317_v54  ;;  %v10244_v51 = vld [vmem:[#allocation11_spill] sm:$0xff]  ;;  %v10245_v54 = vld [vmem:[#allocation12_spill] sm:$0xff] }
 0x505   : > { %3052 = vmatprep.subr.bf16.mxu0 %v6323_v55  ;;  %v10246_v55 = vld [vmem:[#allocation13_spill] sm:$0xff] }
 0x507   : > { %3010 = vmatpush1.bf16.msra.mxu1 %v6329_v56  ;;  %v10247_v56 = vld [vmem:[#allocation14_spill] sm:$0xff] }
 0x508   : > { %3053 = vmatpush1.bf16.msra.mxu0 %v6336_v57  ;;  %3065 = vmatprep.subr.bf16.mxu1 %v6341_v58  ;;  %v10248_v57 = vld [vmem:[#allocation15_spill] sm:$0xff]  ;;  %v10249_v58 = vld [vmem:[#allocation16_spill] sm:$0xff] }
 0x509   : > { %3108 = vmatprep.subr.bf16.mxu0 %v6347_v59  ;;  %v10250_v59 = vld [vmem:[#allocation17_spill] sm:$0xff] }
 0x50a   : > { %3012 = vmatmul.mubr.bf16.vlgmr.msra.gmra.mrb[36].mxu1 %v7339_v36 }
 0x50b   : > { %3055 = vmatmul.mubr.bf16.vlgmr.msra.gmra.mrb[36].mxu0 %v7339_v36  ;;  %3066 = vmatpush1.bf16.msra.mxu1 %v6353_v60  ;;  %v10251_v60 = vld [vmem:[#allocation18_spill] sm:$0xff] }
 0x50c   : > { %3097 = vmatprep.mubr.bf16.mxu1 %v7335_v53  ;;  %3109 = vmatpush1.bf16.msra.mxu0 %v6360_v61  ;;  %v10252_v61 = vld [vmem:[#allocation19_spill] sm:$0xff] }
 0x50d   : > { %3140 = vmatprep.mubr.bf16.mxu0 %v7335_v53  ;;  %3067 = vmatprep.subr.bf16.mxu1 %v6366_v62  ;;  %v10253_v62 = vld [vmem:[#allocation20_spill] sm:$0xff] }
 0x50e   : > { %3110 = vmatprep.subr.bf16.mxu0 %v6372_v63  ;;  %v10254_v63 = vld [vmem:[#allocation21_spill] sm:$0xff] }
 0x50f   : > { %3068 = vmatpush1.bf16.msra.mxu1 %v6379_v0  ;;  %v10255_v0 = vld [vmem:[#allocation22_spill] sm:$0xff] }
 0x510   : > { %3111 = vmatpush1.bf16.msra.mxu0 %v6386_v1  ;;  %3069 = vmatprep.subr.bf16.mxu1 %v6391_v2  ;;  %v10256_v1 = vld [vmem:[#allocation23_spill] sm:$0xff]  ;;  %v10257_v2 = vld [vmem:[#allocation24_spill] sm:$0xff] }
 0x511   : > { %3112 = vmatprep.subr.bf16.mxu0 %v6398_v3  ;;  %v10258_v3 = vld [vmem:[#allocation25_spill] sm:$0xff] }
 0x513   : > { %3070 = vmatpush1.bf16.msra.mxu1 %v6405_v4  ;;  %v10259_v4 = vld [vmem:[#allocation26_spill] sm:$0xff] }
 0x514   : > { %3113 = vmatpush1.bf16.msra.mxu0 %v6412_v5  ;;  %3071 = vmatprep.subr.bf16.mxu1 %v6417_v6  ;;  %v10260_v5 = vld [vmem:[#allocation27_spill] sm:$0xff]  ;;  %v10261_v6 = vld [vmem:[#allocation28_spill] sm:$0xff] }
 0x515   : > { %3114 = vmatprep.subr.bf16.mxu0 %v6423_v7  ;;  %v10262_v7 = vld [vmem:[#allocation29_spill] sm:$0xff] }
 0x517   : > { %3072 = vmatpush1.bf16.msra.mxu1 %v6429_v8  ;;  %v10263_v8 = vld [vmem:[#allocation30_spill] sm:$0xff] }
 0x518   : > { %3115 = vmatpush1.bf16.msra.mxu0 %v6436_v9  ;;  %3073 = vmatprep.subr.bf16.mxu1 %v6441_v10  ;;  %v10264_v9 = vld [vmem:[#allocation31_spill] sm:$0xff]  ;;  %v10265_v10 = vld [vmem:[#allocation32_spill] sm:$0xff] }
 0x519   : > { %3116 = vmatprep.subr.bf16.mxu0 %v6447_v11  ;;  %v10266_v11 = vld [vmem:[#allocation33_spill] sm:$0xff] }
 0x51b   : > { %3074 = vmatpush1.bf16.msra.mxu1 %v6453_v12  ;;  %v10267_v12 = vld [vmem:[#allocation34_spill] sm:$0xff] }
 0x51c   : > { %3117 = vmatpush1.bf16.msra.mxu0 %v6460_v13  ;;  %3075 = vmatprep.subr.bf16.mxu1 %v6465_v14  ;;  %v10268_v13 = vld [vmem:[#allocation35_spill] sm:$0xff]  ;;  %v10269_v14 = vld [vmem:[#allocation36_spill] sm:$0xff] }
 0x51d   : > { %3118 = vmatprep.subr.bf16.mxu0 %v6471_v15  ;;  %v10270_v15 = vld [vmem:[#allocation37_spill] sm:$0xff] }
 0x51f   : > { %3076 = vmatpush1.bf16.msra.mxu1 %v6477_v16  ;;  %v10271_v16 = vld [vmem:[#allocation38_spill] sm:$0xff] }
 0x520   : > { %3119 = vmatpush1.bf16.msra.mxu0 %v6484_v17  ;;  %3077 = vmatprep.subr.bf16.mxu1 %v6489_v18  ;;  %v10272_v17 = vld [vmem:[#allocation39_spill] sm:$0xff]  ;;  %v10273_v18 = vld [vmem:[#allocation40_spill] sm:$0xff] }
 0x521   : > { %3120 = vmatprep.subr.bf16.mxu0 %v6495_v19  ;;  %v10274_v19 = vld [vmem:[#allocation41_spill] sm:$0xff] }
 0x523   : > { %3078 = vmatpush1.bf16.msra.mxu1 %v6501_v20  ;;  %v10275_v20 = vld [vmem:[#allocation42_spill] sm:$0xff] }
 0x524   : > { %3121 = vmatpush1.bf16.msra.mxu0 %v6508_v21  ;;  %3079 = vmatprep.subr.bf16.mxu1 %v10235_v41  ;;  %v10276_v21 = vld [vmem:[#allocation43_spill] sm:$0xff]  ;;  %v10277_v41 = vld [vmem:[#allocation44_spill] sm:$0xff] }
 0x525   : > { %3122 = vmatprep.subr.bf16.mxu0 %v10236_v42  ;;  %v10278_v42 = vld [vmem:[#allocation45_spill] sm:$0xff] }
 0x527   : > { %3080 = vmatpush1.bf16.msra.mxu1 %v10237_v44  ;;  %v10279_v44 = vld [vmem:[#allocation46_spill] sm:$0xff] }
 0x528   : > { %3123 = vmatpush1.bf16.msra.mxu0 %v10238_v45  ;;  %3081 = vmatprep.subr.bf16.mxu1 %v10239_v46  ;;  %v10280_v45 = vld [vmem:[#allocation47_spill] sm:$0xff]  ;;  %v10281_v46 = vld [vmem:[#allocation48_spill] sm:$0xff] }
 0x529   : > { %3124 = vmatprep.subr.bf16.mxu0 %v10240_v47 }
 0x52b   : > { %3082 = vmatpush1.bf16.msra.mxu1 %v10241_v48 }
 0x52c   : > { %3125 = vmatpush1.bf16.msra.mxu0 %v10242_v49  ;;  %3083 = vmatprep.subr.bf16.mxu1 %v10243_v50  ;;  %v10282_v50 = vld [vmem:[#allocation49_spill] sm:$0xff] }
 0x52d   : > { %3126 = vmatprep.subr.bf16.mxu0 %v10244_v51 }
 0x52f   : > { %3084 = vmatpush1.bf16.msra.mxu1 %v10245_v54 }
 0x530   : > { %3127 = vmatpush1.bf16.msra.mxu0 %v10246_v55  ;;  %3085 = vmatprep.subr.bf16.mxu1 %v10247_v56 }
 0x531   : > { %3128 = vmatprep.subr.bf16.mxu0 %v10248_v57 }
 0x533   : > { %3086 = vmatpush1.bf16.msra.mxu1 %v10249_v58 }
 0x534   : > { %3129 = vmatpush1.bf16.msra.mxu0 %v10250_v59  ;;  %3087 = vmatprep.subr.bf16.mxu1 %v10251_v60  ;;  %v10283_v59 = vld [vmem:[#allocation50_spill] sm:$0xff] }
 0x535   : > { %3130 = vmatprep.subr.bf16.mxu0 %v10252_v61 }
 0x537   : > { %3088 = vmatpush1.bf16.msra.mxu1 %v10253_v62  ;;  %v10284_v62 = vld [vmem:[#allocation51_spill] sm:$0xff] }
 0x538   : > { %3131 = vmatpush1.bf16.msra.mxu0 %v10254_v63  ;;  %3089 = vmatprep.subr.bf16.mxu1 %v10255_v0  ;;  %v10285_v63 = vld [vmem:[#allocation52_spill] sm:$0xff]  ;;  %v10286_v0 = vld [vmem:[#allocation53_spill] sm:$0xff] }
 0x539   : > { %3132 = vmatprep.subr.bf16.mxu0 %v10256_v1  ;;  %v10287_v1 = vld [vmem:[#allocation54_spill] sm:$0xff] }
 0x53b   : > { %3090 = vmatpush1.bf16.msra.mxu1 %v10257_v2  ;;  %v10288_v2 = vld [vmem:[#allocation55_spill] sm:$0xff] }
 0x53c   : > { %3133 = vmatpush1.bf16.msra.mxu0 %v10258_v3  ;;  %3091 = vmatprep.subr.bf16.mxu1 %v10259_v4  ;;  %v10289_v3 = vld [vmem:[#allocation56_spill] sm:$0xff]  ;;  %v10290_v4 = vld [vmem:[#allocation57_spill] sm:$0xff] }
 0x53d   : > { %3134 = vmatprep.subr.bf16.mxu0 %v10260_v5  ;;  %v10291_v5 = vld [vmem:[#allocation58_spill] sm:$0xff] }
 0x53f   : > { %3092 = vmatpush1.bf16.msra.mxu1 %v10261_v6  ;;  %v10292_v6 = vld [vmem:[#allocation59_spill] sm:$0xff] }
 0x540   : > { %3135 = vmatpush1.bf16.msra.mxu0 %v10262_v7  ;;  %3093 = vmatprep.subr.bf16.mxu1 %v10263_v8  ;;  %v10293_v7 = vld [vmem:[#allocation60_spill] sm:$0xff]  ;;  %v10294_v8 = vld [vmem:[#allocation61_spill] sm:$0xff] }
 0x541   : > { %3136 = vmatprep.subr.bf16.mxu0 %v10264_v9  ;;  %v10295_v9 = vld [vmem:[#allocation62_spill] sm:$0xff] }
 0x543   : > { %3094 = vmatpush1.bf16.msra.mxu1 %v10265_v10  ;;  %v10296_v10 = vld [vmem:[#allocation63_spill] sm:$0xff] }
 0x544   : > { %3137 = vmatpush1.bf16.msra.mxu0 %v10266_v11  ;;  %3095 = vmatprep.subr.bf16.mxu1 %v10267_v12  ;;  %v10297_v11 = vld [vmem:[#allocation64_spill] sm:$0xff]  ;;  %v10298_v12 = vld [vmem:[#allocation65_spill] sm:$0xff] }
 0x545   : > { %3138 = vmatprep.subr.bf16.mxu0 %v10268_v13  ;;  %v10299_v13 = vld [vmem:[#allocation66_spill] sm:$0xff] }
 0x547   : > { %3096 = vmatpush1.bf16.msra.mxu1 %v10269_v14  ;;  %v10300_v14 = vld [vmem:[#allocation67_spill] sm:$0xff] }
 0x548   : > { %3139 = vmatpush1.bf16.msra.mxu0 %v10270_v15  ;;  %3151 = vmatprep.subr.bf16.mxu1 %v10271_v16  ;;  %v10301_v15 = vld [vmem:[#allocation68_spill] sm:$0xff]  ;;  %v10302_v16 = vld [vmem:[#allocation69_spill] sm:$0xff] }
 0x54a   : > { %3098 = vmatmul.mubr.bf16.vlgmr.msra.gmra.mrb[40].mxu1 %v7339_v36 }
 0x54b   : > { %3141 = vmatmul.mubr.bf16.vlgmr.msra.gmra.mrb[40].mxu0 %v7339_v36  ;;  %3152 = vmatpush1.bf16.msra.mxu1 %v10272_v17  ;;  %v10303_v17 = vld [vmem:[#allocation70_spill] sm:$0xff] }
 0x54c   : > { %3183 = vmatprep.mubr.bf16.mxu1 %v7335_v53  ;;  %3153 = vmatprep.subr.bf16.mxu1 %v10273_v18  ;;  %v10304_v18 = vld [vmem:[#allocation71_spill] sm:$0xff] }
 0x54f   : > { %3154 = vmatpush1.bf16.msra.mxu1 %v10274_v19  ;;  %v10305_v19 = vld [vmem:[#allocation72_spill] sm:$0xff] }
 0x550   : > { %3155 = vmatprep.subr.bf16.mxu1 %v10275_v20  ;;  %v10306_v20 = vld [vmem:[#allocation73_spill] sm:$0xff] }
 0x553   : > { %3156 = vmatpush1.bf16.msra.mxu1 %v10276_v21  ;;  %v10307_v21 = vld [vmem:[#allocation74_spill] sm:$0xff] }
 0x554   : > { %3157 = vmatprep.subr.bf16.mxu1 %v10277_v41  ;;  %v10308_v41 = vld [vmem:[#allocation75_spill] sm:$0xff] }
 0x557   : > { %3158 = vmatpush1.bf16.msra.mxu1 %v10278_v42  ;;  %v10309_v42 = vld [vmem:[#allocation76_spill] sm:$0xff] }
 0x558   : > { %3159 = vmatprep.subr.bf16.mxu1 %v10279_v44  ;;  %v10310_v44 = vld [vmem:[#allocation77_spill] sm:$0xff] }
 0x55b   : > { %3160 = vmatpush1.bf16.msra.mxu1 %v10280_v45  ;;  %v10311_v45 = vld [vmem:[#allocation78_spill] sm:$0xff] }
 0x55c   : > { %3161 = vmatprep.subr.bf16.mxu1 %v10281_v46  ;;  %v10312_v46 = vld [vmem:[#allocation79_spill] sm:$0xff] }
 0x55d   : > { %v2841_v47 = vpop.f32.mrb[28].mxu1  ;;  %v2884_v53 = vpop.f32.mrb[28].mxu0 }
 0x55e   : > { %v2843_v48 = vpop.f32.mrb[29].mxu1  ;;  %v2886_v49 = vpop.f32.mrb[29].mxu0 }
 0x55f   : > { %3162 = vmatpush1.bf16.msra.mxu1 %v10282_v50  ;;  %v2845_v51 = vpop.f32.mrb[30].mxu1  ;;  %v2888_v54 = vpop.f32.mrb[30].mxu0 }
 0x560   : > { %v3194_v55 = vpack.c.bf16 %v2845_v51, %v2841_v47  ;;  %v3196_v56 = vpack.c.bf16 %v2888_v54, %v2884_v53  ;;  %v2847_v57 = vpop.f32.mrb[31].mxu1  ;;  %v2890_v58 = vpop.f32.mrb[31].mxu0  ;;  %3163 = vmatprep.subr.bf16.mxu1 %v10283_v59  ;;  %v10313_v47 = vld [vmem:[#allocation80_spill] sm:$0xff]  ;;  %v10314_v54 = vld [vmem:[#allocation81_spill] sm:$0xff]  ;;  %v10315_v59 = vld [vmem:[#allocation82_spill] sm:$0xff] }
 0x561   : > { %v3195_v60 = vpack.c.bf16 %v2847_v57, %v2843_v48  ;;  %v3197_v61 = vpack.c.bf16 %v2890_v58, %v2886_v49 }
 0x563   : > { %3164 = vmatpush1.bf16.msra.mxu1 %v10284_v62  ;;  %3223 = vmatprep.subr.bf16.mxu0 %v3195_v60  ;;  %v10316_v62 = vld [vmem:[#allocation83_spill] sm:$0xff] }
 0x564   : > { %3224 = vmatpush1.bf16.msra.mxu0 %v3194_v55  ;;  %3165 = vmatprep.subr.bf16.mxu1 %v10285_v63  ;;  %v10317_v63 = vld [vmem:[#allocation84_spill] sm:$0xff] }
 0x565   : > { %3225 = vmatprep.subr.bf16.mxu0 %v3197_v61 }
 0x567   : > { %3166 = vmatpush1.bf16.msra.mxu1 %v10286_v0  ;;  %v10318_v0 = vld [vmem:[#allocation85_spill] sm:$0xff] }
 0x568   : > { %3226 = vmatpush1.bf16.msra.mxu0 %v3196_v56  ;;  %3167 = vmatprep.subr.bf16.mxu1 %v10287_v1  ;;  %v10319_v1 = vld [vmem:[#allocation86_spill] sm:$0xff] }
 0x56b   : > { %3168 = vmatpush1.bf16.msra.mxu1 %v10288_v2  ;;  %v10320_v2 = vld [vmem:[#allocation87_spill] sm:$0xff] }
 0x56c   : > { %3169 = vmatprep.subr.bf16.mxu1 %v10289_v3  ;;  %v10321_v3 = vld [vmem:[#allocation88_spill] sm:$0xff] }
 0x56f   : > { %3170 = vmatpush1.bf16.msra.mxu1 %v10290_v4  ;;  %v10322_v4 = vld [vmem:[#allocation89_spill] sm:$0xff] }
 0x570   : > { %3171 = vmatprep.subr.bf16.mxu1 %v10291_v5  ;;  %v10323_v5 = vld [vmem:[#allocation90_spill] sm:$0xff] }
 0x573   : > { %3172 = vmatpush1.bf16.msra.mxu1 %v10292_v6  ;;  %v10324_v6 = vld [vmem:[#allocation91_spill] sm:$0xff] }
 0x574   : > { %3173 = vmatprep.subr.bf16.mxu1 %v10293_v7  ;;  %v10325_v7 = vld [vmem:[#allocation92_spill] sm:$0xff] }
 0x577   : > { %3174 = vmatpush1.bf16.msra.mxu1 %v10294_v8  ;;  %v10326_v8 = vld [vmem:[#allocation93_spill] sm:$0xff] }
 0x578   : > { %3175 = vmatprep.subr.bf16.mxu1 %v10295_v9  ;;  %v10327_v9 = vld [vmem:[#allocation94_spill] sm:$0xff] }
 0x57b   : > { %3176 = vmatpush1.bf16.msra.mxu1 %v10296_v10  ;;  %v10328_v10 = vld [vmem:[#allocation95_spill] sm:$0xff] }
 0x57c   : > { %3177 = vmatprep.subr.bf16.mxu1 %v10297_v11  ;;  %v10329_v11 = vld [vmem:[#allocation96_spill] sm:$0xff] }
 0x57f   : > { %3178 = vmatpush1.bf16.msra.mxu1 %v10298_v12  ;;  %v10330_v12 = vld [vmem:[#allocation97_spill] sm:$0xff] }
 0x580   : > { %3179 = vmatprep.subr.bf16.mxu1 %v10299_v13  ;;  %v10331_v13 = vld [vmem:[#allocation98_spill] sm:$0xff] }
 0x583   : > { %3180 = vmatpush1.bf16.msra.mxu1 %v10300_v14  ;;  %v10332_v14 = vld [vmem:[#allocation99_spill] sm:$0xff] }
 0x584   : > { %3181 = vmatprep.subr.bf16.mxu1 %v10301_v15  ;;  %v10333_v15 = vld [vmem:[#allocation100_spill] sm:$0xff] }
 0x587   : > { %3182 = vmatpush1.bf16.msra.mxu1 %v10302_v16  ;;  %v10334_v16 = vld [vmem:[#allocation101_spill] sm:$0xff] }
 0x588   : > { %3325 = vmatprep.subr.bf16.mxu1 %v10303_v17  ;;  %v10335_v17 = vld [vmem:[#allocation102_spill] sm:$0xff] }
 0x58a   : > { %3184 = vmatmul.mubr.bf16.vlgmr.msra.gmra.mrb[44].mxu1 %v7339_v36 }
 0x58b   : > { %3326 = vmatpush1.bf16.msra.mxu1 %v10304_v18 }
 0x58c   : > { %3327 = vmatprep.subr.bf16.mxu1 %v10305_v19 }
 0x58f   : > { %3328 = vmatpush1.bf16.msra.mxu1 %v10306_v20 }
 0x590   : > { %3329 = vmatprep.subr.bf16.mxu1 %v10307_v21 }
 0x593   : > { %3330 = vmatpush1.bf16.msra.mxu1 %v10308_v41 }
 0x594   : > { %3331 = vmatprep.subr.bf16.mxu1 %v10309_v42 }
 0x597   : > { %3332 = vmatpush1.bf16.msra.mxu1 %v10310_v44 }
 0x598   : > { %3333 = vmatprep.subr.bf16.mxu1 %v10311_v45 }
 0x59b   : > { %3334 = vmatpush1.bf16.msra.mxu1 %v10312_v46 }
 0x59c   : > { %3335 = vmatprep.subr.bf16.mxu1 %v10313_v47 }
 0x59d   : > { %v2927_v36 = vpop.f32.mrb[32].mxu1  ;;  %v2970_v53 = vpop.f32.mrb[32].mxu0 }
 0x59e   : > { %v2929_v48 = vpop.f32.mrb[33].mxu1  ;;  %v2972_v49 = vpop.f32.mrb[33].mxu0 }
 0x59f   : > { %v2931_v50 = vpop.f32.mrb[34].mxu1  ;;  %v2974_v51 = vpop.f32.mrb[34].mxu0  ;;  %3336 = vmatpush1.bf16.msra.mxu1 %v10314_v54 }
 0x5a0   : > { %v3198_v55 = vpack.c.bf16 %v2931_v50, %v2927_v36  ;;  %v3200_v56 = vpack.c.bf16 %v2974_v51, %v2970_v53  ;;  %v2933_v57 = vpop.f32.mrb[35].mxu1  ;;  %v2976_v58 = vpop.f32.mrb[35].mxu0  ;;  %3337 = vmatprep.subr.bf16.mxu1 %v10315_v59 }
 0x5a1   : > { %v3199_v60 = vpack.c.bf16 %v2933_v57, %v2929_v48  ;;  %v3201_v61 = vpack.c.bf16 %v2976_v58, %v2972_v49  ;;  %v4624_v48 = vld [vmem:[%s9707_s5 + $0x8] sm:$0xff] }
 0x5a2   : > { %v4626_v49 = vcombine.high %v4624_v48, %v4624_v48 }
 0x5a3   : > { %3227 = vmatprep.subr.bf16.mxu0 %v3199_v60  ;;  %3338 = vmatpush1.bf16.msra.mxu1 %v10316_v62 }
 0x5a4   : > { %3228 = vmatpush1.bf16.msra.mxu0 %v3198_v55  ;;  %3339 = vmatprep.subr.bf16.mxu1 %v10317_v63 }
 0x5a5   : > { %3229 = vmatprep.subr.bf16.mxu0 %v3201_v61  ;;  %4627 = vmatprep.mubr.msk.bf16.mxu0 %vm2744_vm4, %v4626_v49 }
 0x5a7   : > { %3340 = vmatpush1.bf16.msra.mxu1 %v10318_v0 }
 0x5a8   : > { %3230 = vmatpush1.bf16.msra.mxu0 %v3200_v56  ;;  %3341 = vmatprep.subr.bf16.mxu1 %v10319_v1 }
 0x5ab   : > { %3342 = vmatpush1.bf16.msra.mxu1 %v10320_v2 }
 0x5ac   : > { %3343 = vmatprep.subr.bf16.mxu1 %v10321_v3 }
 0x5af   : > { %3344 = vmatpush1.bf16.msra.mxu1 %v10322_v4 }
 0x5b0   : > { %3345 = vmatprep.subr.bf16.mxu1 %v10323_v5 }
 0x5b3   : > { %3346 = vmatpush1.bf16.msra.mxu1 %v10324_v6  ;;  %v4625_v6 = vcombine.low %v4624_v48, %v4624_v48 }
 0x5b4   : > { %3347 = vmatprep.subr.bf16.mxu1 %v10325_v7  ;;  %v10336_v7 = vld [vmem:[#allocation103_spill] sm:$0xff] }
 0x5b7   : > { %3348 = vmatpush1.bf16.msra.mxu1 %v10326_v8  ;;  %v10337_v8 = vld [vmem:[#allocation104_spill] sm:$0xff] }
 0x5b8   : > { %3349 = vmatprep.subr.bf16.mxu1 %v10327_v9  ;;  %v10339_v9 = vld [vmem:[#allocation106_spill] sm:$0xff] }
 0x5bb   : > { %3350 = vmatpush1.bf16.msra.mxu1 %v10328_v10  ;;  %v10347_v10 = vld [vmem:[#allocation114_spill] sm:$0xff] }
 0x5bc   : > { %3351 = vmatprep.subr.bf16.mxu1 %v10329_v11  ;;  %v10348_v11 = vld [vmem:[#allocation115_spill] sm:$0xff] }
 0x5bf   : > { %3352 = vmatpush1.bf16.msra.mxu1 %v10330_v12  ;;  %v10349_v12 = vld [vmem:[#allocation116_spill] sm:$0xff] }
 0x5c0   : > { %3353 = vmatprep.subr.bf16.mxu1 %v10331_v13  ;;  %v10350_v13 = vld [vmem:[#allocation117_spill] sm:$0xff] }
 0x5c3   : > { %3354 = vmatpush1.bf16.msra.mxu1 %v10332_v14  ;;  %v10351_v14 = vld [vmem:[#allocation118_spill] sm:$0xff] }
 0x5c4   : > { %3355 = vmatprep.subr.bf16.mxu1 %v10333_v15  ;;  %v10352_v15 = vld [vmem:[#allocation119_spill] sm:$0xff] }
 0x5c7   : > { %3356 = vmatpush1.bf16.msra.mxu1 %v10334_v16  ;;  %v10353_v16 = vld [vmem:[#allocation120_spill] sm:$0xff] }
 0x5c8   : > { %3411 = vmatprep.subr.bf16.mxu1 %v10335_v17  ;;  %v10354_v17 = vld [vmem:[#allocation121_spill] sm:$0xff] }
 0x5dd   : > { %v3013_v18 = vpop.f32.mrb[36].mxu1 }
 0x5de   : > { %v3056_v19 = vpop.f32.mrb[36].mxu0  ;;  %v3015_v20 = vpop.f32.mrb[37].mxu1 }
 0x5df   : > { %v3058_v21 = vpop.f32.mrb[37].mxu0  ;;  %v3017_v41 = vpop.f32.mrb[38].mxu1 }
 0x5e0   : > { %v3202_v42 = vpack.c.bf16 %v3017_v41, %v3013_v18  ;;  %v3060_v44 = vpop.f32.mrb[38].mxu0  ;;  %v3019_v45 = vpop.f32.mrb[39].mxu1  ;;  %v10355_v18 = vld [vmem:[#allocation122_spill] sm:$0xff] }
 0x5e1   : > { %v3204_v46 = vpack.c.bf16 %v3060_v44, %v3056_v19  ;;  %v3203_v47 = vpack.c.bf16 %v3019_v45, %v3015_v20  ;;  %v3062_v36 = vpop.f32.mrb[39].mxu0  ;;  %v10356_v19 = vld [vmem:[#allocation123_spill] sm:$0xff]  ;;  %v10357_v20 = vld [vmem:[#allocation124_spill] sm:$0xff]  ;;  %v10359_v41 = vld [vmem:[#allocation126_spill] sm:$0xff] }
 0x5e2   : > { %v3205_v53 = vpack.c.bf16 %v3062_v36, %v3058_v21  ;;  %v10358_v21 = vld [vmem:[#allocation125_spill] sm:$0xff] }
 0x5e3   : > { %3231 = vmatprep.subr.bf16.mxu0 %v3203_v47 }
 0x5e4   : > { %3232 = vmatpush1.bf16.msra.mxu0 %v3202_v42 }
 0x5e5   : > { %3233 = vmatprep.subr.bf16.mxu0 %v3205_v53 }
 0x5e8   : > { %3234 = vmatpush1.bf16.msra.mxu0 %v3204_v46 }
 0x61d   : > { %v3099_v50 = vpop.f32.mrb[40].mxu1 }
 0x61e   : > { %v3142_v51 = vpop.f32.mrb[40].mxu0  ;;  %v3101_v54 = vpop.f32.mrb[41].mxu1 }
 0x61f   : > { %v3144_v55 = vpop.f32.mrb[41].mxu0  ;;  %v3103_v56 = vpop.f32.mrb[42].mxu1 }
 0x620   : > { %v3206_v57 = vpack.c.bf16 %v3103_v56, %v3099_v50  ;;  %v3146_v58 = vpop.f32.mrb[42].mxu0  ;;  %v3105_v59 = vpop.f32.mrb[43].mxu1  ;;  %v10366_v56 = vld [vmem:[#allocation133_spill] sm:$0xff] }
 0x621   : > { %v3208_v60 = vpack.c.bf16 %v3146_v58, %v3142_v51  ;;  %v3207_v61 = vpack.c.bf16 %v3105_v59, %v3101_v54  ;;  %v3148_v62 = vpop.f32.mrb[43].mxu0  ;;  %v10362_v54 = vld [vmem:[#allocation129_spill] sm:$0xff]  ;;  %v10371_v58 = vld [vmem:[#allocation138_spill] sm:$0xff]  ;;  %v10372_v59 = vld [vmem:[#allocation139_spill] sm:$0xff] }
 0x622   : > { %v3209_v63 = vpack.c.bf16 %v3148_v62, %v3144_v55  ;;  %v10363_v55 = vld [vmem:[#allocation130_spill] sm:$0xff] }
 0x623   : > { %3235 = vmatprep.subr.bf16.mxu0 %v3207_v61  ;;  %v10374_v61 = vld [vmem:[#allocation141_spill] sm:$0xff]  ;;  %v10375_v62 = vld [vmem:[#allocation142_spill] sm:$0xff] }
 0x624   : > { %3236 = vmatpush1.bf16.msra.mxu0 %v3206_v57  ;;  %v10367_v57 = vld [vmem:[#allocation134_spill] sm:$0xff] }
 0x625   : > { %3237 = vmatprep.subr.bf16.mxu0 %v3209_v63  ;;  %v10376_v63 = vld [vmem:[#allocation143_spill] sm:$0xff] }
 0x628   : > { %3238 = vmatpush1.bf16.msra.mxu0 %v3208_v60  ;;  %v10373_v60 = vld [vmem:[#allocation140_spill] sm:$0xff] }
 0x65d   : > { %v3185_v0 = vpop.f32.mrb[44].mxu1 }
 0x65e   : > { %v3187_v1 = vpop.f32.mrb[45].mxu1 }
 0x65f   : > { %v3189_v2 = vpop.f32.mrb[46].mxu1 }
 0x660   : > { %v3210_v3 = vpack.c.bf16 %v3189_v2, %v3185_v0  ;;  %v3191_v4 = vpop.f32.mrb[47].mxu1  ;;  %v10377_v0 = vld [vmem:[#allocation144_spill] sm:$0xff]  ;;  %v10379_v2 = vld [vmem:[#allocation146_spill] sm:$0xff] }
 0x661   : > { %v3211_v5 = vpack.c.bf16 %v3191_v4, %v3187_v1  ;;  %v10378_v1 = vld [vmem:[#allocation145_spill] sm:$0xff]  ;;  %v10381_v4 = vld [vmem:[#allocation148_spill] sm:$0xff] }
 0x663   : > { %3239 = vmatprep.subr.bf16.mxu0 %v3211_v5  ;;  %v10382_v5 = vld [vmem:[#allocation149_spill] sm:$0xff] }
 0x664   : > { %3240 = vmatpush1.bf16.msra.mxu0 %v3210_v3  ;;  %v10380_v3 = vld [vmem:[#allocation147_spill] sm:$0xff] }
 0x665   : > { %3282 = vmatprep.subr.bf16.mxu0 %v7130_v30  ;;  %v10338_v30 = vld [vmem:[#allocation105_spill] sm:$0xff] }
 0x667   : > { %3256 = vmatmul.mubr.bf16.vlgmr.msra.gmra.mrb[44].mxu0 %v4625_v6  ;;  %v10383_v6 = vld [vmem:[#allocation150_spill] sm:$0xff] }
 0x668   : > { %3283 = vmatpush1.bf16.msra.mxu0 %v7136_v31  ;;  %v10340_v31 = vld [vmem:[#allocation107_spill] sm:$0xff] }
 0x669   : > { %3284 = vmatprep.subr.bf16.mxu0 %v7142_v23  ;;  %v10341_v23 = vld [vmem:[#allocation108_spill] sm:$0xff] }
 0x66c   : > { %3285 = vmatpush1.bf16.msra.mxu0 %v7148_v24  ;;  %v10342_v24 = vld [vmem:[#allocation109_spill] sm:$0xff] }
 0x66d   : > { %3286 = vmatprep.subr.bf16.mxu0 %v7154_v22  ;;  %v10343_v22 = vld [vmem:[#allocation110_spill] sm:$0xff] }
 0x670   : > { %3287 = vmatpush1.bf16.msra.mxu0 %v7160_v40  ;;  %v10344_v40 = vld [vmem:[#allocation111_spill] sm:$0xff] }
 0x671   : > { %3288 = vmatprep.subr.bf16.mxu0 %v7166_v37  ;;  %v10345_v37 = vld [vmem:[#allocation112_spill] sm:$0xff] }
 0x674   : > { %3289 = vmatpush1.bf16.msra.mxu0 %v7172_v25  ;;  %v10346_v25 = vld [vmem:[#allocation113_spill] sm:$0xff] }
 0x675   : > { %3290 = vmatprep.subr.bf16.mxu0 %v10336_v7  ;;  %v10384_v7 = vld [vmem:[#allocation151_spill] sm:$0xff] }
 0x678   : > { %3291 = vmatpush1.bf16.msra.mxu0 %v10337_v8  ;;  %v10385_v8 = vld [vmem:[#allocation152_spill] sm:$0xff] }
 0x679   : > { %3292 = vmatprep.subr.bf16.mxu0 %v10338_v30  ;;  %v10386_v30 = vld [vmem:[#allocation153_spill] sm:$0xff] }
 0x67c   : > { %3293 = vmatpush1.bf16.msra.mxu0 %v10339_v9  ;;  %v10387_v9 = vld [vmem:[#allocation154_spill] sm:$0xff] }
 0x67d   : > { %3294 = vmatprep.subr.bf16.mxu0 %v10340_v31  ;;  %v10388_v31 = vld [vmem:[#allocation155_spill] sm:$0xff] }
 0x680   : > { %3295 = vmatpush1.bf16.msra.mxu0 %v10341_v23  ;;  %v10389_v23 = vld [vmem:[#allocation156_spill] sm:$0xff] }
 0x681   : > { %3296 = vmatprep.subr.bf16.mxu0 %v10342_v24  ;;  %v10390_v24 = vld [vmem:[#allocation157_spill] sm:$0xff] }
 0x684   : > { %3297 = vmatpush1.bf16.msra.mxu0 %v10343_v22  ;;  %v10391_v22 = vld [vmem:[#allocation158_spill] sm:$0xff] }
 0x685   : > { %3298 = vmatprep.subr.bf16.mxu0 %v10344_v40  ;;  %v10392_v40 = vld [vmem:[#allocation159_spill] sm:$0xff] }
 0x688   : > { %3299 = vmatpush1.bf16.msra.mxu0 %v10345_v37  ;;  %v10393_v37 = vld [vmem:[#allocation160_spill] sm:$0xff] }
 0x689   : > { %3300 = vmatprep.subr.bf16.mxu0 %v10346_v25  ;;  %v10394_v25 = vld [vmem:[#allocation161_spill] sm:$0xff] }
 0x68c   : > { %3301 = vmatpush1.bf16.msra.mxu0 %v10347_v10  ;;  %v10395_v10 = vld [vmem:[#allocation162_spill] sm:$0xff] }
 0x68d   : > { %3302 = vmatprep.subr.bf16.mxu0 %v10348_v11  ;;  %v10396_v11 = vld [vmem:[#allocation163_spill] sm:$0xff] }
 0x690   : > { %3303 = vmatpush1.bf16.msra.mxu0 %v10349_v12  ;;  %v10397_v12 = vld [vmem:[#allocation164_spill] sm:$0xff] }
 0x691   : > { %3304 = vmatprep.subr.bf16.mxu0 %v10350_v13  ;;  %v10398_v13 = vld [vmem:[#allocation165_spill] sm:$0xff] }
 0x694   : > { %3305 = vmatpush1.bf16.msra.mxu0 %v10351_v14  ;;  %v10399_v14 = vld [vmem:[#allocation166_spill] sm:$0xff] }
 0x695   : > { %3306 = vmatprep.subr.bf16.mxu0 %v10352_v15  ;;  %v10400_v15 = vld [vmem:[#allocation167_spill] sm:$0xff] }
 0x698   : > { %3307 = vmatpush1.bf16.msra.mxu0 %v10353_v16  ;;  %v10401_v16 = vld [vmem:[#allocation168_spill] sm:$0xff] }
 0x699   : > { %3308 = vmatprep.subr.bf16.mxu0 %v10354_v17  ;;  %v10402_v17 = vld [vmem:[#allocation169_spill] sm:$0xff] }
 0x69c   : > { %3309 = vmatpush1.bf16.msra.mxu0 %v10355_v18  ;;  %v10403_v18 = vld [vmem:[#allocation170_spill] sm:$0xff] }
 0x69d   : > { %3310 = vmatprep.subr.bf16.mxu0 %v10356_v19  ;;  %v10404_v19 = vld [vmem:[#allocation171_spill] sm:$0xff] }
 0x6a0   : > { %3311 = vmatpush1.bf16.msra.mxu0 %v10357_v20  ;;  %v10405_v20 = vld [vmem:[#allocation172_spill] sm:$0xff] }
 0x6a1   : > { %3312 = vmatprep.subr.bf16.mxu0 %v10358_v21  ;;  %v10406_v21 = vld [vmem:[#allocation173_spill] sm:$0xff] }
 0x6a4   : > { %3313 = vmatpush1.bf16.msra.mxu0 %v10359_v41  ;;  %v10407_v41 = vld [vmem:[#allocation174_spill] sm:$0xff] }
 0x6a5   : > { %3368 = vmatprep.subr.bf16.mxu0 %v7322_v38 }
 0x73a   : > { %v3257_v42 = vpop.f32.mrb[44].mxu0 }
 0x73b   : > { %v4628_v44 = vclamps-f32 %v3257_v42, 1.0  ;;  %4218 = vst [vmem:[%s5668_s23 + $0x10] sm:$0xff] %v3257_v42  ;;  %v3259_v45 = vpop.f32.mrb[45].mxu0  ;;  %v10408_v42 = vld [vmem:[#allocation175_spill] sm:$0xff] }
 0x73c   : > { %v4629_v46 = vclamps-f32 %v3259_v45, 1.0  ;;  %4219 = vst [vmem:[%s5668_s23 + $0x18] sm:$0xff] %v3259_v45  ;;  %v3261_v47 = vpop.f32.mrb[46].mxu0  ;;  %v10410_v45 = vld [vmem:[#allocation177_spill] sm:$0xff] }
 0x73d   : > { %v8213_v36 = vpack.c.bf16 %v4628_v44, %v4628_v44  ;;  %v3262_v53 = vpop.f32.mrb[47].mxu0  ;;  %v10409_v44 = vld [vmem:[#allocation176_spill] sm:$0xff]  ;;  %v10412_v47 = vld [vmem:[#allocation179_spill] sm:$0xff] }
 0x73e   : > { %v8215_v48 = vpack.c.bf16 %v4629_v46, %v4629_v46  ;;  %v10411_v46 = vld [vmem:[#allocation178_spill] sm:$0xff]  ;;  %v10413_v53 = vld [vmem:[#allocation180_spill] sm:$0xff] }
 0x73f   : > { %v3272_v49 = vrot.slane %v8213_v36, 4 }
 0x740   : > { %v3273_v50 = vrot.slane %v8215_v48, 4 }
 0x741   : > { %v8225_v38 = vsel %vm350_vm1, %v7327_v27, %v3272_v49  ;;  %v10361_v27 = vld [vmem:[#allocation128_spill] sm:$0xff]  ;;  %v10414_v49 = vld [vmem:[#allocation181_spill] sm:$0xff] }
 0x742   : > { %v8221_v51 = vsel %vm350_vm1, %v7329_v26, %v3273_v50  ;;  %v10360_v26 = vld [vmem:[#allocation127_spill] sm:$0xff]  ;;  %v10415_v50 = vld [vmem:[#allocation182_spill] sm:$0xff] }
 0x743   : > { %3314 = vmatprep.mubr.bf16.mxu0 %v8221_v51  ;;  %3357 = vmatprep.mubr.bf16.mxu1 %v8221_v51 }
 0x744   : > { %3315 = vmatmul.mubr.bf16.vlgmr.msra.gmra.mrb[48].mxu0 %v8225_v38  ;;  %3358 = vmatmul.mubr.bf16.vlgmr.msra.gmra.mrb[48].mxu1 %v8225_v38 }
 0x745   : > { %3369 = vmatpush1.bf16.msra.mxu0 %v7348_v34  ;;  %3412 = vmatpush1.bf16.msra.mxu1 %v7354_v39  ;;  %v10364_v34 = vld [vmem:[#allocation131_spill] sm:$0xff]  ;;  %v10365_v39 = vld [vmem:[#allocation132_spill] sm:$0xff] }
 0x746   : > { %3400 = vmatprep.mubr.bf16.mxu0 %v8221_v51  ;;  %3443 = vmatprep.mubr.bf16.mxu1 %v8221_v51 }
 0x747   : > { %3370 = vmatprep.subr.bf16.mxu0 %v7362_v43  ;;  %3413 = vmatprep.subr.bf16.mxu1 %v7368_v28  ;;  %v10368_v43 = vld [vmem:[#allocation135_spill] sm:$0xff]  ;;  %v10369_v28 = vld [vmem:[#allocation136_spill] sm:$0xff] }
 0x749   : > { %3371 = vmatpush1.bf16.msra.mxu0 %v7374_v33  ;;  %3414 = vmatpush1.bf16.msra.mxu1 %v10360_v26  ;;  %v10370_v33 = vld [vmem:[#allocation137_spill] sm:$0xff]  ;;  %v10416_v26 = vld [vmem:[#allocation183_spill] sm:$0xff] }
 0x74a   : > { %3372 = vmatprep.subr.bf16.mxu0 %v10361_v27  ;;  %3415 = vmatprep.subr.bf16.mxu1 %v10362_v54  ;;  %v10417_v27 = vld [vmem:[#allocation184_spill] sm:$0xff]  ;;  %v10418_v54 = vld [vmem:[#allocation185_spill] sm:$0xff] }
 0x74d   : > { %3373 = vmatpush1.bf16.msra.mxu0 %v10363_v55  ;;  %3416 = vmatpush1.bf16.msra.mxu1 %v10364_v34  ;;  %v10419_v55 = vld [vmem:[#allocation186_spill] sm:$0xff]  ;;  %v10420_v34 = vld [vmem:[#allocation187_spill] sm:$0xff] }
 0x74e   : > { %3374 = vmatprep.subr.bf16.mxu0 %v10365_v39  ;;  %3417 = vmatprep.subr.bf16.mxu1 %v10366_v56  ;;  %v10421_v39 = vld [vmem:[#allocation188_spill] sm:$0xff]  ;;  %v10422_v56 = vld [vmem:[#allocation189_spill] sm:$0xff] }
 0x751   : > { %3375 = vmatpush1.bf16.msra.mxu0 %v10367_v57  ;;  %3418 = vmatpush1.bf16.msra.mxu1 %v10368_v43  ;;  %v10423_v57 = vld [vmem:[#allocation190_spill] sm:$0xff]  ;;  %v10424_v43 = vld [vmem:[#allocation191_spill] sm:$0xff] }
 0x752   : > { %3376 = vmatprep.subr.bf16.mxu0 %v10369_v28  ;;  %3419 = vmatprep.subr.bf16.mxu1 %v10370_v33  ;;  %v10425_v28 = vld [vmem:[#allocation192_spill] sm:$0xff]  ;;  %v10426_v33 = vld [vmem:[#allocation193_spill] sm:$0xff] }
 0x755   : > { %3377 = vmatpush1.bf16.msra.mxu0 %v10371_v58  ;;  %3420 = vmatpush1.bf16.msra.mxu1 %v10372_v59  ;;  %v10427_v58 = vld [vmem:[#allocation194_spill] sm:$0xff]  ;;  %v10428_v59 = vld [vmem:[#allocation195_spill] sm:$0xff] }
 0x756   : > { %3378 = vmatprep.subr.bf16.mxu0 %v10373_v60  ;;  %3421 = vmatprep.subr.bf16.mxu1 %v10374_v61  ;;  %v10429_v60 = vld [vmem:[#allocation196_spill] sm:$0xff]  ;;  %v10430_v61 = vld [vmem:[#allocation197_spill] sm:$0xff] }
 0x759   : > { %3379 = vmatpush1.bf16.msra.mxu0 %v10375_v62  ;;  %3422 = vmatpush1.bf16.msra.mxu1 %v10376_v63  ;;  %v10431_v62 = vld [vmem:[#allocation198_spill] sm:$0xff]  ;;  %v10432_v63 = vld [vmem:[#allocation199_spill] sm:$0xff] }
 0x75a   : > { %3380 = vmatprep.subr.bf16.mxu0 %v10377_v0  ;;  %3423 = vmatprep.subr.bf16.mxu1 %v10378_v1  ;;  %v10433_v0 = vld [vmem:[#allocation200_spill] sm:$0xff]  ;;  %v10434_v1 = vld [vmem:[#allocation201_spill] sm:$0xff] }
 0x75d   : > { %3381 = vmatpush1.bf16.msra.mxu0 %v10379_v2  ;;  %3424 = vmatpush1.bf16.msra.mxu1 %v10380_v3  ;;  %v10435_v2 = vld [vmem:[#allocation202_spill] sm:$0xff]  ;;  %v10436_v3 = vld [vmem:[#allocation203_spill] sm:$0xff] }
 0x75e   : > { %3382 = vmatprep.subr.bf16.mxu0 %v10381_v4  ;;  %3425 = vmatprep.subr.bf16.mxu1 %v10382_v5  ;;  %v10437_v4 = vld [vmem:[#allocation204_spill] sm:$0xff]  ;;  %v10438_v5 = vld [vmem:[#allocation205_spill] sm:$0xff] }
 0x761   : > { %3383 = vmatpush1.bf16.msra.mxu0 %v10383_v6  ;;  %3426 = vmatpush1.bf16.msra.mxu1 %v10384_v7  ;;  %v10439_v6 = vld [vmem:[#allocation206_spill] sm:$0xff]  ;;  %v10440_v7 = vld [vmem:[#allocation207_spill] sm:$0xff] }
 0x762   : > { %3384 = vmatprep.subr.bf16.mxu0 %v10385_v8  ;;  %3427 = vmatprep.subr.bf16.mxu1 %v10386_v30  ;;  %v10441_v8 = vld [vmem:[#allocation208_spill] sm:$0xff]  ;;  %v10442_v30 = vld [vmem:[#allocation209_spill] sm:$0xff] }
 0x765   : > { %3385 = vmatpush1.bf16.msra.mxu0 %v10387_v9  ;;  %3428 = vmatpush1.bf16.msra.mxu1 %v10388_v31  ;;  %v10443_v9 = vld [vmem:[#allocation210_spill] sm:$0xff]  ;;  %v10444_v31 = vld [vmem:[#allocation211_spill] sm:$0xff] }
 0x766   : > { %3386 = vmatprep.subr.bf16.mxu0 %v10389_v23  ;;  %3429 = vmatprep.subr.bf16.mxu1 %v10390_v24  ;;  %v10445_v23 = vld [vmem:[#allocation212_spill] sm:$0xff]  ;;  %v10446_v24 = vld [vmem:[#allocation213_spill] sm:$0xff] }
 0x769   : > { %3387 = vmatpush1.bf16.msra.mxu0 %v10391_v22  ;;  %3430 = vmatpush1.bf16.msra.mxu1 %v10392_v40  ;;  %v10447_v22 = vld [vmem:[#allocation214_spill] sm:$0xff]  ;;  %v10448_v40 = vld [vmem:[#allocation215_spill] sm:$0xff] }
 0x76a   : > { %3388 = vmatprep.subr.bf16.mxu0 %v10393_v37  ;;  %3431 = vmatprep.subr.bf16.mxu1 %v10394_v25  ;;  %v10449_v37 = vld [vmem:[#allocation216_spill] sm:$0xff]  ;;  %v10450_v25 = vld [vmem:[#allocation217_spill] sm:$0xff] }
 0x76d   : > { %3389 = vmatpush1.bf16.msra.mxu0 %v10395_v10  ;;  %3432 = vmatpush1.bf16.msra.mxu1 %v10396_v11  ;;  %v10451_v10 = vld [vmem:[#allocation218_spill] sm:$0xff]  ;;  %v10452_v11 = vld [vmem:[#allocation219_spill] sm:$0xff] }
 0x76e   : > { %3390 = vmatprep.subr.bf16.mxu0 %v10397_v12  ;;  %3433 = vmatprep.subr.bf16.mxu1 %v10398_v13  ;;  %v10453_v12 = vld [vmem:[#allocation220_spill] sm:$0xff]  ;;  %v10454_v13 = vld [vmem:[#allocation221_spill] sm:$0xff] }
 0x771   : > { %3391 = vmatpush1.bf16.msra.mxu0 %v10399_v14  ;;  %3434 = vmatpush1.bf16.msra.mxu1 %v10400_v15  ;;  %v10455_v14 = vld [vmem:[#allocation222_spill] sm:$0xff]  ;;  %v10456_v15 = vld [vmem:[#allocation223_spill] sm:$0xff] }
 0x772   : > { %3392 = vmatprep.subr.bf16.mxu0 %v10401_v16  ;;  %3435 = vmatprep.subr.bf16.mxu1 %v10402_v17  ;;  %v10457_v16 = vld [vmem:[#allocation224_spill] sm:$0xff]  ;;  %v10458_v17 = vld [vmem:[#allocation225_spill] sm:$0xff] }
 0x775   : > { %3393 = vmatpush1.bf16.msra.mxu0 %v10403_v18  ;;  %3436 = vmatpush1.bf16.msra.mxu1 %v10404_v19  ;;  %v10459_v18 = vld [vmem:[#allocation226_spill] sm:$0xff]  ;;  %v10460_v19 = vld [vmem:[#allocation227_spill] sm:$0xff] }
 0x776   : > { %3394 = vmatprep.subr.bf16.mxu0 %v10405_v20  ;;  %3437 = vmatprep.subr.bf16.mxu1 %v10406_v21  ;;  %v10461_v20 = vld [vmem:[#allocation228_spill] sm:$0xff]  ;;  %v10462_v21 = vld [vmem:[#allocation229_spill] sm:$0xff] }
 0x779   : > { %3395 = vmatpush1.bf16.msra.mxu0 %v10407_v41  ;;  %3438 = vmatpush1.bf16.msra.mxu1 %v10408_v42  ;;  %v8352_v41 = vld [vmem:[%s9709_s7 + $0x6e0] ss:$72 sps:$4 sm:$0xff]  }
 0x77a   : > { %3396 = vmatprep.subr.bf16.mxu0 %v10409_v44  ;;  %3439 = vmatprep.subr.bf16.mxu1 %v10410_v45  ;;  %v8358_v42 = vld [vmem:[%s9709_s7 + $0x6e8] ss:$72 sps:$4 sm:$0xff]   ;;  %v8388_v44 = vld [vmem:[%s9709_s7 + $0x804] ss:$72 sps:$4 sm:$0xff]  }
 0x77b   : > { %v8394_v45 = vld [vmem:[%s9709_s7 + $0x80c] ss:$72 sps:$4 sm:$0xff]  }
 0x77d   : > { %3397 = vmatpush1.bf16.msra.mxu0 %v10411_v46  ;;  %3440 = vmatpush1.bf16.msra.mxu1 %v10412_v47  ;;  %v8400_v46 = vld [vmem:[%s9709_s7 + $0x800] ss:$72 sps:$4 sm:$0xff]  }
 0x77e   : > { %3398 = vmatprep.subr.bf16.mxu0 %v10413_v53  ;;  %3441 = vmatprep.subr.bf16.mxu1 %v10414_v49  ;;  %v8406_v47 = vld [vmem:[%s9709_s7 + $0x808] ss:$72 sps:$4 sm:$0xff]   ;;  %v8412_v53 = vld [vmem:[%s9709_s7 + $0x894] ss:$72 sps:$4 sm:$0xff]  }
 0x77f   : > { %v8418_v49 = vld [vmem:[%s9709_s7 + $0x89c] ss:$72 sps:$4 sm:$0xff]  }
 0x781   : > { %3399 = vmatpush1.bf16.msra.mxu0 %v10415_v50  ;;  %3442 = vmatpush1.bf16.msra.mxu1 %v10416_v26  ;;  %v8424_v50 = vld [vmem:[%s9709_s7 + $0x890] ss:$72 sps:$4 sm:$0xff]  }
 0x782   : > { %3454 = vmatprep.subr.bf16.mxu0 %v10417_v27  ;;  %3497 = vmatprep.subr.bf16.mxu1 %v10418_v54  ;;  %v8430_v26 = vld [vmem:[%s9709_s7 + $0x898] ss:$72 sps:$4 sm:$0xff]   ;;  %v8436_v27 = vld [vmem:[%s9709_s7 + $0x34] ss:$72 sps:$4 sm:$0xff]  }
 0x783   : > { %v8442_v54 = vld [vmem:[%s9709_s7 + $0x3c] ss:$72 sps:$4 sm:$0xff]  }
 0x784   : > { %3401 = vmatmul.mubr.bf16.vlgmr.msra.gmra.mrb[52].mxu0 %v8225_v38  ;;  %3444 = vmatmul.mubr.bf16.vlgmr.msra.gmra.mrb[52].mxu1 %v8225_v38 }
 0x785   : > { %3455 = vmatpush1.bf16.msra.mxu0 %v10419_v55  ;;  %3486 = vmatprep.mubr.bf16.mxu0 %v8221_v51  ;;  %v8450_v55 = vld [vmem:[%s9709_s7 + $0x30] ss:$72 sps:$4 sm:$0xff]  }
 0x786   : > { %3498 = vmatpush1.bf16.msra.mxu1 %v10420_v34  ;;  %3529 = vmatprep.mubr.bf16.mxu1 %v8221_v51  ;;  %v8457_v34 = vld [vmem:[%s9709_s7 + $0x38] ss:$72 sps:$4 sm:$0xff]  }
 0x787   : > { %3456 = vmatprep.subr.bf16.mxu0 %v10421_v39  ;;  %3499 = vmatprep.subr.bf16.mxu1 %v10422_v56  ;;  %v8464_v39 = vld [vmem:[%s9709_s7 + $0xc4] ss:$72 sps:$4 sm:$0xff]  }
 0x788   : > { %v8470_v56 = vld [vmem:[%s9709_s7 + $0xcc] ss:$72 sps:$4 sm:$0xff]  }
 0x789   : > { %3457 = vmatpush1.bf16.msra.mxu0 %v10423_v57  ;;  %v8476_v57 = vld [vmem:[%s9709_s7 + $0xc0] ss:$72 sps:$4 sm:$0xff]  }
 0x78a   : > { %3500 = vmatpush1.bf16.msra.mxu1 %v10424_v43  ;;  %3458 = vmatprep.subr.bf16.mxu0 %v10425_v28  ;;  %v8482_v43 = vld [vmem:[%s9709_s7 + $0xc8] ss:$72 sps:$4 sm:$0xff]   ;;  %v8488_v28 = vld [vmem:[%s9709_s7 + $0x154] ss:$72 sps:$4 sm:$0xff]  }
 0x78b   : > { %3501 = vmatprep.subr.bf16.mxu1 %v10426_v33  ;;  %v8494_v33 = vld [vmem:[%s9709_s7 + $0x15c] ss:$72 sps:$4 sm:$0xff]  }
 0x78d   : > { %3459 = vmatpush1.bf16.msra.mxu0 %v10427_v58  ;;  %v8500_v58 = vld [vmem:[%s9709_s7 + $0x150] ss:$72 sps:$4 sm:$0xff]  }
 0x78e   : > { %3502 = vmatpush1.bf16.msra.mxu1 %v10428_v59  ;;  %3460 = vmatprep.subr.bf16.mxu0 %v10429_v60  ;;  %v8506_v59 = vld [vmem:[%s9709_s7 + $0x158] ss:$72 sps:$4 sm:$0xff]   ;;  %v8512_v60 = vld [vmem:[%s9709_s7 + $0x1e4] ss:$72 sps:$4 sm:$0xff]  }
 0x78f   : > { %3503 = vmatprep.subr.bf16.mxu1 %v10430_v61  ;;  %v8518_v61 = vld [vmem:[%s9709_s7 + $0x1ec] ss:$72 sps:$4 sm:$0xff]  }
 0x791   : > { %3461 = vmatpush1.bf16.msra.mxu0 %v10431_v62  ;;  %v8524_v62 = vld [vmem:[%s9709_s7 + $0x1e0] ss:$72 sps:$4 sm:$0xff]  }
 0x792   : > { %3504 = vmatpush1.bf16.msra.mxu1 %v10432_v63  ;;  %3462 = vmatprep.subr.bf16.mxu0 %v10433_v0  ;;  %v8530_v63 = vld [vmem:[%s9709_s7 + $0x1e8] ss:$72 sps:$4 sm:$0xff]   ;;  %v8536_v0 = vld [vmem:[%s9709_s7 + $0x274] ss:$72 sps:$4 sm:$0xff]  }
 0x793   : > { %3505 = vmatprep.subr.bf16.mxu1 %v10434_v1  ;;  %v8542_v1 = vld [vmem:[%s9709_s7 + $0x27c] ss:$72 sps:$4 sm:$0xff]  }
 0x795   : > { %3463 = vmatpush1.bf16.msra.mxu0 %v10435_v2  ;;  %v8548_v2 = vld [vmem:[%s9709_s7 + $0x270] ss:$72 sps:$4 sm:$0xff]  }
 0x796   : > { %3506 = vmatpush1.bf16.msra.mxu1 %v10436_v3  ;;  %3464 = vmatprep.subr.bf16.mxu0 %v10437_v4  ;;  %v8554_v3 = vld [vmem:[%s9709_s7 + $0x278] ss:$72 sps:$4 sm:$0xff]   ;;  %v8560_v4 = vld [vmem:[%s9709_s7 + $0x304] ss:$72 sps:$4 sm:$0xff]  }
 0x797   : > { %3507 = vmatprep.subr.bf16.mxu1 %v10438_v5  ;;  %v8566_v5 = vld [vmem:[%s9709_s7 + $0x30c] ss:$72 sps:$4 sm:$0xff]  }
 0x799   : > { %3465 = vmatpush1.bf16.msra.mxu0 %v10439_v6  ;;  %v8572_v6 = vld [vmem:[%s9709_s7 + $0x300] ss:$72 sps:$4 sm:$0xff]  }
 0x79a   : > { %3508 = vmatpush1.bf16.msra.mxu1 %v10440_v7  ;;  %3466 = vmatprep.subr.bf16.mxu0 %v10441_v8  ;;  %v8578_v7 = vld [vmem:[%s9709_s7 + $0x308] ss:$72 sps:$4 sm:$0xff]   ;;  %v8584_v8 = vld [vmem:[%s9709_s7 + $0x394] ss:$72 sps:$4 sm:$0xff]  }
 0x79b   : > { %3509 = vmatprep.subr.bf16.mxu1 %v10442_v30  ;;  %v8590_v30 = vld [vmem:[%s9709_s7 + $0x39c] ss:$72 sps:$4 sm:$0xff]  }
 0x79d   : > { %3467 = vmatpush1.bf16.msra.mxu0 %v10443_v9  ;;  %v8596_v9 = vld [vmem:[%s9709_s7 + $0x390] ss:$72 sps:$4 sm:$0xff]  }
 0x79e   : > { %3510 = vmatpush1.bf16.msra.mxu1 %v10444_v31  ;;  %3468 = vmatprep.subr.bf16.mxu0 %v10445_v23  ;;  %v8602_v31 = vld [vmem:[%s9709_s7 + $0x398] ss:$72 sps:$4 sm:$0xff]   ;;  %v8608_v23 = vld [vmem:[%s9709_s7 + $0x424] ss:$72 sps:$4 sm:$0xff]  }
 0x79f   : > { %3511 = vmatprep.subr.bf16.mxu1 %v10446_v24  ;;  %10463 = vst [vmem:[#allocation2_spill] sm:$0xff] %v8608_v23  ;;  %v8614_v24 = vld [vmem:[%s9709_s7 + $0x42c] ss:$72 sps:$4 sm:$0xff]  }
 0x7a0   : > { %10464 = vst [vmem:[#allocation3_spill] sm:$0xff] %v8614_v24 }
 0x7a1   : > { %3469 = vmatpush1.bf16.msra.mxu0 %v10447_v22  ;;  %v8620_v22 = vld [vmem:[%s9709_s7 + $0x420] ss:$72 sps:$4 sm:$0xff]  }
 0x7a2   : > { %3512 = vmatpush1.bf16.msra.mxu1 %v10448_v40  ;;  %3470 = vmatprep.subr.bf16.mxu0 %v10449_v37  ;;  %10465 = vst [vmem:[#allocation4_spill] sm:$0xff] %v8620_v22  ;;  %v8626_v40 = vld [vmem:[%s9709_s7 + $0x428] ss:$72 sps:$4 sm:$0xff]   ;;  %v8632_v37 = vld [vmem:[%s9709_s7 + $0x4b4] ss:$72 sps:$4 sm:$0xff]  }
 0x7a3   : > { %3513 = vmatprep.subr.bf16.mxu1 %v10450_v25  ;;  %10466 = vst [vmem:[#allocation5_spill] sm:$0xff] %v8626_v40  ;;  %10467 = vst [vmem:[#allocation6_spill] sm:$0xff] %v8632_v37  ;;  %v8638_v25 = vld [vmem:[%s9709_s7 + $0x4bc] ss:$72 sps:$4 sm:$0xff]  }
 0x7a4   : > { %10468 = vst [vmem:[#allocation7_spill] sm:$0xff] %v8638_v25 }
 0x7a5   : > { %3471 = vmatpush1.bf16.msra.mxu0 %v10451_v10  ;;  %v8644_v10 = vld [vmem:[%s9709_s7 + $0x4b0] ss:$72 sps:$4 sm:$0xff]  }
 0x7a6   : > { %3514 = vmatpush1.bf16.msra.mxu1 %v10452_v11  ;;  %3472 = vmatprep.subr.bf16.mxu0 %v10453_v12  ;;  %10469 = vst [vmem:[#allocation8_spill] sm:$0xff] %v8644_v10  ;;  %v8650_v11 = vld [vmem:[%s9709_s7 + $0x4b8] ss:$72 sps:$4 sm:$0xff]   ;;  %v8656_v12 = vld [vmem:[%s9709_s7 + $0x544] ss:$72 sps:$4 sm:$0xff]  }
 0x7a7   : > { %3515 = vmatprep.subr.bf16.mxu1 %v10454_v13  ;;  %10470 = vst [vmem:[#allocation9_spill] sm:$0xff] %v8650_v11  ;;  %10471 = vst [vmem:[#allocation10_spill] sm:$0xff] %v8656_v12  ;;  %v8662_v13 = vld [vmem:[%s9709_s7 + $0x54c] ss:$72 sps:$4 sm:$0xff]  }
 0x7a8   : > { %10472 = vst [vmem:[#allocation11_spill] sm:$0xff] %v8662_v13 }
 0x7a9   : > { %3473 = vmatpush1.bf16.msra.mxu0 %v10455_v14  ;;  %v8668_v14 = vld [vmem:[%s9709_s7 + $0x540] ss:$72 sps:$4 sm:$0xff]  }
 0x7aa   : > { %3516 = vmatpush1.bf16.msra.mxu1 %v10456_v15  ;;  %3474 = vmatprep.subr.bf16.mxu0 %v10457_v16  ;;  %10473 = vst [vmem:[#allocation12_spill] sm:$0xff] %v8668_v14  ;;  %v8674_v15 = vld [vmem:[%s9709_s7 + $0x548] ss:$72 sps:$4 sm:$0xff]   ;;  %v8680_v16 = vld [vmem:[%s9709_s7 + $0x5d4] ss:$72 sps:$4 sm:$0xff]  }
 0x7ab   : > { %3517 = vmatprep.subr.bf16.mxu1 %v10458_v17  ;;  %10474 = vst [vmem:[#allocation13_spill] sm:$0xff] %v8674_v15  ;;  %10475 = vst [vmem:[#allocation14_spill] sm:$0xff] %v8680_v16  ;;  %v8686_v17 = vld [vmem:[%s9709_s7 + $0x5dc] ss:$72 sps:$4 sm:$0xff]  }
 0x7ac   : > { %10476 = vst [vmem:[#allocation15_spill] sm:$0xff] %v8686_v17 }
 0x7ad   : > { %3475 = vmatpush1.bf16.msra.mxu0 %v10459_v18  ;;  %v8692_v18 = vld [vmem:[%s9709_s7 + $0x5d0] ss:$72 sps:$4 sm:$0xff]  }
 0x7ae   : > { %3518 = vmatpush1.bf16.msra.mxu1 %v10460_v19  ;;  %3476 = vmatprep.subr.bf16.mxu0 %v10461_v20  ;;  %10477 = vst [vmem:[#allocation16_spill] sm:$0xff] %v8692_v18  ;;  %v8698_v19 = vld [vmem:[%s9709_s7 + $0x5d8] ss:$72 sps:$4 sm:$0xff]   ;;  %v8704_v20 = vld [vmem:[%s9709_s7 + $0x664] ss:$72 sps:$4 sm:$0xff]  }
 0x7af   : > { %3519 = vmatprep.subr.bf16.mxu1 %v10462_v21  ;;  %10478 = vst [vmem:[#allocation17_spill] sm:$0xff] %v8698_v19  ;;  %10479 = vst [vmem:[#allocation18_spill] sm:$0xff] %v8704_v20  ;;  %v8710_v21 = vld [vmem:[%s9709_s7 + $0x66c] ss:$72 sps:$4 sm:$0xff]  }
 0x7b0   : > { %10480 = vst [vmem:[#allocation19_spill] sm:$0xff] %v8710_v21 }
 0x7b1   : > { %3477 = vmatpush1.bf16.msra.mxu0 %v8002_v35  ;;  %v8364_v35 = vld [vmem:[%s9709_s7 + $0x774] ss:$72 sps:$4 sm:$0xff]  }
 0x7b2   : > { %3520 = vmatpush1.bf16.msra.mxu1 %v8008_v32  ;;  %3478 = vmatprep.subr.bf16.mxu0 %v8014_v52  ;;  %v8376_v52 = vld [vmem:[%s9709_s7 + $0x770] ss:$72 sps:$4 sm:$0xff]  }
 0x7b3   : > { %3521 = vmatprep.subr.bf16.mxu1 %v8020_v29  ;;  %v8370_v29 = vld [vmem:[%s9709_s7 + $0x77c] ss:$72 sps:$4 sm:$0xff]   ;;  %v8382_v32 = vld [vmem:[%s9709_s7 + $0x778] ss:$72 sps:$4 sm:$0xff]  }
 0x7b5   : > { %3479 = vmatpush1.bf16.msra.mxu0 %v8352_v41 }
 0x7b6   : > { %3522 = vmatpush1.bf16.msra.mxu1 %v8358_v42  ;;  %3480 = vmatprep.subr.bf16.mxu0 %v8364_v35 }
 0x7b7   : > { %3523 = vmatprep.subr.bf16.mxu1 %v8370_v29 }
 0x7b9   : > { %3481 = vmatpush1.bf16.msra.mxu0 %v8376_v52 }
 0x7ba   : > { %3524 = vmatpush1.bf16.msra.mxu1 %v8382_v32  ;;  %3482 = vmatprep.subr.bf16.mxu0 %v8388_v44 }
 0x7bb   : > { %3525 = vmatprep.subr.bf16.mxu1 %v8394_v45 }
 0x7bd   : > { %3483 = vmatpush1.bf16.msra.mxu0 %v8400_v46 }
 0x7be   : > { %3526 = vmatpush1.bf16.msra.mxu1 %v8406_v47  ;;  %3484 = vmatprep.subr.bf16.mxu0 %v8412_v53 }
 0x7bf   : > { %3527 = vmatprep.subr.bf16.mxu1 %v8418_v49 }
 0x7c1   : > { %3485 = vmatpush1.bf16.msra.mxu0 %v8424_v50 }
 0x7c2   : > { %3528 = vmatpush1.bf16.msra.mxu1 %v8430_v26  ;;  %3540 = vmatprep.subr.bf16.mxu0 %v8436_v27 }
 0x7c3   : > { %3583 = vmatprep.subr.bf16.mxu1 %v8442_v54 }
 0x7c4   : > { %3487 = vmatmul.mubr.bf16.vlgmr.msra.gmra.mrb[56].mxu0 %v8225_v38 }
 0x7c5   : > { %3530 = vmatmul.mubr.bf16.vlgmr.msra.gmra.mrb[56].mxu1 %v8225_v38  ;;  %3541 = vmatpush1.bf16.msra.mxu0 %v8450_v55 }
 0x7c6   : > { %3572 = vmatprep.mubr.bf16.mxu0 %v8221_v51  ;;  %3584 = vmatpush1.bf16.msra.mxu1 %v8457_v34 }
 0x7c7   : > { %3615 = vmatprep.mubr.bf16.mxu1 %v8221_v51  ;;  %3542 = vmatprep.subr.bf16.mxu0 %v8464_v39 }
 0x7c8   : > { %3585 = vmatprep.subr.bf16.mxu1 %v8470_v56 }
 0x7c9   : > { %3543 = vmatpush1.bf16.msra.mxu0 %v8476_v57 }
 0x7ca   : > { %3586 = vmatpush1.bf16.msra.mxu1 %v8482_v43  ;;  %3544 = vmatprep.subr.bf16.mxu0 %v8488_v28 }
 0x7cb   : > { %3587 = vmatprep.subr.bf16.mxu1 %v8494_v33 }
 0x7cd   : > { %3545 = vmatpush1.bf16.msra.mxu0 %v8500_v58 }
 0x7ce   : > { %3588 = vmatpush1.bf16.msra.mxu1 %v8506_v59  ;;  %3546 = vmatprep.subr.bf16.mxu0 %v8512_v60 }
 0x7cf   : > { %3589 = vmatprep.subr.bf16.mxu1 %v8518_v61 }
 0x7d1   : > { %3547 = vmatpush1.bf16.msra.mxu0 %v8524_v62 }
 0x7d2   : > { %3590 = vmatpush1.bf16.msra.mxu1 %v8530_v63  ;;  %3548 = vmatprep.subr.bf16.mxu0 %v8536_v0 }
 0x7d3   : > { %3591 = vmatprep.subr.bf16.mxu1 %v8542_v1 }
 0x7d5   : > { %3549 = vmatpush1.bf16.msra.mxu0 %v8548_v2 }
 0x7d6   : > { %3592 = vmatpush1.bf16.msra.mxu1 %v8554_v3  ;;  %3550 = vmatprep.subr.bf16.mxu0 %v8560_v4 }
 0x7d7   : > { %3593 = vmatprep.subr.bf16.mxu1 %v8566_v5 }
 0x7d9   : > { %3551 = vmatpush1.bf16.msra.mxu0 %v8572_v6 }
 0x7da   : > { %3594 = vmatpush1.bf16.msra.mxu1 %v8578_v7  ;;  %3552 = vmatprep.subr.bf16.mxu0 %v8584_v8 }
 0x7db   : > { %3595 = vmatprep.subr.bf16.mxu1 %v8590_v30 }
 0x7dd   : > { %3553 = vmatpush1.bf16.msra.mxu0 %v8596_v9 }
 0x7de   : > { %3596 = vmatpush1.bf16.msra.mxu1 %v8602_v31  ;;  %3554 = vmatprep.subr.bf16.mxu0 %v8608_v23 }
 0x7df   : > { %3597 = vmatprep.subr.bf16.mxu1 %v8614_v24 }
 0x7e1   : > { %3555 = vmatpush1.bf16.msra.mxu0 %v8620_v22 }
 0x7e2   : > { %3598 = vmatpush1.bf16.msra.mxu1 %v8626_v40  ;;  %3556 = vmatprep.subr.bf16.mxu0 %v8632_v37  ;;  %v8905_v37 = vld [vmem:[%s9709_s7 + $0x3a0] ss:$72 sps:$4 sm:$0xff]  }
 0x7e3   : > { %3599 = vmatprep.subr.bf16.mxu1 %v8638_v25  ;;  %10512 = vst [vmem:[#allocation51_spill] sm:$0xff] %v8905_v37 }
 0x7e5   : > { %3557 = vmatpush1.bf16.msra.mxu0 %v8644_v10 }
 0x7e6   : > { %3600 = vmatpush1.bf16.msra.mxu1 %v8650_v11  ;;  %3558 = vmatprep.subr.bf16.mxu0 %v8656_v12 }
 0x7e7   : > { %3601 = vmatprep.subr.bf16.mxu1 %v8662_v13 }
 0x7e9   : > { %3559 = vmatpush1.bf16.msra.mxu0 %v8668_v14 }
 0x7ea   : > { %3602 = vmatpush1.bf16.msra.mxu1 %v8674_v15  ;;  %3560 = vmatprep.subr.bf16.mxu0 %v8680_v16 }
 0x7eb   : > { %3603 = vmatprep.subr.bf16.mxu1 %v8686_v17 }
 0x7ed   : > { %3561 = vmatpush1.bf16.msra.mxu0 %v8692_v18  ;;  %v8716_v18 = vld [vmem:[%s9709_s7 + $0x660] ss:$72 sps:$4 sm:$0xff]  }
 0x7ee   : > { %3604 = vmatpush1.bf16.msra.mxu1 %v8698_v19  ;;  %3562 = vmatprep.subr.bf16.mxu0 %v8704_v20  ;;  %10481 = vst [vmem:[#allocation20_spill] sm:$0xff] %v8716_v18  ;;  %v8722_v19 = vld [vmem:[%s9709_s7 + $0x668] ss:$72 sps:$4 sm:$0xff]   ;;  %v8728_v20 = vld [vmem:[%s9709_s7 + $0x6f4] ss:$72 sps:$4 sm:$0xff]  }
 0x7ef   : > { %3605 = vmatprep.subr.bf16.mxu1 %v8710_v21  ;;  %10482 = vst [vmem:[#allocation21_spill] sm:$0xff] %v8722_v19  ;;  %10483 = vst [vmem:[#allocation22_spill] sm:$0xff] %v8728_v20  ;;  %v8734_v21 = vld [vmem:[%s9709_s7 + $0x6fc] ss:$72 sps:$4 sm:$0xff]  }
 0x7f0   : > { %10484 = vst [vmem:[#allocation23_spill] sm:$0xff] %v8734_v21 }
 0x7f1   : > { %3563 = vmatpush1.bf16.msra.mxu0 %v8716_v18  ;;  %v8740_v18 = vld [vmem:[%s9709_s7 + $0x6f0] ss:$72 sps:$4 sm:$0xff]  }
 0x7f2   : > { %3606 = vmatpush1.bf16.msra.mxu1 %v8722_v19  ;;  %3564 = vmatprep.subr.bf16.mxu0 %v8728_v20  ;;  %10485 = vst [vmem:[#allocation24_spill] sm:$0xff] %v8740_v18  ;;  %v8746_v19 = vld [vmem:[%s9709_s7 + $0x6f8] ss:$72 sps:$4 sm:$0xff]   ;;  %v8752_v20 = vld [vmem:[%s9709_s7 + $0x784] ss:$72 sps:$4 sm:$0xff]  }
 0x7f3   : > { %3607 = vmatprep.subr.bf16.mxu1 %v8734_v21  ;;  %10486 = vst [vmem:[#allocation25_spill] sm:$0xff] %v8746_v19  ;;  %10487 = vst [vmem:[#allocation26_spill] sm:$0xff] %v8752_v20  ;;  %v8758_v21 = vld [vmem:[%s9709_s7 + $0x78c] ss:$72 sps:$4 sm:$0xff]  }
 0x7f4   : > { %10488 = vst [vmem:[#allocation27_spill] sm:$0xff] %v8758_v21 }
 0x7f5   : > { %3565 = vmatpush1.bf16.msra.mxu0 %v8740_v18  ;;  %v8764_v18 = vld [vmem:[%s9709_s7 + $0x780] ss:$72 sps:$4 sm:$0xff]  }
 0x7f6   : > { %3608 = vmatpush1.bf16.msra.mxu1 %v8746_v19  ;;  %3566 = vmatprep.subr.bf16.mxu0 %v8752_v20  ;;  %10489 = vst [vmem:[#allocation28_spill] sm:$0xff] %v8764_v18  ;;  %v8770_v19 = vld [vmem:[%s9709_s7 + $0x788] ss:$72 sps:$4 sm:$0xff]   ;;  %v8776_v20 = vld [vmem:[%s9709_s7 + $0x814] ss:$72 sps:$4 sm:$0xff]  }
 0x7f7   : > { %3609 = vmatprep.subr.bf16.mxu1 %v8758_v21  ;;  %10490 = vst [vmem:[#allocation29_spill] sm:$0xff] %v8770_v19  ;;  %10491 = vst [vmem:[#allocation30_spill] sm:$0xff] %v8776_v20  ;;  %v8782_v21 = vld [vmem:[%s9709_s7 + $0x81c] ss:$72 sps:$4 sm:$0xff]  }
 0x7f8   : > { %10492 = vst [vmem:[#allocation31_spill] sm:$0xff] %v8782_v21 }
 0x7f9   : > { %3567 = vmatpush1.bf16.msra.mxu0 %v8764_v18  ;;  %v8788_v18 = vld [vmem:[%s9709_s7 + $0x810] ss:$72 sps:$4 sm:$0xff]  }
 0x7fa   : > { %3610 = vmatpush1.bf16.msra.mxu1 %v8770_v19  ;;  %3568 = vmatprep.subr.bf16.mxu0 %v8776_v20  ;;  %10493 = vst [vmem:[#allocation32_spill] sm:$0xff] %v8788_v18  ;;  %v8794_v19 = vld [vmem:[%s9709_s7 + $0x818] ss:$72 sps:$4 sm:$0xff]   ;;  %v8800_v20 = vld [vmem:[%s9709_s7 + $0x8a4] ss:$72 sps:$4 sm:$0xff]  }
 0x7fb   : > { %3611 = vmatprep.subr.bf16.mxu1 %v8782_v21  ;;  %10494 = vst [vmem:[#allocation33_spill] sm:$0xff] %v8794_v19  ;;  %10495 = vst [vmem:[#allocation34_spill] sm:$0xff] %v8800_v20  ;;  %v8806_v21 = vld [vmem:[%s9709_s7 + $0x8ac] ss:$72 sps:$4 sm:$0xff]  }
 0x7fc   : > { %10496 = vst [vmem:[#allocation35_spill] sm:$0xff] %v8806_v21 }
 0x7fd   : > { %3569 = vmatpush1.bf16.msra.mxu0 %v8788_v18  ;;  %v8812_v18 = vld [vmem:[%s9709_s7 + $0x8a0] ss:$72 sps:$4 sm:$0xff]  }
 0x7fe   : > { %3612 = vmatpush1.bf16.msra.mxu1 %v8794_v19  ;;  %3570 = vmatprep.subr.bf16.mxu0 %v8800_v20  ;;  %10497 = vst [vmem:[#allocation36_spill] sm:$0xff] %v8812_v18  ;;  %v8818_v19 = vld [vmem:[%s9709_s7 + $0x8a8] ss:$72 sps:$4 sm:$0xff]   ;;  %v8824_v20 = vld [vmem:[%s9709_s7 + $0x44] ss:$72 sps:$4 sm:$0xff]  }
 0x7ff   : > { %3613 = vmatprep.subr.bf16.mxu1 %v8806_v21  ;;  %10498 = vst [vmem:[#allocation37_spill] sm:$0xff] %v8818_v19  ;;  %10499 = vst [vmem:[#allocation38_spill] sm:$0xff] %v8824_v20 }
 0x801   : > { %3571 = vmatpush1.bf16.msra.mxu0 %v8812_v18  ;;  %v8832_v18 = vld [vmem:[%s9709_s7 + $0x40] ss:$72 sps:$4 sm:$0xff]  }
 0x802   : > { %3614 = vmatpush1.bf16.msra.mxu1 %v8818_v19  ;;  %3626 = vmatprep.subr.bf16.mxu0 %v8824_v20  ;;  %10500 = vst [vmem:[#allocation39_spill] sm:$0xff] %v8832_v18  ;;  %v8839_v19 = vld [vmem:[%s9709_s7 + $0xd4] ss:$72 sps:$4 sm:$0xff]   ;;  %v8845_v20 = vld [vmem:[%s9709_s7 + $0xd0] ss:$72 sps:$4 sm:$0xff]  }
 0x803   : > { %10501 = vst [vmem:[#allocation40_spill] sm:$0xff] %v8839_v19  ;;  %10502 = vst [vmem:[#allocation41_spill] sm:$0xff] %v8845_v20 }
 0x804   : > { %3573 = vmatmul.mubr.bf16.vlgmr.msra.gmra.mrb[60].mxu0 %v8225_v38 }
 0x805   : > { %3616 = vmatmul.mubr.bf16.vlgmr.msra.gmra.mrb[60].mxu1 %v8225_v38  ;;  %3627 = vmatpush1.bf16.msra.mxu0 %v8832_v18  ;;  %v8851_v18 = vld [vmem:[%s9709_s7 + $0x164] ss:$72 sps:$4 sm:$0xff]  }
 0x806   : > { %3658 = vmatprep.mubr.bf16.mxu0 %v8221_v51  ;;  %3628 = vmatprep.subr.bf16.mxu0 %v8839_v19  ;;  %10503 = vst [vmem:[#allocation42_spill] sm:$0xff] %v8851_v18  ;;  %v8857_v51 = vld [vmem:[%s9709_s7 + $0x160] ss:$72 sps:$4 sm:$0xff]   ;;  %v8863_v19 = vld [vmem:[%s9709_s7 + $0x1f4] ss:$72 sps:$4 sm:$0xff]  }
 0x807   : > { %10504 = vst [vmem:[#allocation43_spill] sm:$0xff] %v8857_v51  ;;  %10505 = vst [vmem:[#allocation44_spill] sm:$0xff] %v8863_v19 }
 0x809   : > { %3629 = vmatpush1.bf16.msra.mxu0 %v8845_v20  ;;  %v8869_v20 = vld [vmem:[%s9709_s7 + $0x1f0] ss:$72 sps:$4 sm:$0xff]  }
 0x80a   : > { %3630 = vmatprep.subr.bf16.mxu0 %v8851_v18  ;;  %10506 = vst [vmem:[#allocation45_spill] sm:$0xff] %v8869_v20  ;;  %v8875_v18 = vld [vmem:[%s9709_s7 + $0x284] ss:$72 sps:$4 sm:$0xff]  }
 0x80b   : > { %10507 = vst [vmem:[#allocation46_spill] sm:$0xff] %v8875_v18 }
 0x80d   : > { %3631 = vmatpush1.bf16.msra.mxu0 %v8857_v51  ;;  %v8881_v51 = vld [vmem:[%s9709_s7 + $0x280] ss:$72 sps:$4 sm:$0xff]  }
 0x80e   : > { %3632 = vmatprep.subr.bf16.mxu0 %v8863_v19  ;;  %10508 = vst [vmem:[#allocation47_spill] sm:$0xff] %v8881_v51  ;;  %v8887_v19 = vld [vmem:[%s9709_s7 + $0x314] ss:$72 sps:$4 sm:$0xff]  }
 0x80f   : > { %10509 = vst [vmem:[#allocation48_spill] sm:$0xff] %v8887_v19 }
 0x811   : > { %3633 = vmatpush1.bf16.msra.mxu0 %v8869_v20 }
 0x812   : > { %3634 = vmatprep.subr.bf16.mxu0 %v8875_v18  ;;  %v8893_v18 = vld [vmem:[%s9709_s7 + $0x310] ss:$72 sps:$4 sm:$0xff]  }
 0x813   : > { %10510 = vst [vmem:[#allocation49_spill] sm:$0xff] %v8893_v18 }
 0x815   : > { %3635 = vmatpush1.bf16.msra.mxu0 %v8881_v51 }
 0x816   : > { %3636 = vmatprep.subr.bf16.mxu0 %v8887_v19  ;;  %v8899_v19 = vld [vmem:[%s9709_s7 + $0x3a4] ss:$72 sps:$4 sm:$0xff]  }
 0x817   : > { %v3316_v20 = vpop.f32.mrb[48].mxu0  ;;  %v3359_v21 = vpop.f32.mrb[48].mxu1  ;;  %10511 = vst [vmem:[#allocation50_spill] sm:$0xff] %v8899_v19 }
 0x818   : > { %v3318_v17 = vpop.f32.mrb[49].mxu0  ;;  %v3361_v16 = vpop.f32.mrb[49].mxu1 }
 0x819   : > { %3637 = vmatpush1.bf16.msra.mxu0 %v8893_v18  ;;  %v3320_v15 = vpop.f32.mrb[50].mxu0  ;;  %v3363_v51 = vpop.f32.mrb[50].mxu1 }
 0x81a   : > { %v3669_v14 = vpack.c.bf16 %v3320_v15, %v3316_v20  ;;  %v3671_v13 = vpack.c.bf16 %v3363_v51, %v3359_v21  ;;  %v3322_v12 = vpop.f32.mrb[51].mxu0  ;;  %v3365_v11 = vpop.f32.mrb[51].mxu1  ;;  %3638 = vmatprep.subr.bf16.mxu0 %v8899_v19  ;;  %v8911_v15 = vld [vmem:[%s9709_s7 + $0x434] ss:$72 sps:$4 sm:$0xff]   ;;  %v8965_v20 = vld [vmem:[%s9709_s7 + $0x670] ss:$72 sps:$4 sm:$0xff]  }
 0x81b   : > { %v3670_v10 = vpack.c.bf16 %v3322_v12, %v3318_v17  ;;  %v3672_v25 = vpack.c.bf16 %v3365_v11, %v3361_v16  ;;  %10513 = vst [vmem:[#allocation52_spill] sm:$0xff] %v8911_v15  ;;  %v8917_v11 = vld [vmem:[%s9709_s7 + $0x430] ss:$72 sps:$4 sm:$0xff]   ;;  %v8929_v12 = vld [vmem:[%s9709_s7 + $0x4c0] ss:$72 sps:$4 sm:$0xff]   ;;  %10522 = vst [vmem:[#allocation61_spill] sm:$0xff] %v8965_v20 }
 0x81c   : > { %10514 = vst [vmem:[#allocation53_spill] sm:$0xff] %v8917_v11  ;;  %10516 = vst [vmem:[#allocation55_spill] sm:$0xff] %v8929_v12  ;;  %v8953_v16 = vld [vmem:[%s9709_s7 + $0x5e0] ss:$72 sps:$4 sm:$0xff]   ;;  %v8959_v17 = vld [vmem:[%s9709_s7 + $0x674] ss:$72 sps:$4 sm:$0xff]  }
 0x81d   : > { %3639 = vmatpush1.bf16.msra.mxu0 %v8905_v37  ;;  %3698 = vmatprep.subr.bf16.mxu1 %v3670_v10  ;;  %v8923_v10 = vld [vmem:[%s9709_s7 + $0x4c4] ss:$72 sps:$4 sm:$0xff]   ;;  %10520 = vst [vmem:[#allocation59_spill] sm:$0xff] %v8953_v16  ;;  %10521 = vst [vmem:[#allocation60_spill] sm:$0xff] %v8959_v17  ;;  %v8977_v51 = vld [vmem:[%s9709_s7 + $0x700] ss:$72 sps:$4 sm:$0xff]  }
 0x81e   : > { %3699 = vmatpush1.bf16.msra.mxu1 %v3669_v14  ;;  %3640 = vmatprep.subr.bf16.mxu0 %v8911_v15  ;;  %10515 = vst [vmem:[#allocation54_spill] sm:$0xff] %v8923_v10  ;;  %v8947_v14 = vld [vmem:[%s9709_s7 + $0x5e4] ss:$72 sps:$4 sm:$0xff]   ;;  %10524 = vst [vmem:[#allocation63_spill] sm:$0xff] %v8977_v51  ;;  %v5424_v19 = vld [vmem:[%s9709_s7 + $0x368] ss:$72 sps:$4 sm:$0xff]  }
 0x81f   : > { %3700 = vmatprep.subr.bf16.mxu1 %v3672_v25  ;;  %v8935_v25 = vld [vmem:[%s9709_s7 + $0x554] ss:$72 sps:$4 sm:$0xff]   ;;  %10519 = vst [vmem:[#allocation58_spill] sm:$0xff] %v8947_v14  ;;  %v8971_v21 = vld [vmem:[%s9709_s7 + $0x704] ss:$72 sps:$4 sm:$0xff]  }
 0x820   : > { %10517 = vst [vmem:[#allocation56_spill] sm:$0xff] %v8935_v25  ;;  %10523 = vst [vmem:[#allocation62_spill] sm:$0xff] %v8971_v21  ;;  %v5423_v15 = vld [vmem:[%s9709_s7 + $0x36c] ss:$72 sps:$4 sm:$0xff]  }
 0x821   : > { %3641 = vmatpush1.bf16.msra.mxu0 %v8917_v11 }
 0x822   : > { %3701 = vmatpush1.bf16.msra.mxu1 %v3671_v13  ;;  %3642 = vmatprep.subr.bf16.mxu0 %v8923_v10  ;;  %v8941_v13 = vld [vmem:[%s9709_s7 + $0x550] ss:$72 sps:$4 sm:$0xff]  }
 0x823   : > { %10518 = vst [vmem:[#allocation57_spill] sm:$0xff] %v8941_v13 }
 0x825   : > { %3643 = vmatpush1.bf16.msra.mxu0 %v8929_v12 }
 0x826   : > { %3644 = vmatprep.subr.bf16.mxu0 %v8935_v25 }
 0x829   : > { %3645 = vmatpush1.bf16.msra.mxu0 %v8941_v13 }
 0x82a   : > { %3646 = vmatprep.subr.bf16.mxu0 %v8947_v14 }
 0x82d   : > { %3647 = vmatpush1.bf16.msra.mxu0 %v8953_v16 }
 0x82e   : > { %3648 = vmatprep.subr.bf16.mxu0 %v8959_v17  ;;  %v8983_v17 = vld [vmem:[%s9709_s7 + $0x794] ss:$72 sps:$4 sm:$0xff]  }
 0x82f   : > { %10525 = vst [vmem:[#allocation64_spill] sm:$0xff] %v8983_v17 }
 0x831   : > { %3649 = vmatpush1.bf16.msra.mxu0 %v8965_v20  ;;  %v8989_v20 = vld [vmem:[%s9709_s7 + $0x790] ss:$72 sps:$4 sm:$0xff]  }
 0x832   : > { %3650 = vmatprep.subr.bf16.mxu0 %v8971_v21  ;;  %10526 = vst [vmem:[#allocation65_spill] sm:$0xff] %v8989_v20  ;;  %v8995_v21 = vld [vmem:[%s9709_s7 + $0x824] ss:$72 sps:$4 sm:$0xff]  }
 0x833   : > { %10527 = vst [vmem:[#allocation66_spill] sm:$0xff] %v8995_v21 }
 0x835   : > { %3651 = vmatpush1.bf16.msra.mxu0 %v8977_v51  ;;  %v9001_v51 = vld [vmem:[%s9709_s7 + $0x820] ss:$72 sps:$4 sm:$0xff]  }
 0x836   : > { %3652 = vmatprep.subr.bf16.mxu0 %v8983_v17  ;;  %10528 = vst [vmem:[#allocation67_spill] sm:$0xff] %v9001_v51  ;;  %v9007_v17 = vld [vmem:[%s9709_s7 + $0x8b4] ss:$72 sps:$4 sm:$0xff]  }
 0x837   : > { %10529 = vst [vmem:[#allocation68_spill] sm:$0xff] %v9007_v17 }
 0x839   : > { %3653 = vmatpush1.bf16.msra.mxu0 %v8989_v20  ;;  %v9013_v20 = vld [vmem:[%s9709_s7 + $0x8b0] ss:$72 sps:$4 sm:$0xff]  }
 0x83a   : > { %3654 = vmatprep.subr.bf16.mxu0 %v8995_v21  ;;  %10530 = vst [vmem:[#allocation69_spill] sm:$0xff] %v9013_v20  ;;  %v5411_v21 = vld [vmem:[%s9709_s7 + $0xc] ss:$72 sps:$4 sm:$0xff]  }
 0x83d   : > { %3655 = vmatpush1.bf16.msra.mxu0 %v9001_v51  ;;  %v5412_v51 = vld [vmem:[%s9709_s7 + $0x8] ss:$72 sps:$4 sm:$0xff]  }
 0x83e   : > { %3656 = vmatprep.subr.bf16.mxu0 %v9007_v17  ;;  %v5413_v17 = vld [vmem:[%s9709_s7 + $0x9c] ss:$72 sps:$4 sm:$0xff]  }
 0x841   : > { %3657 = vmatpush1.bf16.msra.mxu0 %v9013_v20  ;;  %v5414_v20 = vld [vmem:[%s9709_s7 + $0x98] ss:$72 sps:$4 sm:$0xff]  }
 0x842   : > { %3800 = vmatprep.subr.bf16.mxu0 %v5411_v21  ;;  %v5415_v21 = vld [vmem:[%s9709_s7 + $0x12c] ss:$72 sps:$4 sm:$0xff]  }
 0x844   : > { %3659 = vmatmul.mubr.bf16.vlgmr.msra.gmra.mrb[64].mxu0 %v8225_v38  ;;  %v5416_v38 = vld [vmem:[%s9709_s7 + $0x128] ss:$72 sps:$4 sm:$0xff]  }
 0x845   : > { %3801 = vmatpush1.bf16.msra.mxu0 %v5412_v51  ;;  %v5417_v51 = vld [vmem:[%s9709_s7 + $0x1bc] ss:$72 sps:$4 sm:$0xff]  }
 0x846   : > { %3802 = vmatprep.subr.bf16.mxu0 %v5413_v17  ;;  %v5418_v17 = vld [vmem:[%s9709_s7 + $0x1b8] ss:$72 sps:$4 sm:$0xff]  }
 0x849   : > { %3803 = vmatpush1.bf16.msra.mxu0 %v5414_v20  ;;  %v5419_v20 = vld [vmem:[%s9709_s7 + $0x24c] ss:$72 sps:$4 sm:$0xff]  }
 0x84a   : > { %3804 = vmatprep.subr.bf16.mxu0 %v5415_v21  ;;  %v5420_v21 = vld [vmem:[%s9709_s7 + $0x248] ss:$72 sps:$4 sm:$0xff]  }
 0x84d   : > { %3805 = vmatpush1.bf16.msra.mxu0 %v5416_v38  ;;  %v5421_v38 = vld [vmem:[%s9709_s7 + $0x2dc] ss:$72 sps:$4 sm:$0xff]  }
 0x84e   : > { %3806 = vmatprep.subr.bf16.mxu0 %v5417_v51 }
 0x851   : > { %3807 = vmatpush1.bf16.msra.mxu0 %v5418_v17 }
 0x852   : > { %3808 = vmatprep.subr.bf16.mxu0 %v5419_v20  ;;  %v5422_v20 = vld [vmem:[%s9709_s7 + $0x2d8] ss:$72 sps:$4 sm:$0xff]  }
 0x855   : > { %3809 = vmatpush1.bf16.msra.mxu0 %v5420_v21 }
 0x856   : > { %3810 = vmatprep.subr.bf16.mxu0 %v5421_v38 }
 0x857   : > { %v3402_v51 = vpop.f32.mrb[52].mxu0  ;;  %v3445_v16 = vpop.f32.mrb[52].mxu1 }
 0x858   : > { %v3404_v14 = vpop.f32.mrb[53].mxu0  ;;  %v3447_v13 = vpop.f32.mrb[53].mxu1 }
 0x859   : > { %v3406_v17 = vpop.f32.mrb[54].mxu0  ;;  %v3449_v25 = vpop.f32.mrb[54].mxu1  ;;  %3811 = vmatpush1.bf16.msra.mxu0 %v5422_v20  ;;  %v5437_v20 = vld [vmem:[%s9709_s7 + $0x75c] ss:$72 sps:$4 sm:$0xff]  }
 0x85a   : > { %v3673_v12 = vpack.c.bf16 %v3406_v17, %v3402_v51  ;;  %v3675_v10 = vpack.c.bf16 %v3449_v25, %v3445_v16  ;;  %v3408_v11 = vpop.f32.mrb[55].mxu0  ;;  %v3451_v21 = vpop.f32.mrb[55].mxu1  ;;  %3812 = vmatprep.subr.bf16.mxu0 %v5423_v15  ;;  %v5425_v25 = vld [vmem:[%s9709_s7 + $0x3fc] ss:$72 sps:$4 sm:$0xff]   ;;  %v5426_v16 = vld [vmem:[%s9709_s7 + $0x3f8] ss:$72 sps:$4 sm:$0xff]  }
 0x85b   : > { %v3674_v38 = vpack.c.bf16 %v3408_v11, %v3404_v14  ;;  %v3676_v37 = vpack.c.bf16 %v3451_v21, %v3447_v13  ;;  %v5427_v15 = vld [vmem:[%s9709_s7 + $0x48c] ss:$72 sps:$4 sm:$0xff]   ;;  %v5430_v11 = vld [vmem:[%s9709_s7 + $0x518] ss:$72 sps:$4 sm:$0xff]   ;;  %v5433_v13 = vld [vmem:[%s9709_s7 + $0x63c] ss:$72 sps:$4 sm:$0xff]  }
 0x85c   : > { %v5434_v14 = vld [vmem:[%s9709_s7 + $0x638] ss:$72 sps:$4 sm:$0xff]   ;;  %v5435_v51 = vld [vmem:[%s9709_s7 + $0x6cc] ss:$72 sps:$4 sm:$0xff]   ;;  %v5436_v17 = vld [vmem:[%s9709_s7 + $0x6c8] ss:$72 sps:$4 sm:$0xff]  }
 0x85d   : > { %3702 = vmatprep.subr.bf16.mxu1 %v3674_v38  ;;  %3813 = vmatpush1.bf16.msra.mxu0 %v5424_v19  ;;  %v5428_v19 = vld [vmem:[%s9709_s7 + $0x488] ss:$72 sps:$4 sm:$0xff]   ;;  %v5438_v21 = vld [vmem:[%s9709_s7 + $0x758] ss:$72 sps:$4 sm:$0xff]   ;;  %v5439_v38 = vld [vmem:[%s9709_s7 + $0x7ec] ss:$72 sps:$4 sm:$0xff]  }
 0x85e   : > { %3703 = vmatpush1.bf16.msra.mxu1 %v3673_v12  ;;  %3814 = vmatprep.subr.bf16.mxu0 %v5425_v25  ;;  %v5432_v12 = vld [vmem:[%s9709_s7 + $0x5a8] ss:$72 sps:$4 sm:$0xff]  }
 0x85f   : > { %3704 = vmatprep.subr.bf16.mxu1 %v3676_v37  ;;  %v5429_v37 = vld [vmem:[%s9709_s7 + $0x51c] ss:$72 sps:$4 sm:$0xff]   ;;  %v5440_v25 = vld [vmem:[%s9709_s7 + $0x7e8] ss:$72 sps:$4 sm:$0xff]  }
 0x861   : > { %3815 = vmatpush1.bf16.msra.mxu0 %v5426_v16  ;;  %v5441_v16 = vld [vmem:[%s9709_s7 + $0x87c] ss:$72 sps:$4 sm:$0xff]  }
 0x862   : > { %3705 = vmatpush1.bf16.msra.mxu1 %v3675_v10  ;;  %3816 = vmatprep.subr.bf16.mxu0 %v5427_v15  ;;  %v5431_v10 = vld [vmem:[%s9709_s7 + $0x5ac] ss:$72 sps:$4 sm:$0xff]   ;;  %v5442_v15 = vld [vmem:[%s9709_s7 + $0x878] ss:$72 sps:$4 sm:$0xff]  }
 0x865   : > { %3817 = vmatpush1.bf16.msra.mxu0 %v5428_v19  ;;  %v5443_v19 = vld [vmem:[%s9709_s7 + $0x1c] ss:$72 sps:$4 sm:$0xff]  }
 0x866   : > { %3818 = vmatprep.subr.bf16.mxu0 %v5429_v37 }
 0x869   : > { %3819 = vmatpush1.bf16.msra.mxu0 %v5430_v11 }
 0x86a   : > { %3820 = vmatprep.subr.bf16.mxu0 %v5431_v10 }
 0x86d   : > { %3821 = vmatpush1.bf16.msra.mxu0 %v5432_v12 }
 0x86e   : > { %3822 = vmatprep.subr.bf16.mxu0 %v5433_v13 }
 0x871   : > { %3823 = vmatpush1.bf16.msra.mxu0 %v5434_v14 }
 0x872   : > { %3824 = vmatprep.subr.bf16.mxu0 %v5435_v51 }
 0x875   : > { %3825 = vmatpush1.bf16.msra.mxu0 %v5436_v17 }
 0x876   : > { %3826 = vmatprep.subr.bf16.mxu0 %v5437_v20 }
 0x879   : > { %3827 = vmatpush1.bf16.msra.mxu0 %v5438_v21 }
 0x87a   : > { %3828 = vmatprep.subr.bf16.mxu0 %v5439_v38 }
 0x87d   : > { %3829 = vmatpush1.bf16.msra.mxu0 %v5440_v25 }
 0x87e   : > { %3830 = vmatprep.subr.bf16.mxu0 %v5441_v16  ;;  %v4630_v16 = vld [vmem:[%s9707_s5 + $0x10] sm:$0xff] }
 0x87f   : > { %v4631_v23 = vcombine.low %v4630_v16, %v4630_v16 }
 0x881   : > { %3831 = vmatpush1.bf16.msra.mxu0 %v5442_v15  ;;  %v4632_v15 = vcombine.high %v4630_v16, %v4630_v16  ;;  %v5450_v16 = vld [vmem:[%s9709_s7 + $0x1b4] ss:$72 sps:$4 sm:$0xff]  }
 0x882   : > { %3886 = vmatprep.subr.bf16.mxu0 %v5443_v19 }
 0x883   : > { %4633 = vmatprep.mubr.msk.bf16.mxu1 %vm2744_vm4, %v4632_v15 }
 0x897   : > { %v3488_v37 = vpop.f32.mrb[56].mxu0 }
 0x898   : > { %v3531_v11 = vpop.f32.mrb[56].mxu1  ;;  %v3490_v10 = vpop.f32.mrb[57].mxu0 }
 0x899   : > { %v3533_v12 = vpop.f32.mrb[57].mxu1  ;;  %v3492_v13 = vpop.f32.mrb[58].mxu0 }
 0x89a   : > { %v3677_v14 = vpack.c.bf16 %v3492_v13, %v3488_v37  ;;  %v3535_v51 = vpop.f32.mrb[58].mxu1  ;;  %v3494_v17 = vpop.f32.mrb[59].mxu0 }
 0x89b   : > { %v3679_v20 = vpack.c.bf16 %v3535_v51, %v3531_v11  ;;  %v3678_v21 = vpack.c.bf16 %v3494_v17, %v3490_v10  ;;  %v3537_v38 = vpop.f32.mrb[59].mxu1 }
 0x89c   : > { %v3680_v25 = vpack.c.bf16 %v3537_v38, %v3533_v12 }
 0x89d   : > { %3706 = vmatprep.subr.bf16.mxu1 %v3678_v21 }
 0x89e   : > { %3707 = vmatpush1.bf16.msra.mxu1 %v3677_v14 }
 0x89f   : > { %3708 = vmatprep.subr.bf16.mxu1 %v3680_v25 }
 0x8a2   : > { %3709 = vmatpush1.bf16.msra.mxu1 %v3679_v20 }
 0x8d7   : > { %v3574_v19 = vpop.f32.mrb[60].mxu0 }
 0x8d8   : > { %v3617_v18 = vpop.f32.mrb[60].mxu1  ;;  %v3576_v37 = vpop.f32.mrb[61].mxu0 }
 0x8d9   : > { %v3619_v13 = vpop.f32.mrb[61].mxu1  ;;  %v3578_v40 = vpop.f32.mrb[62].mxu0 }
 0x8da   : > { %v3681_v11 = vpack.c.bf16 %v3578_v40, %v3574_v19  ;;  %v3621_v10 = vpop.f32.mrb[62].mxu1  ;;  %v3580_v51 = vpop.f32.mrb[63].mxu0  ;;  %v5444_v40 = vld [vmem:[%s9709_s7 + $0x4] ss:$72 sps:$4 sm:$0xff]   ;;  %v5446_v19 = vld [vmem:[%s9709_s7 + $0x94] ss:$72 sps:$4 sm:$0xff]  }
 0x8db   : > { %v3683_v12 = vpack.c.bf16 %v3621_v10, %v3617_v18  ;;  %v3682_v17 = vpack.c.bf16 %v3580_v51, %v3576_v37  ;;  %v3623_v14 = vpop.f32.mrb[63].mxu1  ;;  %v5445_v18 = vld [vmem:[%s9709_s7] ss:$72 sps:$4 sm:$0xff]   ;;  %v5451_v37 = vld [vmem:[%s9709_s7 + $0x1b0] ss:$72 sps:$4 sm:$0xff]  }
 0x8dc   : > { %v3684_v21 = vpack.c.bf16 %v3623_v14, %v3619_v13  ;;  %v5452_v13 = vld [vmem:[%s9709_s7 + $0x244] ss:$72 sps:$4 sm:$0xff]   ;;  %v5454_v10 = vld [vmem:[%s9709_s7 + $0x2d4] ss:$72 sps:$4 sm:$0xff]   ;;  %v5455_v51 = vld [vmem:[%s9709_s7 + $0x2d0] ss:$72 sps:$4 sm:$0xff]  }
 0x8dd   : > { %3710 = vmatprep.subr.bf16.mxu1 %v3682_v17  ;;  %v5457_v17 = vld [vmem:[%s9709_s7 + $0x360] ss:$72 sps:$4 sm:$0xff]   ;;  %v5458_v14 = vld [vmem:[%s9709_s7 + $0x3f4] ss:$72 sps:$4 sm:$0xff]  }
 0x8de   : > { %3711 = vmatpush1.bf16.msra.mxu1 %v3681_v11  ;;  %v5453_v11 = vld [vmem:[%s9709_s7 + $0x240] ss:$72 sps:$4 sm:$0xff]  }
 0x8df   : > { %3712 = vmatprep.subr.bf16.mxu1 %v3684_v21  ;;  %v5459_v21 = vld [vmem:[%s9709_s7 + $0x3f0] ss:$72 sps:$4 sm:$0xff]  }
 0x8e2   : > { %3713 = vmatpush1.bf16.msra.mxu1 %v3683_v12  ;;  %v5456_v12 = vld [vmem:[%s9709_s7 + $0x364] ss:$72 sps:$4 sm:$0xff]  }
 0x917   : > { %v3660_v38 = vpop.f32.mrb[64].mxu0 }
 0x918   : > { %v3662_v25 = vpop.f32.mrb[65].mxu0 }
 0x919   : > { %v3664_v15 = vpop.f32.mrb[66].mxu0 }
 0x91a   : > { %v3685_v20 = vpack.c.bf16 %v3664_v15, %v3660_v38  ;;  %v3666_v22 = vpop.f32.mrb[67].mxu0  ;;  %v5460_v38 = vld [vmem:[%s9709_s7 + $0x484] ss:$72 sps:$4 sm:$0xff]   ;;  %v5462_v15 = vld [vmem:[%s9709_s7 + $0x514] ss:$72 sps:$4 sm:$0xff]  }
 0x91b   : > { %v3686_v24 = vpack.c.bf16 %v3666_v22, %v3662_v25  ;;  %v5448_v22 = vld [vmem:[%s9709_s7 + $0x124] ss:$72 sps:$4 sm:$0xff]   ;;  %v5461_v25 = vld [vmem:[%s9709_s7 + $0x480] ss:$72 sps:$4 sm:$0xff]  }
 0x91d   : > { %3714 = vmatprep.subr.bf16.mxu1 %v3686_v24  ;;  %v5447_v24 = vld [vmem:[%s9709_s7 + $0x90] ss:$72 sps:$4 sm:$0xff]  }
 0x91e   : > { %3715 = vmatpush1.bf16.msra.mxu1 %v3685_v20  ;;  %v5463_v20 = vld [vmem:[%s9709_s7 + $0x510] ss:$72 sps:$4 sm:$0xff]  }
 0x91f   : > { %3757 = vmatprep.subr.bf16.mxu1 %v5444_v40  ;;  %v5464_v40 = vld [vmem:[%s9709_s7 + $0x5a4] ss:$72 sps:$4 sm:$0xff]  }
 0x921   : > { %3731 = vmatmul.mubr.bf16.vlgmr.msra.gmra.mrb[64].mxu1 %v4631_v23  ;;  %v5449_v23 = vld [vmem:[%s9709_s7 + $0x120] ss:$72 sps:$4 sm:$0xff]  }
 0x922   : > { %3758 = vmatpush1.bf16.msra.mxu1 %v5445_v18  ;;  %v5465_v18 = vld [vmem:[%s9709_s7 + $0x5a0] ss:$72 sps:$4 sm:$0xff]  }
 0x923   : > { %3759 = vmatprep.subr.bf16.mxu1 %v5446_v19  ;;  %v5466_v19 = vld [vmem:[%s9709_s7 + $0x634] ss:$72 sps:$4 sm:$0xff]  }
 0x926   : > { %3760 = vmatpush1.bf16.msra.mxu1 %v5447_v24  ;;  %v5467_v24 = vld [vmem:[%s9709_s7 + $0x630] ss:$72 sps:$4 sm:$0xff]  }
 0x927   : > { %3761 = vmatprep.subr.bf16.mxu1 %v5448_v22  ;;  %v5468_v22 = vld [vmem:[%s9709_s7 + $0x6c4] ss:$72 sps:$4 sm:$0xff]  }
 0x92a   : > { %3762 = vmatpush1.bf16.msra.mxu1 %v5449_v23  ;;  %v5469_v23 = vld [vmem:[%s9709_s7 + $0x6c0] ss:$72 sps:$4 sm:$0xff]  }
 0x92b   : > { %3763 = vmatprep.subr.bf16.mxu1 %v5450_v16  ;;  %v5470_v16 = vld [vmem:[%s9709_s7 + $0x754] ss:$72 sps:$4 sm:$0xff]  }
 0x92e   : > { %3764 = vmatpush1.bf16.msra.mxu1 %v5451_v37  ;;  %v5471_v37 = vld [vmem:[%s9709_s7 + $0x750] ss:$72 sps:$4 sm:$0xff]  }
 0x92f   : > { %3765 = vmatprep.subr.bf16.mxu1 %v5452_v13  ;;  %v5472_v13 = vld [vmem:[%s9709_s7 + $0x7e4] ss:$72 sps:$4 sm:$0xff]  }
 0x932   : > { %3766 = vmatpush1.bf16.msra.mxu1 %v5453_v11  ;;  %v5473_v11 = vld [vmem:[%s9709_s7 + $0x7e0] ss:$72 sps:$4 sm:$0xff]  }
 0x933   : > { %3767 = vmatprep.subr.bf16.mxu1 %v5454_v10  ;;  %v5474_v10 = vld [vmem:[%s9709_s7 + $0x874] ss:$72 sps:$4 sm:$0xff]  }
 0x936   : > { %3768 = vmatpush1.bf16.msra.mxu1 %v5455_v51  ;;  %v5475_v51 = vld [vmem:[%s9709_s7 + $0x870] ss:$72 sps:$4 sm:$0xff]  }
 0x937   : > { %3769 = vmatprep.subr.bf16.mxu1 %v5456_v12  ;;  %v5476_v12 = vld [vmem:[%s9709_s7 + $0x14] ss:$72 sps:$4 sm:$0xff]  }
 0x93a   : > { %3770 = vmatpush1.bf16.msra.mxu1 %v5457_v17 }
 0x93b   : > { %3771 = vmatprep.subr.bf16.mxu1 %v5458_v14 }
 0x93e   : > { %3772 = vmatpush1.bf16.msra.mxu1 %v5459_v21 }
 0x93f   : > { %3773 = vmatprep.subr.bf16.mxu1 %v5460_v38 }
 0x942   : > { %3774 = vmatpush1.bf16.msra.mxu1 %v5461_v25 }
 0x943   : > { %3775 = vmatprep.subr.bf16.mxu1 %v5462_v15 }
 0x946   : > { %3776 = vmatpush1.bf16.msra.mxu1 %v5463_v20 }
 0x947   : > { %3777 = vmatprep.subr.bf16.mxu1 %v5464_v40 }
 0x94a   : > { %3778 = vmatpush1.bf16.msra.mxu1 %v5465_v18 }
 0x94b   : > { %3779 = vmatprep.subr.bf16.mxu1 %v5466_v19 }
 0x94e   : > { %3780 = vmatpush1.bf16.msra.mxu1 %v5467_v24 }
 0x94f   : > { %3781 = vmatprep.subr.bf16.mxu1 %v5468_v22 }
 0x952   : > { %3782 = vmatpush1.bf16.msra.mxu1 %v5469_v23  ;;  %v5477_v23 = vld [vmem:[%s9709_s7 + $0x10] ss:$72 sps:$4 sm:$0xff]  }
 0x953   : > { %3783 = vmatprep.subr.bf16.mxu1 %v5470_v16  ;;  %v5480_v16 = vld [vmem:[%s9709_s7 + $0xac] ss:$72 sps:$4 sm:$0xff]  }
 0x956   : > { %3784 = vmatpush1.bf16.msra.mxu1 %v5471_v37  ;;  %v5481_v37 = vld [vmem:[%s9709_s7 + $0xa0] ss:$72 sps:$4 sm:$0xff]  }
 0x957   : > { %3785 = vmatprep.subr.bf16.mxu1 %v5472_v13  ;;  %v5482_v13 = vld [vmem:[%s9709_s7 + $0xa8] ss:$72 sps:$4 sm:$0xff]  }
 0x95a   : > { %3786 = vmatpush1.bf16.msra.mxu1 %v5473_v11  ;;  %v5483_v11 = vld [vmem:[%s9709_s7 + $0x134] ss:$72 sps:$4 sm:$0xff]  }
 0x95b   : > { %3787 = vmatprep.subr.bf16.mxu1 %v5474_v10  ;;  %v5484_v10 = vld [vmem:[%s9709_s7 + $0x13c] ss:$72 sps:$4 sm:$0xff]  }
 0x95e   : > { %3788 = vmatpush1.bf16.msra.mxu1 %v5475_v51  ;;  %v5485_v51 = vld [vmem:[%s9709_s7 + $0x130] ss:$72 sps:$4 sm:$0xff]  }
 0x95f   : > { %3843 = vmatprep.subr.bf16.mxu1 %v5476_v12  ;;  %v5486_v12 = vld [vmem:[%s9709_s7 + $0x138] ss:$72 sps:$4 sm:$0xff]  }
 0x9f4   : > { %v3732_v17 = vpop.f32.mrb[64].mxu1 }
 0x9f5   : > { %v4634_v14 = vclamps-f32 %v3732_v17, 1.0  ;;  %4220 = vst [vmem:[%s5668_s23 + $0x20] sm:$0xff] %v3732_v17  ;;  %v3734_v21 = vpop.f32.mrb[65].mxu1  ;;  %v5487_v17 = vld [vmem:[%s9709_s7 + $0x1c4] ss:$72 sps:$4 sm:$0xff]  }
 0x9f6   : > { %v4635_v38 = vclamps-f32 %v3734_v21, 1.0  ;;  %4221 = vst [vmem:[%s5668_s23 + $0x28] sm:$0xff] %v3734_v21  ;;  %v3736_v25 = vpop.f32.mrb[66].mxu1  ;;  %v5489_v21 = vld [vmem:[%s9709_s7 + $0x1c0] ss:$72 sps:$4 sm:$0xff]  }
 0x9f7   : > { %v3743_v15 = vpack.c.bf16 %v4634_v14, %v4634_v14  ;;  %v3737_v20 = vpop.f32.mrb[67].mxu1  ;;  %v5488_v14 = vld [vmem:[%s9709_s7 + $0x1cc] ss:$72 sps:$4 sm:$0xff]  }
 0x9f8   : > { %v3744_v40 = vpack.c.bf16 %v4635_v38, %v4635_v38  ;;  %v5490_v38 = vld [vmem:[%s9709_s7 + $0x1c8] ss:$72 sps:$4 sm:$0xff]   ;;  %v5491_v25 = vld [vmem:[%s9709_s7 + $0x254] ss:$72 sps:$4 sm:$0xff]  }
 0x9f9   : > { %v3747_v18 = vrot.slane %v3743_v15, 4  ;;  %v5492_v15 = vld [vmem:[%s9709_s7 + $0x25c] ss:$72 sps:$4 sm:$0xff]   ;;  %v5493_v20 = vld [vmem:[%s9709_s7 + $0x250] ss:$72 sps:$4 sm:$0xff]  }
 0x9fa   : > { %v3748_v19 = vrot.slane %v3744_v40, 4  ;;  %v5494_v40 = vld [vmem:[%s9709_s7 + $0x258] ss:$72 sps:$4 sm:$0xff]  }
 0x9fb   : > { %v9227_v22 = vsel %vm350_vm1, %v8213_v36, %v3747_v18  ;;  %v5479_v36 = vld [vmem:[%s9709_s7 + $0xa4] ss:$72 sps:$4 sm:$0xff]  }
 0x9fc   : > { %v9223_v24 = vsel %vm350_vm1, %v8215_v48, %v3748_v19  ;;  %v5478_v48 = vld [vmem:[%s9709_s7 + $0x18] ss:$72 sps:$4 sm:$0xff]   ;;  %v5495_v18 = vld [vmem:[%s9709_s7 + $0x2e4] ss:$72 sps:$4 sm:$0xff]  }
 0x9fd   : > { %3789 = vmatprep.mubr.bf16.mxu1 %v9223_v24  ;;  %3832 = vmatprep.mubr.bf16.mxu0 %v9223_v24  ;;  %v5496_v19 = vld [vmem:[%s9709_s7 + $0x2ec] ss:$72 sps:$4 sm:$0xff]  }
 0x9fe   : > { %3790 = vmatmul.mubr.bf16.vlgmr.msra.gmra.mrb[68].mxu1 %v9227_v22  ;;  %3833 = vmatmul.mubr.bf16.vlgmr.msra.gmra.mrb[68].mxu0 %v9227_v22 }
 0x9ff   : > { %3844 = vmatpush1.bf16.msra.mxu1 %v5477_v23  ;;  %3887 = vmatpush1.bf16.msra.mxu0 %v5478_v48  ;;  %v5497_v23 = vld [vmem:[%s9709_s7 + $0x2e0] ss:$72 sps:$4 sm:$0xff]  }
 0xa00   : > { %3875 = vmatprep.mubr.bf16.mxu1 %v9223_v24  ;;  %3918 = vmatprep.mubr.bf16.mxu0 %v9223_v24  ;;  %v5498_v48 = vld [vmem:[%s9709_s7 + $0x2e8] ss:$72 sps:$4 sm:$0xff]  }
 0xa01   : > { %3845 = vmatprep.subr.bf16.mxu1 %v5479_v36  ;;  %3888 = vmatprep.subr.bf16.mxu0 %v5480_v16  ;;  %v5499_v36 = vld [vmem:[%s9709_s7 + $0x374] ss:$72 sps:$4 sm:$0xff]  }
 0xa02   : > { %v5500_v16 = vld [vmem:[%s9709_s7 + $0x37c] ss:$72 sps:$4 sm:$0xff]  }
 0xa03   : > { %3846 = vmatpush1.bf16.msra.mxu1 %v5481_v37  ;;  %3889 = vmatpush1.bf16.msra.mxu0 %v5482_v13  ;;  %v5501_v37 = vld [vmem:[%s9709_s7 + $0x370] ss:$72 sps:$4 sm:$0xff]  }
 0xa04   : > { %3847 = vmatprep.subr.bf16.mxu1 %v5483_v11  ;;  %3890 = vmatprep.subr.bf16.mxu0 %v5484_v10  ;;  %v5502_v13 = vld [vmem:[%s9709_s7 + $0x378] ss:$72 sps:$4 sm:$0xff]   ;;  %v5503_v11 = vld [vmem:[%s9709_s7 + $0x404] ss:$72 sps:$4 sm:$0xff]  }
 0xa05   : > { %v5504_v10 = vld [vmem:[%s9709_s7 + $0x40c] ss:$72 sps:$4 sm:$0xff]  }
 0xa07   : > { %3848 = vmatpush1.bf16.msra.mxu1 %v5485_v51  ;;  %3891 = vmatpush1.bf16.msra.mxu0 %v5486_v12  ;;  %v5505_v51 = vld [vmem:[%s9709_s7 + $0x400] ss:$72 sps:$4 sm:$0xff]  }
 0xa08   : > { %3849 = vmatprep.subr.bf16.mxu1 %v5487_v17  ;;  %3892 = vmatprep.subr.bf16.mxu0 %v5488_v14  ;;  %v5506_v12 = vld [vmem:[%s9709_s7 + $0x408] ss:$72 sps:$4 sm:$0xff]   ;;  %v5507_v17 = vld [vmem:[%s9709_s7 + $0x494] ss:$72 sps:$4 sm:$0xff]  }
 0xa09   : > { %v5508_v14 = vld [vmem:[%s9709_s7 + $0x49c] ss:$72 sps:$4 sm:$0xff]  }
 0xa0b   : > { %3850 = vmatpush1.bf16.msra.mxu1 %v5489_v21  ;;  %3893 = vmatpush1.bf16.msra.mxu0 %v5490_v38  ;;  %v5509_v21 = vld [vmem:[%s9709_s7 + $0x490] ss:$72 sps:$4 sm:$0xff]  }
 0xa0c   : > { %3851 = vmatprep.subr.bf16.mxu1 %v5491_v25  ;;  %3894 = vmatprep.subr.bf16.mxu0 %v5492_v15  ;;  %v5510_v38 = vld [vmem:[%s9709_s7 + $0x498] ss:$72 sps:$4 sm:$0xff]   ;;  %v5511_v25 = vld [vmem:[%s9709_s7 + $0x524] ss:$72 sps:$4 sm:$0xff]  }
 0xa0d   : > { %v5512_v15 = vld [vmem:[%s9709_s7 + $0x52c] ss:$72 sps:$4 sm:$0xff]  }
 0xa0f   : > { %3852 = vmatpush1.bf16.msra.mxu1 %v5493_v20  ;;  %3895 = vmatpush1.bf16.msra.mxu0 %v5494_v40  ;;  %v5513_v20 = vld [vmem:[%s9709_s7 + $0x520] ss:$72 sps:$4 sm:$0xff]  }
 0xa10   : > { %3853 = vmatprep.subr.bf16.mxu1 %v5495_v18  ;;  %3896 = vmatprep.subr.bf16.mxu0 %v5496_v19  ;;  %v5514_v40 = vld [vmem:[%s9709_s7 + $0x528] ss:$72 sps:$4 sm:$0xff]   ;;  %v5515_v18 = vld [vmem:[%s9709_s7 + $0x5b4] ss:$72 sps:$4 sm:$0xff]  }
 0xa11   : > { %v5516_v19 = vld [vmem:[%s9709_s7 + $0x5bc] ss:$72 sps:$4 sm:$0xff]  }
 0xa13   : > { %3854 = vmatpush1.bf16.msra.mxu1 %v5497_v23  ;;  %3897 = vmatpush1.bf16.msra.mxu0 %v5498_v48  ;;  %v5517_v23 = vld [vmem:[%s9709_s7 + $0x5b0] ss:$72 sps:$4 sm:$0xff]  }
 0xa14   : > { %3855 = vmatprep.subr.bf16.mxu1 %v5499_v36  ;;  %3898 = vmatprep.subr.bf16.mxu0 %v5500_v16  ;;  %v5518_v48 = vld [vmem:[%s9709_s7 + $0x5b8] ss:$72 sps:$4 sm:$0xff]   ;;  %v5519_v36 = vld [vmem:[%s9709_s7 + $0x644] ss:$72 sps:$4 sm:$0xff]  }
 0xa15   : > { %v5520_v16 = vld [vmem:[%s9709_s7 + $0x64c] ss:$72 sps:$4 sm:$0xff]  }
 0xa17   : > { %3856 = vmatpush1.bf16.msra.mxu1 %v5501_v37  ;;  %3899 = vmatpush1.bf16.msra.mxu0 %v5502_v13  ;;  %v5521_v37 = vld [vmem:[%s9709_s7 + $0x640] ss:$72 sps:$4 sm:$0xff]  }
 0xa18   : > { %3857 = vmatprep.subr.bf16.mxu1 %v5503_v11  ;;  %3900 = vmatprep.subr.bf16.mxu0 %v5504_v10  ;;  %v5522_v13 = vld [vmem:[%s9709_s7 + $0x648] ss:$72 sps:$4 sm:$0xff]   ;;  %v5523_v11 = vld [vmem:[%s9709_s7 + $0x6d4] ss:$72 sps:$4 sm:$0xff]  }
 0xa19   : > { %v5524_v10 = vld [vmem:[%s9709_s7 + $0x6dc] ss:$72 sps:$4 sm:$0xff]  }
 0xa1b   : > { %3858 = vmatpush1.bf16.msra.mxu1 %v5505_v51  ;;  %3901 = vmatpush1.bf16.msra.mxu0 %v5506_v12  ;;  %v5525_v51 = vld [vmem:[%s9709_s7 + $0x6d0] ss:$72 sps:$4 sm:$0xff]  }
 0xa1c   : > { %3859 = vmatprep.subr.bf16.mxu1 %v5507_v17  ;;  %3902 = vmatprep.subr.bf16.mxu0 %v5508_v14  ;;  %v5526_v12 = vld [vmem:[%s9709_s7 + $0x6d8] ss:$72 sps:$4 sm:$0xff]   ;;  %v5527_v17 = vld [vmem:[%s9709_s7 + $0x764] ss:$72 sps:$4 sm:$0xff]  }
 0xa1d   : > { %v5528_v14 = vld [vmem:[%s9709_s7 + $0x76c] ss:$72 sps:$4 sm:$0xff]  }
 0xa1f   : > { %3860 = vmatpush1.bf16.msra.mxu1 %v5509_v21  ;;  %3903 = vmatpush1.bf16.msra.mxu0 %v5510_v38  ;;  %v5529_v21 = vld [vmem:[%s9709_s7 + $0x760] ss:$72 sps:$4 sm:$0xff]  }
 0xa20   : > { %3861 = vmatprep.subr.bf16.mxu1 %v5511_v25  ;;  %3904 = vmatprep.subr.bf16.mxu0 %v5512_v15  ;;  %v5530_v38 = vld [vmem:[%s9709_s7 + $0x768] ss:$72 sps:$4 sm:$0xff]   ;;  %v5531_v25 = vld [vmem:[%s9709_s7 + $0x7f4] ss:$72 sps:$4 sm:$0xff]  }
 0xa21   : > { %v5532_v15 = vld [vmem:[%s9709_s7 + $0x7fc] ss:$72 sps:$4 sm:$0xff]  }
 0xa23   : > { %3862 = vmatpush1.bf16.msra.mxu1 %v5513_v20  ;;  %3905 = vmatpush1.bf16.msra.mxu0 %v5514_v40  ;;  %v5533_v20 = vld [vmem:[%s9709_s7 + $0x7f0] ss:$72 sps:$4 sm:$0xff]  }
 0xa24   : > { %3863 = vmatprep.subr.bf16.mxu1 %v5515_v18  ;;  %3906 = vmatprep.subr.bf16.mxu0 %v5516_v19  ;;  %v5534_v40 = vld [vmem:[%s9709_s7 + $0x7f8] ss:$72 sps:$4 sm:$0xff]   ;;  %v5535_v18 = vld [vmem:[%s9709_s7 + $0x884] ss:$72 sps:$4 sm:$0xff]  }
 0xa25   : > { %v5536_v19 = vld [vmem:[%s9709_s7 + $0x88c] ss:$72 sps:$4 sm:$0xff]  }
 0xa27   : > { %3864 = vmatpush1.bf16.msra.mxu1 %v5517_v23  ;;  %3907 = vmatpush1.bf16.msra.mxu0 %v5518_v48  ;;  %v5537_v23 = vld [vmem:[%s9709_s7 + $0x880] ss:$72 sps:$4 sm:$0xff]  }
 0xa28   : > { %3865 = vmatprep.subr.bf16.mxu1 %v5519_v36  ;;  %3908 = vmatprep.subr.bf16.mxu0 %v5520_v16  ;;  %v5538_v48 = vld [vmem:[%s9709_s7 + $0x888] ss:$72 sps:$4 sm:$0xff]   ;;  %v5539_v36 = vld [vmem:[%s9709_s7 + $0x24] ss:$72 sps:$4 sm:$0xff]  }
 0xa29   : > { %v5540_v16 = vld [vmem:[%s9709_s7 + $0x2c] ss:$72 sps:$4 sm:$0xff]  }
 0xa2b   : > { %3866 = vmatpush1.bf16.msra.mxu1 %v5521_v37  ;;  %3909 = vmatpush1.bf16.msra.mxu0 %v5522_v13  ;;  %v5541_v37 = vld [vmem:[%s9709_s7 + $0x20] ss:$72 sps:$4 sm:$0xff]  }
 0xa2c   : > { %3867 = vmatprep.subr.bf16.mxu1 %v5523_v11  ;;  %3910 = vmatprep.subr.bf16.mxu0 %v5524_v10  ;;  %v5542_v13 = vld [vmem:[%s9709_s7 + $0x28] ss:$72 sps:$4 sm:$0xff]   ;;  %v5543_v11 = vld [vmem:[%s9709_s7 + $0xb4] ss:$72 sps:$4 sm:$0xff]  }
 0xa2d   : > { %v5544_v10 = vld [vmem:[%s9709_s7 + $0xbc] ss:$72 sps:$4 sm:$0xff]  }
 0xa2f   : > { %3868 = vmatpush1.bf16.msra.mxu1 %v5525_v51  ;;  %3911 = vmatpush1.bf16.msra.mxu0 %v5526_v12  ;;  %v5545_v51 = vld [vmem:[%s9709_s7 + $0xb0] ss:$72 sps:$4 sm:$0xff]  }
 0xa30   : > { %3869 = vmatprep.subr.bf16.mxu1 %v5527_v17  ;;  %3912 = vmatprep.subr.bf16.mxu0 %v5528_v14  ;;  %v5546_v12 = vld [vmem:[%s9709_s7 + $0xb8] ss:$72 sps:$4 sm:$0xff]   ;;  %v5547_v17 = vld [vmem:[%s9709_s7 + $0x144] ss:$72 sps:$4 sm:$0xff]  }
 0xa31   : > { %v5548_v14 = vld [vmem:[%s9709_s7 + $0x14c] ss:$72 sps:$4 sm:$0xff]  }
 0xa33   : > { %3870 = vmatpush1.bf16.msra.mxu1 %v5529_v21  ;;  %3913 = vmatpush1.bf16.msra.mxu0 %v5530_v38  ;;  %v5549_v21 = vld [vmem:[%s9709_s7 + $0x140] ss:$72 sps:$4 sm:$0xff]  }
 0xa34   : > { %3871 = vmatprep.subr.bf16.mxu1 %v5531_v25  ;;  %3914 = vmatprep.subr.bf16.mxu0 %v5532_v15  ;;  %v5550_v38 = vld [vmem:[%s9709_s7 + $0x148] ss:$72 sps:$4 sm:$0xff]   ;;  %v5551_v25 = vld [vmem:[%s9709_s7 + $0x1d4] ss:$72 sps:$4 sm:$0xff]  }
 0xa35   : > { %v5552_v15 = vld [vmem:[%s9709_s7 + $0x1dc] ss:$72 sps:$4 sm:$0xff]  }
 0xa37   : > { %3872 = vmatpush1.bf16.msra.mxu1 %v5533_v20  ;;  %3915 = vmatpush1.bf16.msra.mxu0 %v5534_v40  ;;  %v5553_v20 = vld [vmem:[%s9709_s7 + $0x1d0] ss:$72 sps:$4 sm:$0xff]  }
 0xa38   : > { %3873 = vmatprep.subr.bf16.mxu1 %v5535_v18  ;;  %3916 = vmatprep.subr.bf16.mxu0 %v5536_v19  ;;  %v5554_v40 = vld [vmem:[%s9709_s7 + $0x1d8] ss:$72 sps:$4 sm:$0xff]   ;;  %v5555_v18 = vld [vmem:[%s9709_s7 + $0x264] ss:$72 sps:$4 sm:$0xff]  }
 0xa39   : > { %v5556_v19 = vld [vmem:[%s9709_s7 + $0x26c] ss:$72 sps:$4 sm:$0xff]  }
 0xa3b   : > { %3874 = vmatpush1.bf16.msra.mxu1 %v5537_v23  ;;  %3917 = vmatpush1.bf16.msra.mxu0 %v5538_v48  ;;  %v5557_v23 = vld [vmem:[%s9709_s7 + $0x260] ss:$72 sps:$4 sm:$0xff]  }
 0xa3c   : > { %3929 = vmatprep.subr.bf16.mxu1 %v5539_v36  ;;  %3972 = vmatprep.subr.bf16.mxu0 %v5540_v16  ;;  %v5558_v48 = vld [vmem:[%s9709_s7 + $0x268] ss:$72 sps:$4 sm:$0xff]   ;;  %v5559_v36 = vld [vmem:[%s9709_s7 + $0x2f4] ss:$72 sps:$4 sm:$0xff]  }
 0xa3d   : > { %v5560_v16 = vld [vmem:[%s9709_s7 + $0x2fc] ss:$72 sps:$4 sm:$0xff]  }
 0xa3e   : > { %3876 = vmatmul.mubr.bf16.vlgmr.msra.gmra.mrb[72].mxu1 %v9227_v22  ;;  %3919 = vmatmul.mubr.bf16.vlgmr.msra.gmra.mrb[72].mxu0 %v9227_v22 }
 0xa3f   : > { %3930 = vmatpush1.bf16.msra.mxu1 %v5541_v37  ;;  %3961 = vmatprep.mubr.bf16.mxu1 %v9223_v24  ;;  %v5561_v37 = vld [vmem:[%s9709_s7 + $0x2f0] ss:$72 sps:$4 sm:$0xff]  }
 0xa40   : > { %3973 = vmatpush1.bf16.msra.mxu0 %v5542_v13  ;;  %4004 = vmatprep.mubr.bf16.mxu0 %v9223_v24  ;;  %v5562_v13 = vld [vmem:[%s9709_s7 + $0x2f8] ss:$72 sps:$4 sm:$0xff]  }
 0xa41   : > { %3931 = vmatprep.subr.bf16.mxu1 %v5543_v11  ;;  %3974 = vmatprep.subr.bf16.mxu0 %v5544_v10  ;;  %v5563_v11 = vld [vmem:[%s9709_s7 + $0x384] ss:$72 sps:$4 sm:$0xff]  }
 0xa42   : > { %v5564_v10 = vld [vmem:[%s9709_s7 + $0x38c] ss:$72 sps:$4 sm:$0xff]  }
 0xa43   : > { %3932 = vmatpush1.bf16.msra.mxu1 %v5545_v51  ;;  %v5565_v51 = vld [vmem:[%s9709_s7 + $0x380] ss:$72 sps:$4 sm:$0xff]  }
 0xa44   : > { %3975 = vmatpush1.bf16.msra.mxu0 %v5546_v12  ;;  %3933 = vmatprep.subr.bf16.mxu1 %v5547_v17  ;;  %v5566_v12 = vld [vmem:[%s9709_s7 + $0x388] ss:$72 sps:$4 sm:$0xff]   ;;  %v5567_v17 = vld [vmem:[%s9709_s7 + $0x414] ss:$72 sps:$4 sm:$0xff]  }
 0xa45   : > { %3976 = vmatprep.subr.bf16.mxu0 %v5548_v14  ;;  %v5568_v14 = vld [vmem:[%s9709_s7 + $0x41c] ss:$72 sps:$4 sm:$0xff]  }
 0xa47   : > { %3934 = vmatpush1.bf16.msra.mxu1 %v5549_v21  ;;  %v5569_v21 = vld [vmem:[%s9709_s7 + $0x410] ss:$72 sps:$4 sm:$0xff]  }
 0xa48   : > { %3977 = vmatpush1.bf16.msra.mxu0 %v5550_v38  ;;  %3935 = vmatprep.subr.bf16.mxu1 %v5551_v25  ;;  %v5570_v38 = vld [vmem:[%s9709_s7 + $0x418] ss:$72 sps:$4 sm:$0xff]   ;;  %v5571_v25 = vld [vmem:[%s9709_s7 + $0x4a4] ss:$72 sps:$4 sm:$0xff]  }
 0xa49   : > { %3978 = vmatprep.subr.bf16.mxu0 %v5552_v15  ;;  %v5572_v15 = vld [vmem:[%s9709_s7 + $0x4ac] ss:$72 sps:$4 sm:$0xff]  }
 0xa4b   : > { %3936 = vmatpush1.bf16.msra.mxu1 %v5553_v20  ;;  %v5573_v20 = vld [vmem:[%s9709_s7 + $0x4a0] ss:$72 sps:$4 sm:$0xff]  }
 0xa4c   : > { %3979 = vmatpush1.bf16.msra.mxu0 %v5554_v40  ;;  %3937 = vmatprep.subr.bf16.mxu1 %v5555_v18  ;;  %v5574_v40 = vld [vmem:[%s9709_s7 + $0x4a8] ss:$72 sps:$4 sm:$0xff]   ;;  %v5575_v18 = vld [vmem:[%s9709_s7 + $0x534] ss:$72 sps:$4 sm:$0xff]  }
 0xa4d   : > { %3980 = vmatprep.subr.bf16.mxu0 %v5556_v19  ;;  %v5576_v19 = vld [vmem:[%s9709_s7 + $0x53c] ss:$72 sps:$4 sm:$0xff]  }
 0xa4f   : > { %3938 = vmatpush1.bf16.msra.mxu1 %v5557_v23  ;;  %v5577_v23 = vld [vmem:[%s9709_s7 + $0x530] ss:$72 sps:$4 sm:$0xff]  }
 0xa50   : > { %3981 = vmatpush1.bf16.msra.mxu0 %v5558_v48  ;;  %3939 = vmatprep.subr.bf16.mxu1 %v5559_v36  ;;  %v5578_v48 = vld [vmem:[%s9709_s7 + $0x538] ss:$72 sps:$4 sm:$0xff]   ;;  %v5579_v36 = vld [vmem:[%s9709_s7 + $0x5c4] ss:$72 sps:$4 sm:$0xff]  }
 0xa51   : > { %3982 = vmatprep.subr.bf16.mxu0 %v5560_v16  ;;  %v5580_v16 = vld [vmem:[%s9709_s7 + $0x5cc] ss:$72 sps:$4 sm:$0xff]  }
 0xa53   : > { %3940 = vmatpush1.bf16.msra.mxu1 %v5561_v37  ;;  %v5581_v37 = vld [vmem:[%s9709_s7 + $0x5c0] ss:$72 sps:$4 sm:$0xff]  }
 0xa54   : > { %3983 = vmatpush1.bf16.msra.mxu0 %v5562_v13  ;;  %3941 = vmatprep.subr.bf16.mxu1 %v5563_v11  ;;  %v5582_v13 = vld [vmem:[%s9709_s7 + $0x5c8] ss:$72 sps:$4 sm:$0xff]   ;;  %v5583_v11 = vld [vmem:[%s9709_s7 + $0x654] ss:$72 sps:$4 sm:$0xff]  }
 0xa55   : > { %3984 = vmatprep.subr.bf16.mxu0 %v5564_v10  ;;  %v5584_v10 = vld [vmem:[%s9709_s7 + $0x65c] ss:$72 sps:$4 sm:$0xff]  }
 0xa57   : > { %3942 = vmatpush1.bf16.msra.mxu1 %v5565_v51  ;;  %v5585_v51 = vld [vmem:[%s9709_s7 + $0x650] ss:$72 sps:$4 sm:$0xff]  }
 0xa58   : > { %3985 = vmatpush1.bf16.msra.mxu0 %v5566_v12  ;;  %3943 = vmatprep.subr.bf16.mxu1 %v5567_v17  ;;  %v5586_v12 = vld [vmem:[%s9709_s7 + $0x658] ss:$72 sps:$4 sm:$0xff]   ;;  %v5587_v17 = vld [vmem:[%s9709_s7 + $0x6e4] ss:$72 sps:$4 sm:$0xff]  }
 0xa59   : > { %3986 = vmatprep.subr.bf16.mxu0 %v5568_v14  ;;  %v5588_v14 = vld [vmem:[%s9709_s7 + $0x6ec] ss:$72 sps:$4 sm:$0xff]  }
 0xa5b   : > { %3944 = vmatpush1.bf16.msra.mxu1 %v5569_v21  ;;  %v10573_v21 = vld [vmem:[#allocation44_spill] sm:$0xff] }
 0xa5c   : > { %3987 = vmatpush1.bf16.msra.mxu0 %v5570_v38  ;;  %3945 = vmatprep.subr.bf16.mxu1 %v5571_v25  ;;  %v10574_v38 = vld [vmem:[#allocation45_spill] sm:$0xff]  ;;  %v10575_v25 = vld [vmem:[#allocation46_spill] sm:$0xff] }
 0xa5d   : > { %3988 = vmatprep.subr.bf16.mxu0 %v5572_v15  ;;  %v10576_v15 = vld [vmem:[#allocation47_spill] sm:$0xff] }
 0xa5f   : > { %3946 = vmatpush1.bf16.msra.mxu1 %v5573_v20  ;;  %v10577_v20 = vld [vmem:[#allocation48_spill] sm:$0xff] }
 0xa60   : > { %3989 = vmatpush1.bf16.msra.mxu0 %v5574_v40  ;;  %3947 = vmatprep.subr.bf16.mxu1 %v5575_v18 }
 0xa61   : > { %3990 = vmatprep.subr.bf16.mxu0 %v5576_v19 }
 0xa63   : > { %3948 = vmatpush1.bf16.msra.mxu1 %v5577_v23  ;;  %v10578_v23 = vld [vmem:[#allocation49_spill] sm:$0xff] }
 0xa64   : > { %3991 = vmatpush1.bf16.msra.mxu0 %v5578_v48  ;;  %3949 = vmatprep.subr.bf16.mxu1 %v5579_v36 }
 0xa65   : > { %3992 = vmatprep.subr.bf16.mxu0 %v5580_v16 }
 0xa67   : > { %3950 = vmatpush1.bf16.msra.mxu1 %v5581_v37 }
 0xa68   : > { %3993 = vmatpush1.bf16.msra.mxu0 %v5582_v13  ;;  %3951 = vmatprep.subr.bf16.mxu1 %v5583_v11 }
 0xa69   : > { %3994 = vmatprep.subr.bf16.mxu0 %v5584_v10  ;;  %v10579_v10 = vld [vmem:[#allocation50_spill] sm:$0xff] }
 0xa6b   : > { %3952 = vmatpush1.bf16.msra.mxu1 %v5585_v51 }
 0xa6c   : > { %3995 = vmatpush1.bf16.msra.mxu0 %v5586_v12  ;;  %3953 = vmatprep.subr.bf16.mxu1 %v5587_v17  ;;  %v10580_v17 = vld [vmem:[#allocation51_spill] sm:$0xff] }
 0xa6d   : > { %3996 = vmatprep.subr.bf16.mxu0 %v5588_v14  ;;  %v10581_v14 = vld [vmem:[#allocation52_spill] sm:$0xff] }
 0xa6f   : > { %3954 = vmatpush1.bf16.msra.mxu1 %v8352_v41  ;;  %v10531_v41 = vld [vmem:[#allocation2_spill] sm:$0xff] }
 0xa70   : > { %3997 = vmatpush1.bf16.msra.mxu0 %v8358_v42  ;;  %3955 = vmatprep.subr.bf16.mxu1 %v8364_v35  ;;  %v10532_v42 = vld [vmem:[#allocation3_spill] sm:$0xff]  ;;  %v10533_v35 = vld [vmem:[#allocation4_spill] sm:$0xff] }
 0xa71   : > { %3998 = vmatprep.subr.bf16.mxu0 %v8370_v29  ;;  %v10534_v29 = vld [vmem:[#allocation5_spill] sm:$0xff] }
 0xa73   : > { %3956 = vmatpush1.bf16.msra.mxu1 %v8376_v52  ;;  %v10535_v52 = vld [vmem:[#allocation6_spill] sm:$0xff] }
 0xa74   : > { %3999 = vmatpush1.bf16.msra.mxu0 %v8382_v32  ;;  %3957 = vmatprep.subr.bf16.mxu1 %v8388_v44  ;;  %v10536_v32 = vld [vmem:[#allocation7_spill] sm:$0xff]  ;;  %v10537_v44 = vld [vmem:[#allocation8_spill] sm:$0xff] }
 0xa75   : > { %4000 = vmatprep.subr.bf16.mxu0 %v8394_v45  ;;  %v10538_v45 = vld [vmem:[#allocation9_spill] sm:$0xff] }
 0xa77   : > { %3958 = vmatpush1.bf16.msra.mxu1 %v8400_v46  ;;  %v10539_v46 = vld [vmem:[#allocation10_spill] sm:$0xff] }
 0xa78   : > { %4001 = vmatpush1.bf16.msra.mxu0 %v8406_v47  ;;  %3959 = vmatprep.subr.bf16.mxu1 %v8412_v53  ;;  %v10540_v47 = vld [vmem:[#allocation11_spill] sm:$0xff]  ;;  %v10541_v53 = vld [vmem:[#allocation12_spill] sm:$0xff] }
 0xa79   : > { %4002 = vmatprep.subr.bf16.mxu0 %v8418_v49  ;;  %v10542_v49 = vld [vmem:[#allocation13_spill] sm:$0xff] }
 0xa7b   : > { %3960 = vmatpush1.bf16.msra.mxu1 %v8424_v50  ;;  %v10543_v50 = vld [vmem:[#allocation14_spill] sm:$0xff] }
 0xa7c   : > { %4003 = vmatpush1.bf16.msra.mxu0 %v8430_v26  ;;  %4015 = vmatprep.subr.bf16.mxu1 %v8436_v27  ;;  %v10544_v26 = vld [vmem:[#allocation15_spill] sm:$0xff]  ;;  %v10545_v27 = vld [vmem:[#allocation16_spill] sm:$0xff] }
 0xa7d   : > { %4058 = vmatprep.subr.bf16.mxu0 %v8442_v54  ;;  %v10546_v54 = vld [vmem:[#allocation17_spill] sm:$0xff] }
 0xa7e   : > { %3962 = vmatmul.mubr.bf16.vlgmr.msra.gmra.mrb[76].mxu1 %v9227_v22 }
 0xa7f   : > { %4005 = vmatmul.mubr.bf16.vlgmr.msra.gmra.mrb[76].mxu0 %v9227_v22  ;;  %4016 = vmatpush1.bf16.msra.mxu1 %v8450_v55  ;;  %v10547_v55 = vld [vmem:[#allocation18_spill] sm:$0xff] }
 0xa80   : > { %4047 = vmatprep.mubr.bf16.mxu1 %v9223_v24  ;;  %4059 = vmatpush1.bf16.msra.mxu0 %v8457_v34  ;;  %v10548_v34 = vld [vmem:[#allocation19_spill] sm:$0xff] }
 0xa81   : > { %4090 = vmatprep.mubr.bf16.mxu0 %v9223_v24  ;;  %4017 = vmatprep.subr.bf16.mxu1 %v8464_v39  ;;  %v10549_v39 = vld [vmem:[#allocation20_spill] sm:$0xff] }
 0xa82   : > { %4060 = vmatprep.subr.bf16.mxu0 %v8470_v56  ;;  %v10550_v56 = vld [vmem:[#allocation21_spill] sm:$0xff] }
 0xa83   : > { %4018 = vmatpush1.bf16.msra.mxu1 %v8476_v57  ;;  %v10551_v57 = vld [vmem:[#allocation22_spill] sm:$0xff] }
 0xa84   : > { %4061 = vmatpush1.bf16.msra.mxu0 %v8482_v43  ;;  %4019 = vmatprep.subr.bf16.mxu1 %v8488_v28  ;;  %v10552_v43 = vld [vmem:[#allocation23_spill] sm:$0xff]  ;;  %v10553_v28 = vld [vmem:[#allocation24_spill] sm:$0xff] }
 0xa85   : > { %4062 = vmatprep.subr.bf16.mxu0 %v8494_v33  ;;  %v10554_v33 = vld [vmem:[#allocation25_spill] sm:$0xff] }
 0xa87   : > { %4020 = vmatpush1.bf16.msra.mxu1 %v8500_v58  ;;  %v10555_v58 = vld [vmem:[#allocation26_spill] sm:$0xff] }
 0xa88   : > { %4063 = vmatpush1.bf16.msra.mxu0 %v8506_v59  ;;  %4021 = vmatprep.subr.bf16.mxu1 %v8512_v60  ;;  %v10556_v59 = vld [vmem:[#allocation27_spill] sm:$0xff]  ;;  %v10557_v60 = vld [vmem:[#allocation28_spill] sm:$0xff] }
 0xa89   : > { %4064 = vmatprep.subr.bf16.mxu0 %v8518_v61  ;;  %v10558_v61 = vld [vmem:[#allocation29_spill] sm:$0xff] }
 0xa8b   : > { %4022 = vmatpush1.bf16.msra.mxu1 %v8524_v62  ;;  %v10559_v62 = vld [vmem:[#allocation30_spill] sm:$0xff] }
 0xa8c   : > { %4065 = vmatpush1.bf16.msra.mxu0 %v8530_v63  ;;  %4023 = vmatprep.subr.bf16.mxu1 %v8536_v0  ;;  %v10560_v63 = vld [vmem:[#allocation31_spill] sm:$0xff]  ;;  %v10561_v0 = vld [vmem:[#allocation32_spill] sm:$0xff] }
 0xa8d   : > { %4066 = vmatprep.subr.bf16.mxu0 %v8542_v1  ;;  %v10562_v1 = vld [vmem:[#allocation33_spill] sm:$0xff] }
 0xa8f   : > { %4024 = vmatpush1.bf16.msra.mxu1 %v8548_v2  ;;  %v10563_v2 = vld [vmem:[#allocation34_spill] sm:$0xff] }
 0xa90   : > { %4067 = vmatpush1.bf16.msra.mxu0 %v8554_v3  ;;  %4025 = vmatprep.subr.bf16.mxu1 %v8560_v4  ;;  %v10564_v3 = vld [vmem:[#allocation35_spill] sm:$0xff]  ;;  %v10565_v4 = vld [vmem:[#allocation36_spill] sm:$0xff] }
 0xa91   : > { %4068 = vmatprep.subr.bf16.mxu0 %v8566_v5  ;;  %v10566_v5 = vld [vmem:[#allocation37_spill] sm:$0xff] }
 0xa93   : > { %4026 = vmatpush1.bf16.msra.mxu1 %v8572_v6  ;;  %v10567_v6 = vld [vmem:[#allocation38_spill] sm:$0xff] }
 0xa94   : > { %4069 = vmatpush1.bf16.msra.mxu0 %v8578_v7  ;;  %4027 = vmatprep.subr.bf16.mxu1 %v8584_v8  ;;  %v10568_v7 = vld [vmem:[#allocation39_spill] sm:$0xff]  ;;  %v10569_v8 = vld [vmem:[#allocation40_spill] sm:$0xff] }
 0xa95   : > { %4070 = vmatprep.subr.bf16.mxu0 %v8590_v30  ;;  %v10570_v30 = vld [vmem:[#allocation41_spill] sm:$0xff] }
 0xa97   : > { %4028 = vmatpush1.bf16.msra.mxu1 %v8596_v9  ;;  %v10571_v9 = vld [vmem:[#allocation42_spill] sm:$0xff] }
 0xa98   : > { %4071 = vmatpush1.bf16.msra.mxu0 %v8602_v31  ;;  %4029 = vmatprep.subr.bf16.mxu1 %v10531_v41  ;;  %v10572_v31 = vld [vmem:[#allocation43_spill] sm:$0xff]  ;;  %v10582_v41 = vld [vmem:[#allocation53_spill] sm:$0xff] }
 0xa99   : > { %4072 = vmatprep.subr.bf16.mxu0 %v10532_v42  ;;  %v10583_v42 = vld [vmem:[#allocation54_spill] sm:$0xff] }
 0xa9b   : > { %4030 = vmatpush1.bf16.msra.mxu1 %v10533_v35  ;;  %v10584_v35 = vld [vmem:[#allocation55_spill] sm:$0xff] }
 0xa9c   : > { %4073 = vmatpush1.bf16.msra.mxu0 %v10534_v29  ;;  %4031 = vmatprep.subr.bf16.mxu1 %v10535_v52  ;;  %v10585_v29 = vld [vmem:[#allocation56_spill] sm:$0xff]  ;;  %v10586_v52 = vld [vmem:[#allocation57_spill] sm:$0xff] }
 0xa9d   : > { %4074 = vmatprep.subr.bf16.mxu0 %v10536_v32  ;;  %v10587_v32 = vld [vmem:[#allocation58_spill] sm:$0xff] }
 0xa9f   : > { %4032 = vmatpush1.bf16.msra.mxu1 %v10537_v44  ;;  %v10588_v44 = vld [vmem:[#allocation59_spill] sm:$0xff] }
 0xaa0   : > { %4075 = vmatpush1.bf16.msra.mxu0 %v10538_v45  ;;  %4033 = vmatprep.subr.bf16.mxu1 %v10539_v46  ;;  %v10589_v45 = vld [vmem:[#allocation60_spill] sm:$0xff]  ;;  %v10590_v46 = vld [vmem:[#allocation61_spill] sm:$0xff] }
 0xaa1   : > { %4076 = vmatprep.subr.bf16.mxu0 %v10540_v47  ;;  %v10591_v47 = vld [vmem:[#allocation62_spill] sm:$0xff] }
 0xaa3   : > { %4034 = vmatpush1.bf16.msra.mxu1 %v10541_v53  ;;  %v10592_v53 = vld [vmem:[#allocation63_spill] sm:$0xff] }
 0xaa4   : > { %4077 = vmatpush1.bf16.msra.mxu0 %v10542_v49  ;;  %4035 = vmatprep.subr.bf16.mxu1 %v10543_v50  ;;  %v10593_v49 = vld [vmem:[#allocation64_spill] sm:$0xff]  ;;  %v10594_v50 = vld [vmem:[#allocation65_spill] sm:$0xff] }
 0xaa5   : > { %4078 = vmatprep.subr.bf16.mxu0 %v10544_v26  ;;  %v10595_v26 = vld [vmem:[#allocation66_spill] sm:$0xff] }
 0xaa7   : > { %4036 = vmatpush1.bf16.msra.mxu1 %v10545_v27  ;;  %v10596_v27 = vld [vmem:[#allocation67_spill] sm:$0xff] }
 0xaa8   : > { %4079 = vmatpush1.bf16.msra.mxu0 %v10546_v54  ;;  %4037 = vmatprep.subr.bf16.mxu1 %v10547_v55  ;;  %v10597_v54 = vld [vmem:[#allocation68_spill] sm:$0xff]  ;;  %v10598_v55 = vld [vmem:[#allocation69_spill] sm:$0xff] }
 0xaa9   : > { %4080 = vmatprep.subr.bf16.mxu0 %v10548_v34 }
 0xaab   : > { %4038 = vmatpush1.bf16.msra.mxu1 %v10549_v39 }
 0xaac   : > { %4081 = vmatpush1.bf16.msra.mxu0 %v10550_v56  ;;  %4039 = vmatprep.subr.bf16.mxu1 %v10551_v57 }
 0xaad   : > { %4082 = vmatprep.subr.bf16.mxu0 %v10552_v43 }
 0xaaf   : > { %4040 = vmatpush1.bf16.msra.mxu1 %v10553_v28 }
 0xab0   : > { %4083 = vmatpush1.bf16.msra.mxu0 %v10554_v33  ;;  %4041 = vmatprep.subr.bf16.mxu1 %v10555_v58 }
 0xab1   : > { %4084 = vmatprep.subr.bf16.mxu0 %v10556_v59 }
 0xab3   : > { %4042 = vmatpush1.bf16.msra.mxu1 %v10557_v60 }
 0xab4   : > { %4085 = vmatpush1.bf16.msra.mxu0 %v10558_v61  ;;  %4043 = vmatprep.subr.bf16.mxu1 %v10559_v62 }
 0xab5   : > { %4086 = vmatprep.subr.bf16.mxu0 %v10560_v63 }
 0xab7   : > { %4044 = vmatpush1.bf16.msra.mxu1 %v10561_v0 }
 0xab8   : > { %4087 = vmatpush1.bf16.msra.mxu0 %v10562_v1  ;;  %4045 = vmatprep.subr.bf16.mxu1 %v10563_v2 }
 0xab9   : > { %4088 = vmatprep.subr.bf16.mxu0 %v10564_v3 }
 0xabb   : > { %4046 = vmatpush1.bf16.msra.mxu1 %v10565_v4 }
 0xabc   : > { %4089 = vmatpush1.bf16.msra.mxu0 %v10566_v5  ;;  %4101 = vmatprep.subr.bf16.mxu1 %v10567_v6 }
 0xabe   : > { %4048 = vmatmul.mubr.bf16.vlgmr.msra.gmra.mrb[80].mxu1 %v9227_v22 }
 0xabf   : > { %4091 = vmatmul.mubr.bf16.vlgmr.msra.gmra.mrb[80].mxu0 %v9227_v22  ;;  %4102 = vmatpush1.bf16.msra.mxu1 %v10568_v7 }
 0xac0   : > { %4133 = vmatprep.mubr.bf16.mxu1 %v9223_v24  ;;  %4103 = vmatprep.subr.bf16.mxu1 %v10569_v8 }
 0xac3   : > { %4104 = vmatpush1.bf16.msra.mxu1 %v10570_v30 }
 0xac4   : > { %4105 = vmatprep.subr.bf16.mxu1 %v10571_v9  ;;  %v4636_v9 = vld [vmem:[%s9707_s5 + $0x18] sm:$0xff] }
 0xac7   : > { %4106 = vmatpush1.bf16.msra.mxu1 %v10572_v31  ;;  %v4638_v31 = vcombine.high %v4636_v9, %v4636_v9 }
 0xac8   : > { %4107 = vmatprep.subr.bf16.mxu1 %v10573_v21 }
 0xac9   : > { %4639 = vmatprep.mubr.msk.bf16.mxu0 %vm2744_vm4, %v4638_v31 }
 0xacb   : > { %4108 = vmatpush1.bf16.msra.mxu1 %v10574_v38 }
 0xacc   : > { %4109 = vmatprep.subr.bf16.mxu1 %v10575_v25 }
 0xacf   : > { %4110 = vmatpush1.bf16.msra.mxu1 %v10576_v15 }
 0xad0   : > { %4111 = vmatprep.subr.bf16.mxu1 %v10577_v20 }
 0xad1   : > { %v3791_v40 = vpop.f32.mrb[68].mxu1  ;;  %v3834_v24 = vpop.f32.mrb[68].mxu0 }
 0xad2   : > { %v3793_v18 = vpop.f32.mrb[69].mxu1  ;;  %v3836_v19 = vpop.f32.mrb[69].mxu0 }
 0xad3   : > { %4112 = vmatpush1.bf16.msra.mxu1 %v10578_v23  ;;  %v3795_v48 = vpop.f32.mrb[70].mxu1  ;;  %v3838_v36 = vpop.f32.mrb[70].mxu0 }
 0xad4   : > { %v4144_v16 = vpack.c.bf16 %v3795_v48, %v3791_v40  ;;  %v4146_v37 = vpack.c.bf16 %v3838_v36, %v3834_v24  ;;  %v3797_v13 = vpop.f32.mrb[71].mxu1  ;;  %v3840_v11 = vpop.f32.mrb[71].mxu0  ;;  %4113 = vmatprep.subr.bf16.mxu1 %v10579_v10 }
 0xad5   : > { %v4145_v51 = vpack.c.bf16 %v3797_v13, %v3793_v18  ;;  %v4147_v12 = vpack.c.bf16 %v3840_v11, %v3836_v19 }
 0xad7   : > { %4114 = vmatpush1.bf16.msra.mxu1 %v10580_v17  ;;  %4173 = vmatprep.subr.bf16.mxu0 %v4145_v51 }
 0xad8   : > { %4174 = vmatpush1.bf16.msra.mxu0 %v4144_v16  ;;  %4115 = vmatprep.subr.bf16.mxu1 %v10581_v14 }
 0xad9   : > { %4175 = vmatprep.subr.bf16.mxu0 %v4147_v12  ;;  %v4637_v12 = vcombine.low %v4636_v9, %v4636_v9 }
 0xadb   : > { %4116 = vmatpush1.bf16.msra.mxu1 %v10582_v41 }
 0xadc   : > { %4176 = vmatpush1.bf16.msra.mxu0 %v4146_v37  ;;  %4117 = vmatprep.subr.bf16.mxu1 %v10583_v42 }
 0xadf   : > { %4118 = vmatpush1.bf16.msra.mxu1 %v10584_v35 }
 0xae0   : > { %4119 = vmatprep.subr.bf16.mxu1 %v10585_v29 }
 0xae3   : > { %4120 = vmatpush1.bf16.msra.mxu1 %v10586_v52 }
 0xae4   : > { %4121 = vmatprep.subr.bf16.mxu1 %v10587_v32 }
 0xae7   : > { %4122 = vmatpush1.bf16.msra.mxu1 %v10588_v44 }
 0xae8   : > { %4123 = vmatprep.subr.bf16.mxu1 %v10589_v45 }
 0xaeb   : > { %4124 = vmatpush1.bf16.msra.mxu1 %v10590_v46 }
 0xaec   : > { %4125 = vmatprep.subr.bf16.mxu1 %v10591_v47 }
 0xaef   : > { %4126 = vmatpush1.bf16.msra.mxu1 %v10592_v53 }
 0xaf0   : > { %4127 = vmatprep.subr.bf16.mxu1 %v10593_v49 }
 0xaf3   : > { %4128 = vmatpush1.bf16.msra.mxu1 %v10594_v50 }
 0xaf4   : > { %4129 = vmatprep.subr.bf16.mxu1 %v10595_v26 }
 0xaf7   : > { %4130 = vmatpush1.bf16.msra.mxu1 %v10596_v27 }
 0xaf8   : > { %4131 = vmatprep.subr.bf16.mxu1 %v10597_v54 }
 0xafb   : > { %4132 = vmatpush1.bf16.msra.mxu1 %v10598_v55 }
 0xafe   : > { %4134 = vmatmul.mubr.bf16.vlgmr.msra.gmra.mrb[84].mxu1 %v9227_v22 }
 0xb11   : > { %v3877_v34 = vpop.f32.mrb[72].mxu1  ;;  %v3920_v39 = vpop.f32.mrb[72].mxu0 }
 0xb12   : > { %v3879_v56 = vpop.f32.mrb[73].mxu1  ;;  %v3922_v57 = vpop.f32.mrb[73].mxu0 }
 0xb13   : > { %v3881_v43 = vpop.f32.mrb[74].mxu1  ;;  %v3924_v28 = vpop.f32.mrb[74].mxu0 }
 0xb14   : > { %v4148_v33 = vpack.c.bf16 %v3881_v43, %v3877_v34  ;;  %v4150_v58 = vpack.c.bf16 %v3924_v28, %v3920_v39  ;;  %v3883_v59 = vpop.f32.mrb[75].mxu1  ;;  %v3926_v60 = vpop.f32.mrb[75].mxu0 }
 0xb15   : > { %v4149_v61 = vpack.c.bf16 %v3883_v59, %v3879_v56  ;;  %v4151_v62 = vpack.c.bf16 %v3926_v60, %v3922_v57 }
 0xb17   : > { %4177 = vmatprep.subr.bf16.mxu0 %v4149_v61 }
 0xb18   : > { %4178 = vmatpush1.bf16.msra.mxu0 %v4148_v33 }
 0xb19   : > { %4179 = vmatprep.subr.bf16.mxu0 %v4151_v62 }
 0xb1c   : > { %4180 = vmatpush1.bf16.msra.mxu0 %v4150_v58 }
 0xb51   : > { %v3963_v63 = vpop.f32.mrb[76].mxu1 }
 0xb52   : > { %v4006_v0 = vpop.f32.mrb[76].mxu0  ;;  %v3965_v1 = vpop.f32.mrb[77].mxu1 }
 0xb53   : > { %v4008_v22 = vpop.f32.mrb[77].mxu0  ;;  %v3967_v2 = vpop.f32.mrb[78].mxu1 }
 0xb54   : > { %v4152_v3 = vpack.c.bf16 %v3967_v2, %v3963_v63  ;;  %v4010_v4 = vpop.f32.mrb[78].mxu0  ;;  %v3969_v5 = vpop.f32.mrb[79].mxu1 }
 0xb55   : > { %v4154_v6 = vpack.c.bf16 %v4010_v4, %v4006_v0  ;;  %v4153_v7 = vpack.c.bf16 %v3969_v5, %v3965_v1  ;;  %v4012_v8 = vpop.f32.mrb[79].mxu0 }
 0xb56   : > { %v4155_v30 = vpack.c.bf16 %v4012_v8, %v4008_v22 }
 0xb57   : > { %4181 = vmatprep.subr.bf16.mxu0 %v4153_v7 }
 0xb58   : > { %4182 = vmatpush1.bf16.msra.mxu0 %v4152_v3 }
 0xb59   : > { %4183 = vmatprep.subr.bf16.mxu0 %v4155_v30 }
 0xb5c   : > { %4184 = vmatpush1.bf16.msra.mxu0 %v4154_v6 }
 0xb91   : > { %v4049_v21 = vpop.f32.mrb[80].mxu1 }
 0xb92   : > { %v4092_v38 = vpop.f32.mrb[80].mxu0  ;;  %v4051_v25 = vpop.f32.mrb[81].mxu1 }
 0xb93   : > { %v4094_v15 = vpop.f32.mrb[81].mxu0  ;;  %v4053_v20 = vpop.f32.mrb[82].mxu1 }
 0xb94   : > { %v4156_v40 = vpack.c.bf16 %v4053_v20, %v4049_v21  ;;  %v4096_v24 = vpop.f32.mrb[82].mxu0  ;;  %v4055_v18 = vpop.f32.mrb[83].mxu1 }
 0xb95   : > { %v4158_v19 = vpack.c.bf16 %v4096_v24, %v4092_v38  ;;  %v4157_v23 = vpack.c.bf16 %v4055_v18, %v4051_v25  ;;  %v4098_v48 = vpop.f32.mrb[83].mxu0 }
 0xb96   : > { %v4159_v36 = vpack.c.bf16 %v4098_v48, %v4094_v15 }
 0xb97   : > { %4185 = vmatprep.subr.bf16.mxu0 %v4157_v23 }
 0xb98   : > { %4186 = vmatpush1.bf16.msra.mxu0 %v4156_v40 }
 0xb99   : > { %4187 = vmatprep.subr.bf16.mxu0 %v4159_v36 }
 0xb9c   : > { %4188 = vmatpush1.bf16.msra.mxu0 %v4158_v19 }
 0xbd1   : > { %v4135_v16 = vpop.f32.mrb[84].mxu1 }
 0xbd2   : > { %v4137_v37 = vpop.f32.mrb[85].mxu1 }
 0xbd3   : > { %v4139_v13 = vpop.f32.mrb[86].mxu1 }
 0xbd4   : > { %v4160_v11 = vpack.c.bf16 %v4139_v13, %v4135_v16  ;;  %v4141_v10 = vpop.f32.mrb[87].mxu1 }
 0xbd5   : > { %v4161_v51 = vpack.c.bf16 %v4141_v10, %v4137_v37 }
 0xbd7   : > { %4189 = vmatprep.subr.bf16.mxu0 %v4161_v51 }
 0xbd8   : > { %4190 = vmatpush1.bf16.msra.mxu0 %v4160_v11 }
 0xbdb   : > { %4206 = vmatmul.mubr.bf16.vlgmr.msra.gmra.mrb[84].mxu0 %v4637_v12 }
 0xcae   : > { %v4207_v17 = vpop.f32.mrb[84].mxu0 }
 0xcaf   : > { %4222 = vst [vmem:[%s5668_s23 + $0x30] sm:$0xff] %v4207_v17  ;;  %v4209_v14 = vpop.f32.mrb[85].mxu0 }
 0xcb0   : > { %4223 = vst [vmem:[%s5668_s23 + $0x38] sm:$0xff] %v4209_v14  ;;  %v4211_v41 = vpop.f32.mrb[86].mxu0 }
 0xcb1   : > { %v4212_v42 = vpop.f32.mrb[87].mxu0 }
 0xcb2 PF: > { %s18_s27 = sadd.s32 1, %s5595_s27  }
 0xcb3   : > { %p15_p4 = scmp.ge.s32.totalorder %s18_s27, 4  }
 0xcb5   :  { %17 = sbr.rel (!%p15_p4) target bundleno = 1 (0x1), region = 91 }

</bundles_post_ra>
